<compile_context>
chip_gen: v7x
topology: tpu7x:2x2x1
jax: 0.10.0
libtpu: 0.0.40
codegen_flags: <defaults>
</compile_context>

<pallas_src>
import functools

import jax
import jax.numpy as jnp
import numpy as np
from jax.experimental import pallas as pl
from jax.experimental.pallas import tpu as pltpu


# ----------------------------------------------------------------------------
# Pallas kernel: one full (bi)LSTM layer, optionally with the classifier head
# ----------------------------------------------------------------------------
def bilstm_layer_kernel(*refs, T, B, H, bidirectional, with_head):
    """Single-invocation kernel for one LSTM layer (both directions fused).

    refs (in order):
      x_ref:   (T*B, D)        time-major input, flattened over (T, B)
      wih_ref: (D, DIR*4H)     [W_ih_fwd^T | W_ih_bwd^T]
      whh_ref: (H, DIR*4H)     [W_hh_fwd^T | W_hh_bwd^T]
      b_ref:   (1, DIR*4H)     [b_ih_f+b_hh_f | b_ih_b+b_hh_b]
      (wh_ref: (DIR*H, C), bh_ref: (1, C))         -- only if with_head
      out_ref: (T, B, DIR*H)   layer output (hidden states)
      (probs_ref: (B, C))                          -- only if with_head
      xg_sc:   (T*B, DIR*4H)   hoisted input projection (VMEM scratch)
      h_sc:    (DIR*B, H)      hidden state, rows [:B]=fwd, [B:]=bwd
      c_sc:    (DIR*B, H)      cell state
    """
    if with_head:
        (x_ref, wih_ref, whh_ref, b_ref, wh_ref, bh_ref,
         out_ref, probs_ref, xg_sc, h_sc, c_sc) = refs
    else:
        (x_ref, wih_ref, whh_ref, b_ref,
         out_ref, xg_sc, h_sc, c_sc) = refs
        wh_ref = bh_ref = probs_ref = None

    G = 4 * H  # gate block per direction, PyTorch order (i, f, g, o)

    # ---- Hoisted input projection: all timesteps & both directions at once.
    #      (T*B, D) @ (D, DIR*4H) — ~8x better MXU sublane fill than per-step.
    xg_sc[...] = (
        jnp.dot(x_ref[...], wih_ref[...], preferred_element_type=jnp.float32)
        + b_ref[...]
    )

    h_sc[...] = jnp.zeros_like(h_sc)
    c_sc[...] = jnp.zeros_like(c_sc)

    # ---- Recurrence. T is small & static -> fully unrolled straight-line code
    #      with static slices (for large T switch to lax.fori_loop + pl.ds and
    #      chunk the time axis for v7x's smaller VMEM).
    for s in range(T):
        # Both directions' hidden->gate projection in ONE full-width MXU pass:
        # (DIR*B, H) @ (H, DIR*4H); cross-direction blocks are discarded.
        gates_hh = jnp.dot(h_sc[...], whh_ref[...],
                           preferred_element_type=jnp.float32)

        if bidirectional:
            g_f = gates_hh[:B, 0:G] + xg_sc[s * B:(s + 1) * B, 0:G]
            tb = T - 1 - s   # backward direction consumes time in reverse
            g_b = gates_hh[B:, G:2 * G] + xg_sc[tb * B:(tb + 1) * B, G:2 * G]
            gates = jnp.concatenate([g_f, g_b], axis=0)        # (2B, 4H)
        else:
            gates = gates_hh + xg_sc[s * B:(s + 1) * B, :]     # (B, 4H)

        # Two full-vreg transcendental passes instead of eight narrow ones.
        sg = jax.nn.sigmoid(gates)
        tg = jnp.tanh(gates)
        i_g = sg[:, 0:H]
        f_g = sg[:, H:2 * H]
        g_g = tg[:, 2 * H:3 * H]
        o_g = sg[:, 3 * H:4 * H]

        c_new = f_g * c_sc[...] + i_g * g_g
        h_new = o_g * jnp.tanh(c_new)
        c_sc[...] = c_new
        h_sc[...] = h_new

        out_ref[s, :, 0:H] = h_new[:B]                 # fwd hidden at time s
        if bidirectional:
            out_ref[T - 1 - s, :, H:2 * H] = h_new[B:]  # bwd hidden at time T-1-s

    # ---- Fused classifier head (only for the last layer): linear + softmax
    #      on output[-1], read straight from the VMEM output buffer.
    if with_head:
        last = out_ref[T - 1]                                   # (B, DIR*H)
        logits = (jnp.dot(last, wh_ref[...],
                          preferred_element_type=jnp.float32) + bh_ref[...])
        m = jnp.max(logits, axis=-1, keepdims=True)
        e = jnp.exp(logits - m)
        probs_ref[...] = e / jnp.sum(e, axis=-1, keepdims=True)


# ----------------------------------------------------------------------------
# Wrappers
# ----------------------------------------------------------------------------
def bilstm_layer(x, layer_weights, *, bidirectional, head=None):
    """Run one (bi)LSTM layer over time-major x: (T, B, D).

    Returns (T, B, DIR*H), or ((T, B, DIR*H), (B, C)) if `head` is given.
    """
    T, B, D = x.shape
    dirs = ("fwd", "bwd") if bidirectional else ("fwd",)
    DIR = len(dirs)
    H = layer_weights["fwd"][1].shape[1]           # w_hh: (4H, H)

    wih_cat = jnp.concatenate(
        [jnp.transpose(layer_weights[d][0]) for d in dirs], axis=1)  # (D, DIR*4H)
    whh_cat = jnp.concatenate(
        [jnp.transpose(layer_weights[d][1]) for d in dirs], axis=1)  # (H, DIR*4H)
    b_cat = jnp.concatenate(
        [layer_weights[d][2] + layer_weights[d][3] for d in dirs])[None, :]

    inputs = [x.reshape(T * B, D), wih_cat, whh_cat, b_cat]
    vmem_spec = pl.BlockSpec(memory_space=pltpu.MemorySpace.VMEM)
    out_shape = jax.ShapeDtypeStruct((T, B, DIR * H), jnp.float32)
    out_specs = vmem_spec

    with_head = head is not None
    if with_head:
        w_lin, b_lin = head                        # (C, DIR*H), (C,)
        C = w_lin.shape[0]
        inputs += [jnp.transpose(w_lin), b_lin[None, :]]
        out_shape = (out_shape, jax.ShapeDtypeStruct((B, C), jnp.float32))
        out_specs = (vmem_spec, pl.BlockSpec(memory_space=pltpu.MemorySpace.VMEM))

    kernel = functools.partial(bilstm_layer_kernel, T=T, B=B, H=H,
                               bidirectional=bidirectional, with_head=with_head)

    return pl.pallas_call(
        kernel,
        out_shape=out_shape,
        in_specs=[pl.BlockSpec(memory_space=pltpu.MemorySpace.VMEM)] * len(inputs),
        out_specs=out_specs,
        scratch_shapes=[
            pltpu.VMEM((T * B, DIR * 4 * H), jnp.float32),  # hoisted x @ W_ih
            pltpu.VMEM((DIR * B, H), jnp.float32),          # h (fwd rows / bwd rows)
            pltpu.VMEM((DIR * B, H), jnp.float32),          # c
        ],
    )(*inputs)


def lstm_model_forward(batch, params, *, num_layers, bidirectional):
    """batch: (B, T) int32 token ids -> (B, num_class) softmax probs."""
    # Embedding lookup (glue gather) then permute(1, 0, 2) -> time-major.
    emb = jnp.take(params["embeddings"], batch, axis=0)       # (B, T, 300)
    x = jnp.transpose(emb, (1, 0, 2))                         # (T, B, 300)

    probs = None
    for layer in range(num_layers):
        is_last = layer == num_layers - 1
        head = (params["w_lin"], params["b_lin"]) if is_last else None
        res = bilstm_layer(x, params["lstm"][layer],
                           bidirectional=bidirectional, head=head)
        if is_last:
            x, probs = res
        else:
            x = res
        # TODO(synk): inter-layer dropout is a train-time-only op; forward here
        # mirrors eval/inference semantics, so it is intentionally omitted.
    return probs


# ----------------------------------------------------------------------------
# Pure-JAX reference (for correctness sanity check)
# ----------------------------------------------------------------------------
def _ref_layer_dir(x, w_ih, w_hh, b_ih, b_hh):
    H = w_hh.shape[1]
    B = x.shape[1]

    def step(carry, xt):
        h, c = carry
        gates = xt @ w_ih.T + h @ w_hh.T + b_ih + b_hh
        i = jax.nn.sigmoid(gates[:, :H])
        f = jax.nn.sigmoid(gates[:, H:2 * H])
        g = jnp.tanh(gates[:, 2 * H:3 * H])
        o = jax.nn.sigmoid(gates[:, 3 * H:4 * H])
        c = f * c + i * g
        h = o * jnp.tanh(c)
        return (h, c), h

    init = (jnp.zeros((B, H), jnp.float32), jnp.zeros((B, H), jnp.float32))
    _, hs = jax.lax.scan(step, init, x)
    return hs


def ref_forward(batch, params, *, num_layers, bidirectional):
    emb = jnp.take(params["embeddings"], batch, axis=0)
    x = jnp.transpose(emb, (1, 0, 2))
    for layer in range(num_layers):
        lw = params["lstm"][layer]
        fwd = _ref_layer_dir(x, *lw["fwd"])
        if bidirectional:
            bwd = _ref_layer_dir(x[::-1], *lw["bwd"])[::-1]
            x = jnp.concatenate([fwd, bwd], axis=-1)
        else:
            x = fwd
    logits = x[-1] @ params["w_lin"].T + params["b_lin"]
    return jax.nn.softmax(logits, axis=1)


# ----------------------------------------------------------------------------
# Deterministic parameter construction (matches torch module shapes)
# ----------------------------------------------------------------------------
def make_params(key, *, vocab, embed_dim, hidden, num_layers, bidirectional,
                num_class):
    keys = iter(jax.random.split(key, 4 + num_layers * 16))
    k = 1.0 / np.sqrt(hidden)

    def u(shape):
        return jax.random.uniform(next(keys), shape, jnp.float32, -k, k)

    params = {
        "embeddings": jax.random.normal(next(keys), (vocab, embed_dim),
                                        jnp.float32),
        "lstm": [],
    }
    dirt = 2 if bidirectional else 1
    for layer in range(num_layers):
        in_size = embed_dim if layer == 0 else dirt * hidden
        lw = {}
        for d in (("fwd", "bwd") if bidirectional else ("fwd",)):
            lw[d] = (
                u((4 * hidden, in_size)),   # w_ih
                u((4 * hidden, hidden)),    # w_hh
                u((4 * hidden,)),           # b_ih
                u((4 * hidden,)),           # b_hh
            )
        params["lstm"].append(lw)

    lin_k = 1.0 / np.sqrt(dirt * hidden)
    params["w_lin"] = jax.random.uniform(next(keys), (num_class, dirt * hidden),
                                         jnp.float32, -lin_k, lin_k)
    params["b_lin"] = jax.random.uniform(next(keys), (num_class,),
                                         jnp.float32, -lin_k, lin_k)
    return params


# ----------------------------------------------------------------------------
if __name__ == "__main__":
    VOCAB = 50
    EMBED_DIM = 300          # nn.LSTM(input_size=300, ...)
    HIDDEN = 32
    NUM_LAYERS = 2
    BIDIRECTIONAL = True
    NUM_CLASS = 4
    B, T = 2, 8

    key = jax.random.PRNGKey(0)
    pkey, bkey = jax.random.split(key)
    params = make_params(pkey, vocab=VOCAB, embed_dim=EMBED_DIM, hidden=HIDDEN,
                         num_layers=NUM_LAYERS, bidirectional=BIDIRECTIONAL,
                         num_class=NUM_CLASS)
    batch = jax.random.randint(bkey, (B, T), 0, VOCAB, dtype=jnp.int32)

    fwd = jax.jit(functools.partial(lstm_model_forward, num_layers=NUM_LAYERS,
                                    bidirectional=BIDIRECTIONAL))
    probs = jax.block_until_ready(fwd(batch, params))

    ref = jax.block_until_ready(
        ref_forward(batch, params, num_layers=NUM_LAYERS,
                    bidirectional=BIDIRECTIONAL))

    assert probs.shape == (B, NUM_CLASS)
    np.testing.assert_allclose(np.asarray(probs), np.asarray(ref),
                               rtol=1e-4, atol=1e-5)
    np.testing.assert_allclose(np.asarray(probs).sum(axis=1), 1.0,
                               rtol=1e-5, atol=1e-5)
    print("KERNEL_OK")
</pallas_src>

<mosaic_0001>
module attributes {stable_mosaic.version = 11 : i64} {
  func.func @bilstm_layer_kernel(%arg0: memref<16x300xf32, #tpu.memory_space<vmem>>, %arg1: memref<300x256xf32, #tpu.memory_space<vmem>>, %arg2: memref<32x256xf32, #tpu.memory_space<vmem>>, %arg3: memref<1x256xf32, #tpu.memory_space<vmem>>, %arg4: memref<8x2x64xf32, #tpu.memory_space<vmem>>, %arg5: memref<16x256xf32, #tpu.memory_space<vmem>>, %arg6: memref<4x32xf32, #tpu.memory_space<vmem>>, %arg7: memref<4x32xf32, #tpu.memory_space<vmem>>) attributes {dimension_semantics = [], scalar_prefetch = 0 : i64, scratch_operands = 3 : i64, tpu.core_type = #tpu.core_type<tc>} {
    %c0 = arith.constant 0 : index
    %c0_0 = arith.constant 0 : index
    %0 = vector.load %arg0[%c0, %c0_0] : memref<16x300xf32, #tpu.memory_space<vmem>>, vector<16x300xf32>
    %c0_1 = arith.constant 0 : index
    %c0_2 = arith.constant 0 : index
    %1 = vector.load %arg1[%c0_1, %c0_2] : memref<300x256xf32, #tpu.memory_space<vmem>>, vector<300x256xf32>
    %cst = arith.constant dense<0.000000e+00> : vector<16x256xf32>
    %2 = tpu.matmul %0, %1, %cst {dimension_numbers = #tpu.dot_dimension_numbers<[1], [0], [0], [1], [0, 0, 1, 1], [], []>} : vector<16x300xf32>, vector<300x256xf32>, vector<16x256xf32> -> vector<16x256xf32>
    %c0_3 = arith.constant 0 : index
    %c0_4 = arith.constant 0 : index
    %3 = vector.load %arg3[%c0_3, %c0_4] : memref<1x256xf32, #tpu.memory_space<vmem>>, vector<1x256xf32>
    %4 = vector.broadcast %3 : vector<1x256xf32> to vector<16x256xf32>
    %5 = arith.addf %2, %4 : vector<16x256xf32>
    %c0_5 = arith.constant 0 : index
    %c0_6 = arith.constant 0 : index
    %6 = vector.load %arg5[%c0_5, %c0_6] : memref<16x256xf32, #tpu.memory_space<vmem>>, vector<16x256xf32>
    tpu.vector_store %arg5[%c0_5, %c0_6], %5 {strides = array<i32>} : memref<16x256xf32, #tpu.memory_space<vmem>>, vector<16x256xf32>,
    %cst_7 = arith.constant 0.000000e+00 : f32
    %7 = vector.broadcast %cst_7 : f32 to vector<4x32xf32>
    %c0_8 = arith.constant 0 : index
    %c0_9 = arith.constant 0 : index
    %8 = vector.load %arg6[%c0_8, %c0_9] : memref<4x32xf32, #tpu.memory_space<vmem>>, vector<4x32xf32>
    tpu.vector_store %arg6[%c0_8, %c0_9], %7 {strides = array<i32>} : memref<4x32xf32, #tpu.memory_space<vmem>>, vector<4x32xf32>,
    %cst_10 = arith.constant 0.000000e+00 : f32
    %9 = vector.broadcast %cst_10 : f32 to vector<4x32xf32>
    %c0_11 = arith.constant 0 : index
    %c0_12 = arith.constant 0 : index
    %10 = vector.load %arg7[%c0_11, %c0_12] : memref<4x32xf32, #tpu.memory_space<vmem>>, vector<4x32xf32>
    tpu.vector_store %arg7[%c0_11, %c0_12], %9 {strides = array<i32>} : memref<4x32xf32, #tpu.memory_space<vmem>>, vector<4x32xf32>,
    %c0_13 = arith.constant 0 : index
    %c0_14 = arith.constant 0 : index
    %11 = vector.load %arg6[%c0_13, %c0_14] : memref<4x32xf32, #tpu.memory_space<vmem>>, vector<4x32xf32>
    %c0_15 = arith.constant 0 : index
    %c0_16 = arith.constant 0 : index
    %12 = vector.load %arg2[%c0_15, %c0_16] : memref<32x256xf32, #tpu.memory_space<vmem>>, vector<32x256xf32>
    %cst_17 = arith.constant dense<0.000000e+00> : vector<4x256xf32>
    %13 = tpu.matmul %11, %12, %cst_17 {dimension_numbers = #tpu.dot_dimension_numbers<[1], [0], [0], [1], [0, 0, 1, 1], [], []>} : vector<4x32xf32>, vector<32x256xf32>, vector<4x256xf32> -> vector<4x256xf32>
    %14 = vector.extract_strided_slice %13 {offsets = [0, 0], sizes = [2, 128], strides = [1, 1]} : vector<4x256xf32> to vector<2x128xf32>
    %c0_18 = arith.constant 0 : index
    %c0_19 = arith.constant 0 : index
    %15 = vector.load %arg5[%c0_18, %c0_19] : memref<16x256xf32, #tpu.memory_space<vmem>>, vector<2x128xf32>
    %16 = arith.addf %14, %15 : vector<2x128xf32>
    %17 = vector.extract_strided_slice %13 {offsets = [2, 128], sizes = [2, 128], strides = [1, 1]} : vector<4x256xf32> to vector<2x128xf32>
    %c14 = arith.constant 14 : index
    %c128 = arith.constant 128 : index
    %18 = vector.load %arg5[%c14, %c128] : memref<16x256xf32, #tpu.memory_space<vmem>>, vector<2x128xf32>
    %19 = arith.addf %17, %18 : vector<2x128xf32>
    %20 = tpu.concatenate %16, %19 in 0 : vector<2x128xf32>, vector<2x128xf32> -> vector<4x128xf32>
    %21 = arith.negf %20 : vector<4x128xf32>
    %22 = math.exp %21 : vector<4x128xf32>
    %cst_20 = arith.constant 1.000000e+00 : f32
    %23 = vector.broadcast %cst_20 : f32 to vector<4x128xf32>
    %24 = arith.addf %23, %22 : vector<4x128xf32>
    %25 = arith.divf %23, %24 : vector<4x128xf32>
    %26 = math.tanh %20 : vector<4x128xf32>
    %27 = vector.extract_strided_slice %25 {offsets = [0, 0], sizes = [4, 32], strides = [1, 1]} : vector<4x128xf32> to vector<4x32xf32>
    %28 = vector.extract_strided_slice %25 {offsets = [0, 32], sizes = [4, 32], strides = [1, 1]} : vector<4x128xf32> to vector<4x32xf32>
    %29 = vector.extract_strided_slice %26 {offsets = [0, 64], sizes = [4, 32], strides = [1, 1]} : vector<4x128xf32> to vector<4x32xf32>
    %30 = vector.extract_strided_slice %25 {offsets = [0, 96], sizes = [4, 32], strides = [1, 1]} : vector<4x128xf32> to vector<4x32xf32>
    %c0_21 = arith.constant 0 : index
    %c0_22 = arith.constant 0 : index
    %31 = vector.load %arg7[%c0_21, %c0_22] : memref<4x32xf32, #tpu.memory_space<vmem>>, vector<4x32xf32>
    %32 = arith.mulf %28, %31 : vector<4x32xf32>
    %33 = arith.mulf %27, %29 : vector<4x32xf32>
    %34 = arith.addf %32, %33 : vector<4x32xf32>
    %35 = math.tanh %34 : vector<4x32xf32>
    %36 = arith.mulf %30, %35 : vector<4x32xf32>
    %c0_23 = arith.constant 0 : index
    %c0_24 = arith.constant 0 : index
    %37 = vector.load %arg7[%c0_23, %c0_24] : memref<4x32xf32, #tpu.memory_space<vmem>>, vector<4x32xf32>
    tpu.vector_store %arg7[%c0_23, %c0_24], %34 {strides = array<i32>} : memref<4x32xf32, #tpu.memory_space<vmem>>, vector<4x32xf32>,
    %c0_25 = arith.constant 0 : index
    %c0_26 = arith.constant 0 : index
    %38 = vector.load %arg6[%c0_25, %c0_26] : memref<4x32xf32, #tpu.memory_space<vmem>>, vector<4x32xf32>
    tpu.vector_store %arg6[%c0_25, %c0_26], %36 {strides = array<i32>} : memref<4x32xf32, #tpu.memory_space<vmem>>, vector<4x32xf32>,
    %39 = vector.extract_strided_slice %36 {offsets = [0, 0], sizes = [2, 32], strides = [1, 1]} : vector<4x32xf32> to vector<2x32xf32>
    %c0_27 = arith.constant 0 : index
    %c0_28 = arith.constant 0 : index
    %c0_29 = arith.constant 0 : index
    %40 = vector.load %arg4[%c0_27, %c0_28, %c0_29] : memref<8x2x64xf32, #tpu.memory_space<vmem>>, vector<1x2x32xf32>
    %41 = vector.shape_cast %40 : vector<1x2x32xf32> to vector<2x32xf32>
    %42 = vector.shape_cast %39 : vector<2x32xf32> to vector<1x2x32xf32>
    tpu.vector_store %arg4[%c0_27, %c0_28, %c0_29], %42 {strides = array<i32>} : memref<8x2x64xf32, #tpu.memory_space<vmem>>, vector<1x2x32xf32>,
    %43 = vector.extract_strided_slice %36 {offsets = [2, 0], sizes = [2, 32], strides = [1, 1]} : vector<4x32xf32> to vector<2x32xf32>
    %c7 = arith.constant 7 : index
    %c0_30 = arith.constant 0 : index
    %c32 = arith.constant 32 : index
    %44 = vector.load %arg4[%c7, %c0_30, %c32] : memref<8x2x64xf32, #tpu.memory_space<vmem>>, vector<1x2x32xf32>
    %45 = vector.shape_cast %44 : vector<1x2x32xf32> to vector<2x32xf32>
    %46 = vector.shape_cast %43 : vector<2x32xf32> to vector<1x2x32xf32>
    tpu.vector_store %arg4[%c7, %c0_30, %c32], %46 {strides = array<i32>} : memref<8x2x64xf32, #tpu.memory_space<vmem>>, vector<1x2x32xf32>,
    %c0_31 = arith.constant 0 : index
    %c0_32 = arith.constant 0 : index
    %47 = vector.load %arg6[%c0_31, %c0_32] : memref<4x32xf32, #tpu.memory_space<vmem>>, vector<4x32xf32>
    %c0_33 = arith.constant 0 : index
    %c0_34 = arith.constant 0 : index
    %48 = vector.load %arg2[%c0_33, %c0_34] : memref<32x256xf32, #tpu.memory_space<vmem>>, vector<32x256xf32>
    %cst_35 = arith.constant dense<0.000000e+00> : vector<4x256xf32>
    %49 = tpu.matmul %47, %48, %cst_35 {dimension_numbers = #tpu.dot_dimension_numbers<[1], [0], [0], [1], [0, 0, 1, 1], [], []>} : vector<4x32xf32>, vector<32x256xf32>, vector<4x256xf32> -> vector<4x256xf32>
    %50 = vector.extract_strided_slice %49 {offsets = [0, 0], sizes = [2, 128], strides = [1, 1]} : vector<4x256xf32> to vector<2x128xf32>
    %c2 = arith.constant 2 : index
    %c0_36 = arith.constant 0 : index
    %51 = vector.load %arg5[%c2, %c0_36] : memref<16x256xf32, #tpu.memory_space<vmem>>, vector<2x128xf32>
    %52 = arith.addf %50, %51 : vector<2x128xf32>
    %53 = vector.extract_strided_slice %49 {offsets = [2, 128], sizes = [2, 128], strides = [1, 1]} : vector<4x256xf32> to vector<2x128xf32>
    %c12 = arith.constant 12 : index
    %c128_37 = arith.constant 128 : index
    %54 = vector.load %arg5[%c12, %c128_37] : memref<16x256xf32, #tpu.memory_space<vmem>>, vector<2x128xf32>
    %55 = arith.addf %53, %54 : vector<2x128xf32>
    %56 = tpu.concatenate %52, %55 in 0 : vector<2x128xf32>, vector<2x128xf32> -> vector<4x128xf32>
    %57 = arith.negf %56 : vector<4x128xf32>
    %58 = math.exp %57 : vector<4x128xf32>
    %cst_38 = arith.constant 1.000000e+00 : f32
    %59 = vector.broadcast %cst_38 : f32 to vector<4x128xf32>
    %60 = arith.addf %59, %58 : vector<4x128xf32>
    %61 = arith.divf %59, %60 : vector<4x128xf32>
    %62 = math.tanh %56 : vector<4x128xf32>
    %63 = vector.extract_strided_slice %61 {offsets = [0, 0], sizes = [4, 32], strides = [1, 1]} : vector<4x128xf32> to vector<4x32xf32>
    %64 = vector.extract_strided_slice %61 {offsets = [0, 32], sizes = [4, 32], strides = [1, 1]} : vector<4x128xf32> to vector<4x32xf32>
    %65 = vector.extract_strided_slice %62 {offsets = [0, 64], sizes = [4, 32], strides = [1, 1]} : vector<4x128xf32> to vector<4x32xf32>
    %66 = vector.extract_strided_slice %61 {offsets = [0, 96], sizes = [4, 32], strides = [1, 1]} : vector<4x128xf32> to vector<4x32xf32>
    %c0_39 = arith.constant 0 : index
    %c0_40 = arith.constant 0 : index
    %67 = vector.load %arg7[%c0_39, %c0_40] : memref<4x32xf32, #tpu.memory_space<vmem>>, vector<4x32xf32>
    %68 = arith.mulf %64, %67 : vector<4x32xf32>
    %69 = arith.mulf %63, %65 : vector<4x32xf32>
    %70 = arith.addf %68, %69 : vector<4x32xf32>
    %71 = math.tanh %70 : vector<4x32xf32>
    %72 = arith.mulf %66, %71 : vector<4x32xf32>
    %c0_41 = arith.constant 0 : index
    %c0_42 = arith.constant 0 : index
    %73 = vector.load %arg7[%c0_41, %c0_42] : memref<4x32xf32, #tpu.memory_space<vmem>>, vector<4x32xf32>
    tpu.vector_store %arg7[%c0_41, %c0_42], %70 {strides = array<i32>} : memref<4x32xf32, #tpu.memory_space<vmem>>, vector<4x32xf32>,
    %c0_43 = arith.constant 0 : index
    %c0_44 = arith.constant 0 : index
    %74 = vector.load %arg6[%c0_43, %c0_44] : memref<4x32xf32, #tpu.memory_space<vmem>>, vector<4x32xf32>
    tpu.vector_store %arg6[%c0_43, %c0_44], %72 {strides = array<i32>} : memref<4x32xf32, #tpu.memory_space<vmem>>, vector<4x32xf32>,
    %75 = vector.extract_strided_slice %72 {offsets = [0, 0], sizes = [2, 32], strides = [1, 1]} : vector<4x32xf32> to vector<2x32xf32>
    %c1 = arith.constant 1 : index
    %c0_45 = arith.constant 0 : index
    %c0_46 = arith.constant 0 : index
    %76 = vector.load %arg4[%c1, %c0_45, %c0_46] : memref<8x2x64xf32, #tpu.memory_space<vmem>>, vector<1x2x32xf32>
    %77 = vector.shape_cast %76 : vector<1x2x32xf32> to vector<2x32xf32>
    %78 = vector.shape_cast %75 : vector<2x32xf32> to vector<1x2x32xf32>
    tpu.vector_store %arg4[%c1, %c0_45, %c0_46], %78 {strides = array<i32>} : memref<8x2x64xf32, #tpu.memory_space<vmem>>, vector<1x2x32xf32>,
    %79 = vector.extract_strided_slice %72 {offsets = [2, 0], sizes = [2, 32], strides = [1, 1]} : vector<4x32xf32> to vector<2x32xf32>
    %c6 = arith.constant 6 : index
    %c0_47 = arith.constant 0 : index
    %c32_48 = arith.constant 32 : index
    %80 = vector.load %arg4[%c6, %c0_47, %c32_48] : memref<8x2x64xf32, #tpu.memory_space<vmem>>, vector<1x2x32xf32>
    %81 = vector.shape_cast %80 : vector<1x2x32xf32> to vector<2x32xf32>
    %82 = vector.shape_cast %79 : vector<2x32xf32> to vector<1x2x32xf32>
    tpu.vector_store %arg4[%c6, %c0_47, %c32_48], %82 {strides = array<i32>} : memref<8x2x64xf32, #tpu.memory_space<vmem>>, vector<1x2x32xf32>,
    %c0_49 = arith.constant 0 : index
    %c0_50 = arith.constant 0 : index
    %83 = vector.load %arg6[%c0_49, %c0_50] : memref<4x32xf32, #tpu.memory_space<vmem>>, vector<4x32xf32>
    %c0_51 = arith.constant 0 : index
    %c0_52 = arith.constant 0 : index
    %84 = vector.load %arg2[%c0_51, %c0_52] : memref<32x256xf32, #tpu.memory_space<vmem>>, vector<32x256xf32>
    %cst_53 = arith.constant dense<0.000000e+00> : vector<4x256xf32>
    %85 = tpu.matmul %83, %84, %cst_53 {dimension_numbers = #tpu.dot_dimension_numbers<[1], [0], [0], [1], [0, 0, 1, 1], [], []>} : vector<4x32xf32>, vector<32x256xf32>, vector<4x256xf32> -> vector<4x256xf32>
    %86 = vector.extract_strided_slice %85 {offsets = [0, 0], sizes = [2, 128], strides = [1, 1]} : vector<4x256xf32> to vector<2x128xf32>
    %c4 = arith.constant 4 : index
    %c0_54 = arith.constant 0 : index
    %87 = vector.load %arg5[%c4, %c0_54] : memref<16x256xf32, #tpu.memory_space<vmem>>, vector<2x128xf32>
    %88 = arith.addf %86, %87 : vector<2x128xf32>
    %89 = vector.extract_strided_slice %85 {offsets = [2, 128], sizes = [2, 128], strides = [1, 1]} : vector<4x256xf32> to vector<2x128xf32>
    %c10 = arith.constant 10 : index
    %c128_55 = arith.constant 128 : index
    %90 = vector.load %arg5[%c10, %c128_55] : memref<16x256xf32, #tpu.memory_space<vmem>>, vector<2x128xf32>
    %91 = arith.addf %89, %90 : vector<2x128xf32>
    %92 = tpu.concatenate %88, %91 in 0 : vector<2x128xf32>, vector<2x128xf32> -> vector<4x128xf32>
    %93 = arith.negf %92 : vector<4x128xf32>
    %94 = math.exp %93 : vector<4x128xf32>
    %cst_56 = arith.constant 1.000000e+00 : f32
    %95 = vector.broadcast %cst_56 : f32 to vector<4x128xf32>
    %96 = arith.addf %95, %94 : vector<4x128xf32>
    %97 = arith.divf %95, %96 : vector<4x128xf32>
    %98 = math.tanh %92 : vector<4x128xf32>
    %99 = vector.extract_strided_slice %97 {offsets = [0, 0], sizes = [4, 32], strides = [1, 1]} : vector<4x128xf32> to vector<4x32xf32>
    %100 = vector.extract_strided_slice %97 {offsets = [0, 32], sizes = [4, 32], strides = [1, 1]} : vector<4x128xf32> to vector<4x32xf32>
    %101 = vector.extract_strided_slice %98 {offsets = [0, 64], sizes = [4, 32], strides = [1, 1]} : vector<4x128xf32> to vector<4x32xf32>
    %102 = vector.extract_strided_slice %97 {offsets = [0, 96], sizes = [4, 32], strides = [1, 1]} : vector<4x128xf32> to vector<4x32xf32>
    %c0_57 = arith.constant 0 : index
    %c0_58 = arith.constant 0 : index
    %103 = vector.load %arg7[%c0_57, %c0_58] : memref<4x32xf32, #tpu.memory_space<vmem>>, vector<4x32xf32>
    %104 = arith.mulf %100, %103 : vector<4x32xf32>
    %105 = arith.mulf %99, %101 : vector<4x32xf32>
    %106 = arith.addf %104, %105 : vector<4x32xf32>
    %107 = math.tanh %106 : vector<4x32xf32>
    %108 = arith.mulf %102, %107 : vector<4x32xf32>
    %c0_59 = arith.constant 0 : index
    %c0_60 = arith.constant 0 : index
    %109 = vector.load %arg7[%c0_59, %c0_60] : memref<4x32xf32, #tpu.memory_space<vmem>>, vector<4x32xf32>
    tpu.vector_store %arg7[%c0_59, %c0_60], %106 {strides = array<i32>} : memref<4x32xf32, #tpu.memory_space<vmem>>, vector<4x32xf32>,
    %c0_61 = arith.constant 0 : index
    %c0_62 = arith.constant 0 : index
    %110 = vector.load %arg6[%c0_61, %c0_62] : memref<4x32xf32, #tpu.memory_space<vmem>>, vector<4x32xf32>
    tpu.vector_store %arg6[%c0_61, %c0_62], %108 {strides = array<i32>} : memref<4x32xf32, #tpu.memory_space<vmem>>, vector<4x32xf32>,
    %111 = vector.extract_strided_slice %108 {offsets = [0, 0], sizes = [2, 32], strides = [1, 1]} : vector<4x32xf32> to vector<2x32xf32>
    %c2_63 = arith.constant 2 : index
    %c0_64 = arith.constant 0 : index
    %c0_65 = arith.constant 0 : index
    %112 = vector.load %arg4[%c2_63, %c0_64, %c0_65] : memref<8x2x64xf32, #tpu.memory_space<vmem>>, vector<1x2x32xf32>
    %113 = vector.shape_cast %112 : vector<1x2x32xf32> to vector<2x32xf32>
    %114 = vector.shape_cast %111 : vector<2x32xf32> to vector<1x2x32xf32>
    tpu.vector_store %arg4[%c2_63, %c0_64, %c0_65], %114 {strides = array<i32>} : memref<8x2x64xf32, #tpu.memory_space<vmem>>, vector<1x2x32xf32>,
    %115 = vector.extract_strided_slice %108 {offsets = [2, 0], sizes = [2, 32], strides = [1, 1]} : vector<4x32xf32> to vector<2x32xf32>
    %c5 = arith.constant 5 : index
    %c0_66 = arith.constant 0 : index
    %c32_67 = arith.constant 32 : index
    %116 = vector.load %arg4[%c5, %c0_66, %c32_67] : memref<8x2x64xf32, #tpu.memory_space<vmem>>, vector<1x2x32xf32>
    %117 = vector.shape_cast %116 : vector<1x2x32xf32> to vector<2x32xf32>
    %118 = vector.shape_cast %115 : vector<2x32xf32> to vector<1x2x32xf32>
    tpu.vector_store %arg4[%c5, %c0_66, %c32_67], %118 {strides = array<i32>} : memref<8x2x64xf32, #tpu.memory_space<vmem>>, vector<1x2x32xf32>,
    %c0_68 = arith.constant 0 : index
    %c0_69 = arith.constant 0 : index
    %119 = vector.load %arg6[%c0_68, %c0_69] : memref<4x32xf32, #tpu.memory_space<vmem>>, vector<4x32xf32>
    %c0_70 = arith.constant 0 : index
    %c0_71 = arith.constant 0 : index
    %120 = vector.load %arg2[%c0_70, %c0_71] : memref<32x256xf32, #tpu.memory_space<vmem>>, vector<32x256xf32>
    %cst_72 = arith.constant dense<0.000000e+00> : vector<4x256xf32>
    %121 = tpu.matmul %119, %120, %cst_72 {dimension_numbers = #tpu.dot_dimension_numbers<[1], [0], [0], [1], [0, 0, 1, 1], [], []>} : vector<4x32xf32>, vector<32x256xf32>, vector<4x256xf32> -> vector<4x256xf32>
    %122 = vector.extract_strided_slice %121 {offsets = [0, 0], sizes = [2, 128], strides = [1, 1]} : vector<4x256xf32> to vector<2x128xf32>
    %c6_73 = arith.constant 6 : index
    %c0_74 = arith.constant 0 : index
    %123 = vector.load %arg5[%c6_73, %c0_74] : memref<16x256xf32, #tpu.memory_space<vmem>>, vector<2x128xf32>
    %124 = arith.addf %122, %123 : vector<2x128xf32>
    %125 = vector.extract_strided_slice %121 {offsets = [2, 128], sizes = [2, 128], strides = [1, 1]} : vector<4x256xf32> to vector<2x128xf32>
    %c8 = arith.constant 8 : index
    %c128_75 = arith.constant 128 : index
    %126 = vector.load %arg5[%c8, %c128_75] : memref<16x256xf32, #tpu.memory_space<vmem>>, vector<2x128xf32>
    %127 = arith.addf %125, %126 : vector<2x128xf32>
    %128 = tpu.concatenate %124, %127 in 0 : vector<2x128xf32>, vector<2x128xf32> -> vector<4x128xf32>
    %129 = arith.negf %128 : vector<4x128xf32>
    %130 = math.exp %129 : vector<4x128xf32>
    %cst_76 = arith.constant 1.000000e+00 : f32
    %131 = vector.broadcast %cst_76 : f32 to vector<4x128xf32>
    %132 = arith.addf %131, %130 : vector<4x128xf32>
    %133 = arith.divf %131, %132 : vector<4x128xf32>
    %134 = math.tanh %128 : vector<4x128xf32>
    %135 = vector.extract_strided_slice %133 {offsets = [0, 0], sizes = [4, 32], strides = [1, 1]} : vector<4x128xf32> to vector<4x32xf32>
    %136 = vector.extract_strided_slice %133 {offsets = [0, 32], sizes = [4, 32], strides = [1, 1]} : vector<4x128xf32> to vector<4x32xf32>
    %137 = vector.extract_strided_slice %134 {offsets = [0, 64], sizes = [4, 32], strides = [1, 1]} : vector<4x128xf32> to vector<4x32xf32>
    %138 = vector.extract_strided_slice %133 {offsets = [0, 96], sizes = [4, 32], strides = [1, 1]} : vector<4x128xf32> to vector<4x32xf32>
    %c0_77 = arith.constant 0 : index
    %c0_78 = arith.constant 0 : index
    %139 = vector.load %arg7[%c0_77, %c0_78] : memref<4x32xf32, #tpu.memory_space<vmem>>, vector<4x32xf32>
    %140 = arith.mulf %136, %139 : vector<4x32xf32>
    %141 = arith.mulf %135, %137 : vector<4x32xf32>
    %142 = arith.addf %140, %141 : vector<4x32xf32>
    %143 = math.tanh %142 : vector<4x32xf32>
    %144 = arith.mulf %138, %143 : vector<4x32xf32>
    %c0_79 = arith.constant 0 : index
    %c0_80 = arith.constant 0 : index
    %145 = vector.load %arg7[%c0_79, %c0_80] : memref<4x32xf32, #tpu.memory_space<vmem>>, vector<4x32xf32>
    tpu.vector_store %arg7[%c0_79, %c0_80], %142 {strides = array<i32>} : memref<4x32xf32, #tpu.memory_space<vmem>>, vector<4x32xf32>,
    %c0_81 = arith.constant 0 : index
    %c0_82 = arith.constant 0 : index
    %146 = vector.load %arg6[%c0_81, %c0_82] : memref<4x32xf32, #tpu.memory_space<vmem>>, vector<4x32xf32>
    tpu.vector_store %arg6[%c0_81, %c0_82], %144 {strides = array<i32>} : memref<4x32xf32, #tpu.memory_space<vmem>>, vector<4x32xf32>,
    %147 = vector.extract_strided_slice %144 {offsets = [0, 0], sizes = [2, 32], strides = [1, 1]} : vector<4x32xf32> to vector<2x32xf32>
    %c3 = arith.constant 3 : index
    %c0_83 = arith.constant 0 : index
    %c0_84 = arith.constant 0 : index
    %148 = vector.load %arg4[%c3, %c0_83, %c0_84] : memref<8x2x64xf32, #tpu.memory_space<vmem>>, vector<1x2x32xf32>
    %149 = vector.shape_cast %148 : vector<1x2x32xf32> to vector<2x32xf32>
    %150 = vector.shape_cast %147 : vector<2x32xf32> to vector<1x2x32xf32>
    tpu.vector_store %arg4[%c3, %c0_83, %c0_84], %150 {strides = array<i32>} : memref<8x2x64xf32, #tpu.memory_space<vmem>>, vector<1x2x32xf32>,
    %151 = vector.extract_strided_slice %144 {offsets = [2, 0], sizes = [2, 32], strides = [1, 1]} : vector<4x32xf32> to vector<2x32xf32>
    %c4_85 = arith.constant 4 : index
    %c0_86 = arith.constant 0 : index
    %c32_87 = arith.constant 32 : index
    %152 = vector.load %arg4[%c4_85, %c0_86, %c32_87] : memref<8x2x64xf32, #tpu.memory_space<vmem>>, vector<1x2x32xf32>
    %153 = vector.shape_cast %152 : vector<1x2x32xf32> to vector<2x32xf32>
    %154 = vector.shape_cast %151 : vector<2x32xf32> to vector<1x2x32xf32>
    tpu.vector_store %arg4[%c4_85, %c0_86, %c32_87], %154 {strides = array<i32>} : memref<8x2x64xf32, #tpu.memory_space<vmem>>, vector<1x2x32xf32>,
    %c0_88 = arith.constant 0 : index
    %c0_89 = arith.constant 0 : index
    %155 = vector.load %arg6[%c0_88, %c0_89] : memref<4x32xf32, #tpu.memory_space<vmem>>, vector<4x32xf32>
    %c0_90 = arith.constant 0 : index
    %c0_91 = arith.constant 0 : index
    %156 = vector.load %arg2[%c0_90, %c0_91] : memref<32x256xf32, #tpu.memory_space<vmem>>, vector<32x256xf32>
    %cst_92 = arith.constant dense<0.000000e+00> : vector<4x256xf32>
    %157 = tpu.matmul %155, %156, %cst_92 {dimension_numbers = #tpu.dot_dimension_numbers<[1], [0], [0], [1], [0, 0, 1, 1], [], []>} : vector<4x32xf32>, vector<32x256xf32>, vector<4x256xf32> -> vector<4x256xf32>
    %158 = vector.extract_strided_slice %157 {offsets = [0, 0], sizes = [2, 128], strides = [1, 1]} : vector<4x256xf32> to vector<2x128xf32>
    %c8_93 = arith.constant 8 : index
    %c0_94 = arith.constant 0 : index
    %159 = vector.load %arg5[%c8_93, %c0_94] : memref<16x256xf32, #tpu.memory_space<vmem>>, vector<2x128xf32>
    %160 = arith.addf %158, %159 : vector<2x128xf32>
    %161 = vector.extract_strided_slice %157 {offsets = [2, 128], sizes = [2, 128], strides = [1, 1]} : vector<4x256xf32> to vector<2x128xf32>
    %c6_95 = arith.constant 6 : index
    %c128_96 = arith.constant 128 : index
    %162 = vector.load %arg5[%c6_95, %c128_96] : memref<16x256xf32, #tpu.memory_space<vmem>>, vector<2x128xf32>
    %163 = arith.addf %161, %162 : vector<2x128xf32>
    %164 = tpu.concatenate %160, %163 in 0 : vector<2x128xf32>, vector<2x128xf32> -> vector<4x128xf32>
    %165 = arith.negf %164 : vector<4x128xf32>
    %166 = math.exp %165 : vector<4x128xf32>
    %cst_97 = arith.constant 1.000000e+00 : f32
    %167 = vector.broadcast %cst_97 : f32 to vector<4x128xf32>
    %168 = arith.addf %167, %166 : vector<4x128xf32>
    %169 = arith.divf %167, %168 : vector<4x128xf32>
    %170 = math.tanh %164 : vector<4x128xf32>
    %171 = vector.extract_strided_slice %169 {offsets = [0, 0], sizes = [4, 32], strides = [1, 1]} : vector<4x128xf32> to vector<4x32xf32>
    %172 = vector.extract_strided_slice %169 {offsets = [0, 32], sizes = [4, 32], strides = [1, 1]} : vector<4x128xf32> to vector<4x32xf32>
    %173 = vector.extract_strided_slice %170 {offsets = [0, 64], sizes = [4, 32], strides = [1, 1]} : vector<4x128xf32> to vector<4x32xf32>
    %174 = vector.extract_strided_slice %169 {offsets = [0, 96], sizes = [4, 32], strides = [1, 1]} : vector<4x128xf32> to vector<4x32xf32>
    %c0_98 = arith.constant 0 : index
    %c0_99 = arith.constant 0 : index
    %175 = vector.load %arg7[%c0_98, %c0_99] : memref<4x32xf32, #tpu.memory_space<vmem>>, vector<4x32xf32>
    %176 = arith.mulf %172, %175 : vector<4x32xf32>
    %177 = arith.mulf %171, %173 : vector<4x32xf32>
    %178 = arith.addf %176, %177 : vector<4x32xf32>
    %179 = math.tanh %178 : vector<4x32xf32>
    %180 = arith.mulf %174, %179 : vector<4x32xf32>
    %c0_100 = arith.constant 0 : index
    %c0_101 = arith.constant 0 : index
    %181 = vector.load %arg7[%c0_100, %c0_101] : memref<4x32xf32, #tpu.memory_space<vmem>>, vector<4x32xf32>
    tpu.vector_store %arg7[%c0_100, %c0_101], %178 {strides = array<i32>} : memref<4x32xf32, #tpu.memory_space<vmem>>, vector<4x32xf32>,
    %c0_102 = arith.constant 0 : index
    %c0_103 = arith.constant 0 : index
    %182 = vector.load %arg6[%c0_102, %c0_103] : memref<4x32xf32, #tpu.memory_space<vmem>>, vector<4x32xf32>
    tpu.vector_store %arg6[%c0_102, %c0_103], %180 {strides = array<i32>} : memref<4x32xf32, #tpu.memory_space<vmem>>, vector<4x32xf32>,
    %183 = vector.extract_strided_slice %180 {offsets = [0, 0], sizes = [2, 32], strides = [1, 1]} : vector<4x32xf32> to vector<2x32xf32>
    %c4_104 = arith.constant 4 : index
    %c0_105 = arith.constant 0 : index
    %c0_106 = arith.constant 0 : index
    %184 = vector.load %arg4[%c4_104, %c0_105, %c0_106] : memref<8x2x64xf32, #tpu.memory_space<vmem>>, vector<1x2x32xf32>
    %185 = vector.shape_cast %184 : vector<1x2x32xf32> to vector<2x32xf32>
    %186 = vector.shape_cast %183 : vector<2x32xf32> to vector<1x2x32xf32>
    tpu.vector_store %arg4[%c4_104, %c0_105, %c0_106], %186 {strides = array<i32>} : memref<8x2x64xf32, #tpu.memory_space<vmem>>, vector<1x2x32xf32>,
    %187 = vector.extract_strided_slice %180 {offsets = [2, 0], sizes = [2, 32], strides = [1, 1]} : vector<4x32xf32> to vector<2x32xf32>
    %c3_107 = arith.constant 3 : index
    %c0_108 = arith.constant 0 : index
    %c32_109 = arith.constant 32 : index
    %188 = vector.load %arg4[%c3_107, %c0_108, %c32_109] : memref<8x2x64xf32, #tpu.memory_space<vmem>>, vector<1x2x32xf32>
    %189 = vector.shape_cast %188 : vector<1x2x32xf32> to vector<2x32xf32>
    %190 = vector.shape_cast %187 : vector<2x32xf32> to vector<1x2x32xf32>
    tpu.vector_store %arg4[%c3_107, %c0_108, %c32_109], %190 {strides = array<i32>} : memref<8x2x64xf32, #tpu.memory_space<vmem>>, vector<1x2x32xf32>,
    %c0_110 = arith.constant 0 : index
    %c0_111 = arith.constant 0 : index
    %191 = vector.load %arg6[%c0_110, %c0_111] : memref<4x32xf32, #tpu.memory_space<vmem>>, vector<4x32xf32>
    %c0_112 = arith.constant 0 : index
    %c0_113 = arith.constant 0 : index
    %192 = vector.load %arg2[%c0_112, %c0_113] : memref<32x256xf32, #tpu.memory_space<vmem>>, vector<32x256xf32>
    %cst_114 = arith.constant dense<0.000000e+00> : vector<4x256xf32>
    %193 = tpu.matmul %191, %192, %cst_114 {dimension_numbers = #tpu.dot_dimension_numbers<[1], [0], [0], [1], [0, 0, 1, 1], [], []>} : vector<4x32xf32>, vector<32x256xf32>, vector<4x256xf32> -> vector<4x256xf32>
    %194 = vector.extract_strided_slice %193 {offsets = [0, 0], sizes = [2, 128], strides = [1, 1]} : vector<4x256xf32> to vector<2x128xf32>
    %c10_115 = arith.constant 10 : index
    %c0_116 = arith.constant 0 : index
    %195 = vector.load %arg5[%c10_115, %c0_116] : memref<16x256xf32, #tpu.memory_space<vmem>>, vector<2x128xf32>
    %196 = arith.addf %194, %195 : vector<2x128xf32>
    %197 = vector.extract_strided_slice %193 {offsets = [2, 128], sizes = [2, 128], strides = [1, 1]} : vector<4x256xf32> to vector<2x128xf32>
    %c4_117 = arith.constant 4 : index
    %c128_118 = arith.constant 128 : index
    %198 = vector.load %arg5[%c4_117, %c128_118] : memref<16x256xf32, #tpu.memory_space<vmem>>, vector<2x128xf32>
    %199 = arith.addf %197, %198 : vector<2x128xf32>
    %200 = tpu.concatenate %196, %199 in 0 : vector<2x128xf32>, vector<2x128xf32> -> vector<4x128xf32>
    %201 = arith.negf %200 : vector<4x128xf32>
    %202 = math.exp %201 : vector<4x128xf32>
    %cst_119 = arith.constant 1.000000e+00 : f32
    %203 = vector.broadcast %cst_119 : f32 to vector<4x128xf32>
    %204 = arith.addf %203, %202 : vector<4x128xf32>
    %205 = arith.divf %203, %204 : vector<4x128xf32>
    %206 = math.tanh %200 : vector<4x128xf32>
    %207 = vector.extract_strided_slice %205 {offsets = [0, 0], sizes = [4, 32], strides = [1, 1]} : vector<4x128xf32> to vector<4x32xf32>
    %208 = vector.extract_strided_slice %205 {offsets = [0, 32], sizes = [4, 32], strides = [1, 1]} : vector<4x128xf32> to vector<4x32xf32>
    %209 = vector.extract_strided_slice %206 {offsets = [0, 64], sizes = [4, 32], strides = [1, 1]} : vector<4x128xf32> to vector<4x32xf32>
    %210 = vector.extract_strided_slice %205 {offsets = [0, 96], sizes = [4, 32], strides = [1, 1]} : vector<4x128xf32> to vector<4x32xf32>
    %c0_120 = arith.constant 0 : index
    %c0_121 = arith.constant 0 : index
    %211 = vector.load %arg7[%c0_120, %c0_121] : memref<4x32xf32, #tpu.memory_space<vmem>>, vector<4x32xf32>
    %212 = arith.mulf %208, %211 : vector<4x32xf32>
    %213 = arith.mulf %207, %209 : vector<4x32xf32>
    %214 = arith.addf %212, %213 : vector<4x32xf32>
    %215 = math.tanh %214 : vector<4x32xf32>
    %216 = arith.mulf %210, %215 : vector<4x32xf32>
    %c0_122 = arith.constant 0 : index
    %c0_123 = arith.constant 0 : index
    %217 = vector.load %arg7[%c0_122, %c0_123] : memref<4x32xf32, #tpu.memory_space<vmem>>, vector<4x32xf32>
    tpu.vector_store %arg7[%c0_122, %c0_123], %214 {strides = array<i32>} : memref<4x32xf32, #tpu.memory_space<vmem>>, vector<4x32xf32>,
    %c0_124 = arith.constant 0 : index
    %c0_125 = arith.constant 0 : index
    %218 = vector.load %arg6[%c0_124, %c0_125] : memref<4x32xf32, #tpu.memory_space<vmem>>, vector<4x32xf32>
    tpu.vector_store %arg6[%c0_124, %c0_125], %216 {strides = array<i32>} : memref<4x32xf32, #tpu.memory_space<vmem>>, vector<4x32xf32>,
    %219 = vector.extract_strided_slice %216 {offsets = [0, 0], sizes = [2, 32], strides = [1, 1]} : vector<4x32xf32> to vector<2x32xf32>
    %c5_126 = arith.constant 5 : index
    %c0_127 = arith.constant 0 : index
    %c0_128 = arith.constant 0 : index
    %220 = vector.load %arg4[%c5_126, %c0_127, %c0_128] : memref<8x2x64xf32, #tpu.memory_space<vmem>>, vector<1x2x32xf32>
    %221 = vector.shape_cast %220 : vector<1x2x32xf32> to vector<2x32xf32>
    %222 = vector.shape_cast %219 : vector<2x32xf32> to vector<1x2x32xf32>
    tpu.vector_store %arg4[%c5_126, %c0_127, %c0_128], %222 {strides = array<i32>} : memref<8x2x64xf32, #tpu.memory_space<vmem>>, vector<1x2x32xf32>,
    %223 = vector.extract_strided_slice %216 {offsets = [2, 0], sizes = [2, 32], strides = [1, 1]} : vector<4x32xf32> to vector<2x32xf32>
    %c2_129 = arith.constant 2 : index
    %c0_130 = arith.constant 0 : index
    %c32_131 = arith.constant 32 : index
    %224 = vector.load %arg4[%c2_129, %c0_130, %c32_131] : memref<8x2x64xf32, #tpu.memory_space<vmem>>, vector<1x2x32xf32>
    %225 = vector.shape_cast %224 : vector<1x2x32xf32> to vector<2x32xf32>
    %226 = vector.shape_cast %223 : vector<2x32xf32> to vector<1x2x32xf32>
    tpu.vector_store %arg4[%c2_129, %c0_130, %c32_131], %226 {strides = array<i32>} : memref<8x2x64xf32, #tpu.memory_space<vmem>>, vector<1x2x32xf32>,
    %c0_132 = arith.constant 0 : index
    %c0_133 = arith.constant 0 : index
    %227 = vector.load %arg6[%c0_132, %c0_133] : memref<4x32xf32, #tpu.memory_space<vmem>>, vector<4x32xf32>
    %c0_134 = arith.constant 0 : index
    %c0_135 = arith.constant 0 : index
    %228 = vector.load %arg2[%c0_134, %c0_135] : memref<32x256xf32, #tpu.memory_space<vmem>>, vector<32x256xf32>
    %cst_136 = arith.constant dense<0.000000e+00> : vector<4x256xf32>
    %229 = tpu.matmul %227, %228, %cst_136 {dimension_numbers = #tpu.dot_dimension_numbers<[1], [0], [0], [1], [0, 0, 1, 1], [], []>} : vector<4x32xf32>, vector<32x256xf32>, vector<4x256xf32> -> vector<4x256xf32>
    %230 = vector.extract_strided_slice %229 {offsets = [0, 0], sizes = [2, 128], strides = [1, 1]} : vector<4x256xf32> to vector<2x128xf32>
    %c12_137 = arith.constant 12 : index
    %c0_138 = arith.constant 0 : index
    %231 = vector.load %arg5[%c12_137, %c0_138] : memref<16x256xf32, #tpu.memory_space<vmem>>, vector<2x128xf32>
    %232 = arith.addf %230, %231 : vector<2x128xf32>
    %233 = vector.extract_strided_slice %229 {offsets = [2, 128], sizes = [2, 128], strides = [1, 1]} : vector<4x256xf32> to vector<2x128xf32>
    %c2_139 = arith.constant 2 : index
    %c128_140 = arith.constant 128 : index
    %234 = vector.load %arg5[%c2_139, %c128_140] : memref<16x256xf32, #tpu.memory_space<vmem>>, vector<2x128xf32>
    %235 = arith.addf %233, %234 : vector<2x128xf32>
    %236 = tpu.concatenate %232, %235 in 0 : vector<2x128xf32>, vector<2x128xf32> -> vector<4x128xf32>
    %237 = arith.negf %236 : vector<4x128xf32>
    %238 = math.exp %237 : vector<4x128xf32>
    %cst_141 = arith.constant 1.000000e+00 : f32
    %239 = vector.broadcast %cst_141 : f32 to vector<4x128xf32>
    %240 = arith.addf %239, %238 : vector<4x128xf32>
    %241 = arith.divf %239, %240 : vector<4x128xf32>
    %242 = math.tanh %236 : vector<4x128xf32>
    %243 = vector.extract_strided_slice %241 {offsets = [0, 0], sizes = [4, 32], strides = [1, 1]} : vector<4x128xf32> to vector<4x32xf32>
    %244 = vector.extract_strided_slice %241 {offsets = [0, 32], sizes = [4, 32], strides = [1, 1]} : vector<4x128xf32> to vector<4x32xf32>
    %245 = vector.extract_strided_slice %242 {offsets = [0, 64], sizes = [4, 32], strides = [1, 1]} : vector<4x128xf32> to vector<4x32xf32>
    %246 = vector.extract_strided_slice %241 {offsets = [0, 96], sizes = [4, 32], strides = [1, 1]} : vector<4x128xf32> to vector<4x32xf32>
    %c0_142 = arith.constant 0 : index
    %c0_143 = arith.constant 0 : index
    %247 = vector.load %arg7[%c0_142, %c0_143] : memref<4x32xf32, #tpu.memory_space<vmem>>, vector<4x32xf32>
    %248 = arith.mulf %244, %247 : vector<4x32xf32>
    %249 = arith.mulf %243, %245 : vector<4x32xf32>
    %250 = arith.addf %248, %249 : vector<4x32xf32>
    %251 = math.tanh %250 : vector<4x32xf32>
    %252 = arith.mulf %246, %251 : vector<4x32xf32>
    %c0_144 = arith.constant 0 : index
    %c0_145 = arith.constant 0 : index
    %253 = vector.load %arg7[%c0_144, %c0_145] : memref<4x32xf32, #tpu.memory_space<vmem>>, vector<4x32xf32>
    tpu.vector_store %arg7[%c0_144, %c0_145], %250 {strides = array<i32>} : memref<4x32xf32, #tpu.memory_space<vmem>>, vector<4x32xf32>,
    %c0_146 = arith.constant 0 : index
    %c0_147 = arith.constant 0 : index
    %254 = vector.load %arg6[%c0_146, %c0_147] : memref<4x32xf32, #tpu.memory_space<vmem>>, vector<4x32xf32>
    tpu.vector_store %arg6[%c0_146, %c0_147], %252 {strides = array<i32>} : memref<4x32xf32, #tpu.memory_space<vmem>>, vector<4x32xf32>,
    %255 = vector.extract_strided_slice %252 {offsets = [0, 0], sizes = [2, 32], strides = [1, 1]} : vector<4x32xf32> to vector<2x32xf32>
    %c6_148 = arith.constant 6 : index
    %c0_149 = arith.constant 0 : index
    %c0_150 = arith.constant 0 : index
    %256 = vector.load %arg4[%c6_148, %c0_149, %c0_150] : memref<8x2x64xf32, #tpu.memory_space<vmem>>, vector<1x2x32xf32>
    %257 = vector.shape_cast %256 : vector<1x2x32xf32> to vector<2x32xf32>
    %258 = vector.shape_cast %255 : vector<2x32xf32> to vector<1x2x32xf32>
    tpu.vector_store %arg4[%c6_148, %c0_149, %c0_150], %258 {strides = array<i32>} : memref<8x2x64xf32, #tpu.memory_space<vmem>>, vector<1x2x32xf32>,
    %259 = vector.extract_strided_slice %252 {offsets = [2, 0], sizes = [2, 32], strides = [1, 1]} : vector<4x32xf32> to vector<2x32xf32>
    %c1_151 = arith.constant 1 : index
    %c0_152 = arith.constant 0 : index
    %c32_153 = arith.constant 32 : index
    %260 = vector.load %arg4[%c1_151, %c0_152, %c32_153] : memref<8x2x64xf32, #tpu.memory_space<vmem>>, vector<1x2x32xf32>
    %261 = vector.shape_cast %260 : vector<1x2x32xf32> to vector<2x32xf32>
    %262 = vector.shape_cast %259 : vector<2x32xf32> to vector<1x2x32xf32>
    tpu.vector_store %arg4[%c1_151, %c0_152, %c32_153], %262 {strides = array<i32>} : memref<8x2x64xf32, #tpu.memory_space<vmem>>, vector<1x2x32xf32>,
    %c0_154 = arith.constant 0 : index
    %c0_155 = arith.constant 0 : index
    %263 = vector.load %arg6[%c0_154, %c0_155] : memref<4x32xf32, #tpu.memory_space<vmem>>, vector<4x32xf32>
    %c0_156 = arith.constant 0 : index
    %c0_157 = arith.constant 0 : index
    %264 = vector.load %arg2[%c0_156, %c0_157] : memref<32x256xf32, #tpu.memory_space<vmem>>, vector<32x256xf32>
    %cst_158 = arith.constant dense<0.000000e+00> : vector<4x256xf32>
    %265 = tpu.matmul %263, %264, %cst_158 {dimension_numbers = #tpu.dot_dimension_numbers<[1], [0], [0], [1], [0, 0, 1, 1], [], []>} : vector<4x32xf32>, vector<32x256xf32>, vector<4x256xf32> -> vector<4x256xf32>
    %266 = vector.extract_strided_slice %265 {offsets = [0, 0], sizes = [2, 128], strides = [1, 1]} : vector<4x256xf32> to vector<2x128xf32>
    %c14_159 = arith.constant 14 : index
    %c0_160 = arith.constant 0 : index
    %267 = vector.load %arg5[%c14_159, %c0_160] : memref<16x256xf32, #tpu.memory_space<vmem>>, vector<2x128xf32>
    %268 = arith.addf %266, %267 : vector<2x128xf32>
    %269 = vector.extract_strided_slice %265 {offsets = [2, 128], sizes = [2, 128], strides = [1, 1]} : vector<4x256xf32> to vector<2x128xf32>
    %c0_161 = arith.constant 0 : index
    %c128_162 = arith.constant 128 : index
    %270 = vector.load %arg5[%c0_161, %c128_162] : memref<16x256xf32, #tpu.memory_space<vmem>>, vector<2x128xf32>
    %271 = arith.addf %269, %270 : vector<2x128xf32>
    %272 = tpu.concatenate %268, %271 in 0 : vector<2x128xf32>, vector<2x128xf32> -> vector<4x128xf32>
    %273 = arith.negf %272 : vector<4x128xf32>
    %274 = math.exp %273 : vector<4x128xf32>
    %cst_163 = arith.constant 1.000000e+00 : f32
    %275 = vector.broadcast %cst_163 : f32 to vector<4x128xf32>
    %276 = arith.addf %275, %274 : vector<4x128xf32>
    %277 = arith.divf %275, %276 : vector<4x128xf32>
    %278 = math.tanh %272 : vector<4x128xf32>
    %279 = vector.extract_strided_slice %277 {offsets = [0, 0], sizes = [4, 32], strides = [1, 1]} : vector<4x128xf32> to vector<4x32xf32>
    %280 = vector.extract_strided_slice %277 {offsets = [0, 32], sizes = [4, 32], strides = [1, 1]} : vector<4x128xf32> to vector<4x32xf32>
    %281 = vector.extract_strided_slice %278 {offsets = [0, 64], sizes = [4, 32], strides = [1, 1]} : vector<4x128xf32> to vector<4x32xf32>
    %282 = vector.extract_strided_slice %277 {offsets = [0, 96], sizes = [4, 32], strides = [1, 1]} : vector<4x128xf32> to vector<4x32xf32>
    %c0_164 = arith.constant 0 : index
    %c0_165 = arith.constant 0 : index
    %283 = vector.load %arg7[%c0_164, %c0_165] : memref<4x32xf32, #tpu.memory_space<vmem>>, vector<4x32xf32>
    %284 = arith.mulf %280, %283 : vector<4x32xf32>
    %285 = arith.mulf %279, %281 : vector<4x32xf32>
    %286 = arith.addf %284, %285 : vector<4x32xf32>
    %287 = math.tanh %286 : vector<4x32xf32>
    %288 = arith.mulf %282, %287 : vector<4x32xf32>
    %c0_166 = arith.constant 0 : index
    %c0_167 = arith.constant 0 : index
    %289 = vector.load %arg7[%c0_166, %c0_167] : memref<4x32xf32, #tpu.memory_space<vmem>>, vector<4x32xf32>
    tpu.vector_store %arg7[%c0_166, %c0_167], %286 {strides = array<i32>} : memref<4x32xf32, #tpu.memory_space<vmem>>, vector<4x32xf32>,
    %c0_168 = arith.constant 0 : index
    %c0_169 = arith.constant 0 : index
    %290 = vector.load %arg6[%c0_168, %c0_169] : memref<4x32xf32, #tpu.memory_space<vmem>>, vector<4x32xf32>
    tpu.vector_store %arg6[%c0_168, %c0_169], %288 {strides = array<i32>} : memref<4x32xf32, #tpu.memory_space<vmem>>, vector<4x32xf32>,
    %291 = vector.extract_strided_slice %288 {offsets = [0, 0], sizes = [2, 32], strides = [1, 1]} : vector<4x32xf32> to vector<2x32xf32>
    %c7_170 = arith.constant 7 : index
    %c0_171 = arith.constant 0 : index
    %c0_172 = arith.constant 0 : index
    %292 = vector.load %arg4[%c7_170, %c0_171, %c0_172] : memref<8x2x64xf32, #tpu.memory_space<vmem>>, vector<1x2x32xf32>
    %293 = vector.shape_cast %292 : vector<1x2x32xf32> to vector<2x32xf32>
    %294 = vector.shape_cast %291 : vector<2x32xf32> to vector<1x2x32xf32>
    tpu.vector_store %arg4[%c7_170, %c0_171, %c0_172], %294 {strides = array<i32>} : memref<8x2x64xf32, #tpu.memory_space<vmem>>, vector<1x2x32xf32>,
    %295 = vector.extract_strided_slice %288 {offsets = [2, 0], sizes = [2, 32], strides = [1, 1]} : vector<4x32xf32> to vector<2x32xf32>
    %c0_173 = arith.constant 0 : index
    %c0_174 = arith.constant 0 : index
    %c32_175 = arith.constant 32 : index
    %296 = vector.load %arg4[%c0_173, %c0_174, %c32_175] : memref<8x2x64xf32, #tpu.memory_space<vmem>>, vector<1x2x32xf32>
    %297 = vector.shape_cast %296 : vector<1x2x32xf32> to vector<2x32xf32>
    %298 = vector.shape_cast %295 : vector<2x32xf32> to vector<1x2x32xf32>
    tpu.vector_store %arg4[%c0_173, %c0_174, %c32_175], %298 {strides = array<i32>} : memref<8x2x64xf32, #tpu.memory_space<vmem>>, vector<1x2x32xf32>,
    return
  }
}

module attributes {stable_mosaic.version = 11 : i64} {
  func.func @bilstm_layer_kernel(%arg0: memref<16x64xf32, #tpu.memory_space<vmem>>, %arg1: memref<64x256xf32, #tpu.memory_space<vmem>>, %arg2: memref<32x256xf32, #tpu.memory_space<vmem>>, %arg3: memref<1x256xf32, #tpu.memory_space<vmem>>, %arg4: memref<64x4xf32, #tpu.memory_space<vmem>>, %arg5: memref<1x4xf32, #tpu.memory_space<vmem>>, %arg6: memref<8x2x64xf32, #tpu.memory_space<vmem>>, %arg7: memref<2x4xf32, #tpu.memory_space<vmem>>, %arg8: memref<16x256xf32, #tpu.memory_space<vmem>>, %arg9: memref<4x32xf32, #tpu.memory_space<vmem>>, %arg10: memref<4x32xf32, #tpu.memory_space<vmem>>) attributes {dimension_semantics = [], scalar_prefetch = 0 : i64, scratch_operands = 3 : i64, tpu.core_type = #tpu.core_type<tc>} {
    %c0 = arith.constant 0 : index
    %c0_0 = arith.constant 0 : index
    %0 = vector.load %arg0[%c0, %c0_0] : memref<16x64xf32, #tpu.memory_space<vmem>>, vector<16x64xf32>
    %c0_1 = arith.constant 0 : index
    %c0_2 = arith.constant 0 : index
    %1 = vector.load %arg1[%c0_1, %c0_2] : memref<64x256xf32, #tpu.memory_space<vmem>>, vector<64x256xf32>
    %cst = arith.constant dense<0.000000e+00> : vector<16x256xf32>
    %2 = tpu.matmul %0, %1, %cst {dimension_numbers = #tpu.dot_dimension_numbers<[1], [0], [0], [1], [0, 0, 1, 1], [], []>} : vector<16x64xf32>, vector<64x256xf32>, vector<16x256xf32> -> vector<16x256xf32>
    %c0_3 = arith.constant 0 : index
    %c0_4 = arith.constant 0 : index
    %3 = vector.load %arg3[%c0_3, %c0_4] : memref<1x256xf32, #tpu.memory_space<vmem>>, vector<1x256xf32>
    %4 = vector.broadcast %3 : vector<1x256xf32> to vector<16x256xf32>
    %5 = arith.addf %2, %4 : vector<16x256xf32>
    %c0_5 = arith.constant 0 : index
    %c0_6 = arith.constant 0 : index
    %6 = vector.load %arg8[%c0_5, %c0_6] : memref<16x256xf32, #tpu.memory_space<vmem>>, vector<16x256xf32>
    tpu.vector_store %arg8[%c0_5, %c0_6], %5 {strides = array<i32>} : memref<16x256xf32, #tpu.memory_space<vmem>>, vector<16x256xf32>,
    %cst_7 = arith.constant 0.000000e+00 : f32
    %7 = vector.broadcast %cst_7 : f32 to vector<4x32xf32>
    %c0_8 = arith.constant 0 : index
    %c0_9 = arith.constant 0 : index
    %8 = vector.load %arg9[%c0_8, %c0_9] : memref<4x32xf32, #tpu.memory_space<vmem>>, vector<4x32xf32>
    tpu.vector_store %arg9[%c0_8, %c0_9], %7 {strides = array<i32>} : memref<4x32xf32, #tpu.memory_space<vmem>>, vector<4x32xf32>,
    %cst_10 = arith.constant 0.000000e+00 : f32
    %9 = vector.broadcast %cst_10 : f32 to vector<4x32xf32>
    %c0_11 = arith.constant 0 : index
    %c0_12 = arith.constant 0 : index
    %10 = vector.load %arg10[%c0_11, %c0_12] : memref<4x32xf32, #tpu.memory_space<vmem>>, vector<4x32xf32>
    tpu.vector_store %arg10[%c0_11, %c0_12], %9 {strides = array<i32>} : memref<4x32xf32, #tpu.memory_space<vmem>>, vector<4x32xf32>,
    %c0_13 = arith.constant 0 : index
    %c0_14 = arith.constant 0 : index
    %11 = vector.load %arg9[%c0_13, %c0_14] : memref<4x32xf32, #tpu.memory_space<vmem>>, vector<4x32xf32>
    %c0_15 = arith.constant 0 : index
    %c0_16 = arith.constant 0 : index
    %12 = vector.load %arg2[%c0_15, %c0_16] : memref<32x256xf32, #tpu.memory_space<vmem>>, vector<32x256xf32>
    %cst_17 = arith.constant dense<0.000000e+00> : vector<4x256xf32>
    %13 = tpu.matmul %11, %12, %cst_17 {dimension_numbers = #tpu.dot_dimension_numbers<[1], [0], [0], [1], [0, 0, 1, 1], [], []>} : vector<4x32xf32>, vector<32x256xf32>, vector<4x256xf32> -> vector<4x256xf32>
    %14 = vector.extract_strided_slice %13 {offsets = [0, 0], sizes = [2, 128], strides = [1, 1]} : vector<4x256xf32> to vector<2x128xf32>
    %c0_18 = arith.constant 0 : index
    %c0_19 = arith.constant 0 : index
    %15 = vector.load %arg8[%c0_18, %c0_19] : memref<16x256xf32, #tpu.memory_space<vmem>>, vector<2x128xf32>
    %16 = arith.addf %14, %15 : vector<2x128xf32>
    %17 = vector.extract_strided_slice %13 {offsets = [2, 128], sizes = [2, 128], strides = [1, 1]} : vector<4x256xf32> to vector<2x128xf32>
    %c14 = arith.constant 14 : index
    %c128 = arith.constant 128 : index
    %18 = vector.load %arg8[%c14, %c128] : memref<16x256xf32, #tpu.memory_space<vmem>>, vector<2x128xf32>
    %19 = arith.addf %17, %18 : vector<2x128xf32>
    %20 = tpu.concatenate %16, %19 in 0 : vector<2x128xf32>, vector<2x128xf32> -> vector<4x128xf32>
    %21 = arith.negf %20 : vector<4x128xf32>
    %22 = math.exp %21 : vector<4x128xf32>
    %cst_20 = arith.constant 1.000000e+00 : f32
    %23 = vector.broadcast %cst_20 : f32 to vector<4x128xf32>
    %24 = arith.addf %23, %22 : vector<4x128xf32>
    %25 = arith.divf %23, %24 : vector<4x128xf32>
    %26 = math.tanh %20 : vector<4x128xf32>
    %27 = vector.extract_strided_slice %25 {offsets = [0, 0], sizes = [4, 32], strides = [1, 1]} : vector<4x128xf32> to vector<4x32xf32>
    %28 = vector.extract_strided_slice %25 {offsets = [0, 32], sizes = [4, 32], strides = [1, 1]} : vector<4x128xf32> to vector<4x32xf32>
    %29 = vector.extract_strided_slice %26 {offsets = [0, 64], sizes = [4, 32], strides = [1, 1]} : vector<4x128xf32> to vector<4x32xf32>
    %30 = vector.extract_strided_slice %25 {offsets = [0, 96], sizes = [4, 32], strides = [1, 1]} : vector<4x128xf32> to vector<4x32xf32>
    %c0_21 = arith.constant 0 : index
    %c0_22 = arith.constant 0 : index
    %31 = vector.load %arg10[%c0_21, %c0_22] : memref<4x32xf32, #tpu.memory_space<vmem>>, vector<4x32xf32>
    %32 = arith.mulf %28, %31 : vector<4x32xf32>
    %33 = arith.mulf %27, %29 : vector<4x32xf32>
    %34 = arith.addf %32, %33 : vector<4x32xf32>
    %35 = math.tanh %34 : vector<4x32xf32>
    %36 = arith.mulf %30, %35 : vector<4x32xf32>
    %c0_23 = arith.constant 0 : index
    %c0_24 = arith.constant 0 : index
    %37 = vector.load %arg10[%c0_23, %c0_24] : memref<4x32xf32, #tpu.memory_space<vmem>>, vector<4x32xf32>
    tpu.vector_store %arg10[%c0_23, %c0_24], %34 {strides = array<i32>} : memref<4x32xf32, #tpu.memory_space<vmem>>, vector<4x32xf32>,
    %c0_25 = arith.constant 0 : index
    %c0_26 = arith.constant 0 : index
    %38 = vector.load %arg9[%c0_25, %c0_26] : memref<4x32xf32, #tpu.memory_space<vmem>>, vector<4x32xf32>
    tpu.vector_store %arg9[%c0_25, %c0_26], %36 {strides = array<i32>} : memref<4x32xf32, #tpu.memory_space<vmem>>, vector<4x32xf32>,
    %39 = vector.extract_strided_slice %36 {offsets = [0, 0], sizes = [2, 32], strides = [1, 1]} : vector<4x32xf32> to vector<2x32xf32>
    %c0_27 = arith.constant 0 : index
    %c0_28 = arith.constant 0 : index
    %c0_29 = arith.constant 0 : index
    %40 = vector.load %arg6[%c0_27, %c0_28, %c0_29] : memref<8x2x64xf32, #tpu.memory_space<vmem>>, vector<1x2x32xf32>
    %41 = vector.shape_cast %40 : vector<1x2x32xf32> to vector<2x32xf32>
    %42 = vector.shape_cast %39 : vector<2x32xf32> to vector<1x2x32xf32>
    tpu.vector_store %arg6[%c0_27, %c0_28, %c0_29], %42 {strides = array<i32>} : memref<8x2x64xf32, #tpu.memory_space<vmem>>, vector<1x2x32xf32>,
    %43 = vector.extract_strided_slice %36 {offsets = [2, 0], sizes = [2, 32], strides = [1, 1]} : vector<4x32xf32> to vector<2x32xf32>
    %c7 = arith.constant 7 : index
    %c0_30 = arith.constant 0 : index
    %c32 = arith.constant 32 : index
    %44 = vector.load %arg6[%c7, %c0_30, %c32] : memref<8x2x64xf32, #tpu.memory_space<vmem>>, vector<1x2x32xf32>
    %45 = vector.shape_cast %44 : vector<1x2x32xf32> to vector<2x32xf32>
    %46 = vector.shape_cast %43 : vector<2x32xf32> to vector<1x2x32xf32>
    tpu.vector_store %arg6[%c7, %c0_30, %c32], %46 {strides = array<i32>} : memref<8x2x64xf32, #tpu.memory_space<vmem>>, vector<1x2x32xf32>,
    %c0_31 = arith.constant 0 : index
    %c0_32 = arith.constant 0 : index
    %47 = vector.load %arg9[%c0_31, %c0_32] : memref<4x32xf32, #tpu.memory_space<vmem>>, vector<4x32xf32>
    %c0_33 = arith.constant 0 : index
    %c0_34 = arith.constant 0 : index
    %48 = vector.load %arg2[%c0_33, %c0_34] : memref<32x256xf32, #tpu.memory_space<vmem>>, vector<32x256xf32>
    %cst_35 = arith.constant dense<0.000000e+00> : vector<4x256xf32>
    %49 = tpu.matmul %47, %48, %cst_35 {dimension_numbers = #tpu.dot_dimension_numbers<[1], [0], [0], [1], [0, 0, 1, 1], [], []>} : vector<4x32xf32>, vector<32x256xf32>, vector<4x256xf32> -> vector<4x256xf32>
    %50 = vector.extract_strided_slice %49 {offsets = [0, 0], sizes = [2, 128], strides = [1, 1]} : vector<4x256xf32> to vector<2x128xf32>
    %c2 = arith.constant 2 : index
    %c0_36 = arith.constant 0 : index
    %51 = vector.load %arg8[%c2, %c0_36] : memref<16x256xf32, #tpu.memory_space<vmem>>, vector<2x128xf32>
    %52 = arith.addf %50, %51 : vector<2x128xf32>
    %53 = vector.extract_strided_slice %49 {offsets = [2, 128], sizes = [2, 128], strides = [1, 1]} : vector<4x256xf32> to vector<2x128xf32>
    %c12 = arith.constant 12 : index
    %c128_37 = arith.constant 128 : index
    %54 = vector.load %arg8[%c12, %c128_37] : memref<16x256xf32, #tpu.memory_space<vmem>>, vector<2x128xf32>
    %55 = arith.addf %53, %54 : vector<2x128xf32>
    %56 = tpu.concatenate %52, %55 in 0 : vector<2x128xf32>, vector<2x128xf32> -> vector<4x128xf32>
    %57 = arith.negf %56 : vector<4x128xf32>
    %58 = math.exp %57 : vector<4x128xf32>
    %cst_38 = arith.constant 1.000000e+00 : f32
    %59 = vector.broadcast %cst_38 : f32 to vector<4x128xf32>
    %60 = arith.addf %59, %58 : vector<4x128xf32>
    %61 = arith.divf %59, %60 : vector<4x128xf32>
    %62 = math.tanh %56 : vector<4x128xf32>
    %63 = vector.extract_strided_slice %61 {offsets = [0, 0], sizes = [4, 32], strides = [1, 1]} : vector<4x128xf32> to vector<4x32xf32>
    %64 = vector.extract_strided_slice %61 {offsets = [0, 32], sizes = [4, 32], strides = [1, 1]} : vector<4x128xf32> to vector<4x32xf32>
    %65 = vector.extract_strided_slice %62 {offsets = [0, 64], sizes = [4, 32], strides = [1, 1]} : vector<4x128xf32> to vector<4x32xf32>
    %66 = vector.extract_strided_slice %61 {offsets = [0, 96], sizes = [4, 32], strides = [1, 1]} : vector<4x128xf32> to vector<4x32xf32>
    %c0_39 = arith.constant 0 : index
    %c0_40 = arith.constant 0 : index
    %67 = vector.load %arg10[%c0_39, %c0_40] : memref<4x32xf32, #tpu.memory_space<vmem>>, vector<4x32xf32>
    %68 = arith.mulf %64, %67 : vector<4x32xf32>
    %69 = arith.mulf %63, %65 : vector<4x32xf32>
    %70 = arith.addf %68, %69 : vector<4x32xf32>
    %71 = math.tanh %70 : vector<4x32xf32>
    %72 = arith.mulf %66, %71 : vector<4x32xf32>
    %c0_41 = arith.constant 0 : index
    %c0_42 = arith.constant 0 : index
    %73 = vector.load %arg10[%c0_41, %c0_42] : memref<4x32xf32, #tpu.memory_space<vmem>>, vector<4x32xf32>
    tpu.vector_store %arg10[%c0_41, %c0_42], %70 {strides = array<i32>} : memref<4x32xf32, #tpu.memory_space<vmem>>, vector<4x32xf32>,
    %c0_43 = arith.constant 0 : index
    %c0_44 = arith.constant 0 : index
    %74 = vector.load %arg9[%c0_43, %c0_44] : memref<4x32xf32, #tpu.memory_space<vmem>>, vector<4x32xf32>
    tpu.vector_store %arg9[%c0_43, %c0_44], %72 {strides = array<i32>} : memref<4x32xf32, #tpu.memory_space<vmem>>, vector<4x32xf32>,
    %75 = vector.extract_strided_slice %72 {offsets = [0, 0], sizes = [2, 32], strides = [1, 1]} : vector<4x32xf32> to vector<2x32xf32>
    %c1 = arith.constant 1 : index
    %c0_45 = arith.constant 0 : index
    %c0_46 = arith.constant 0 : index
    %76 = vector.load %arg6[%c1, %c0_45, %c0_46] : memref<8x2x64xf32, #tpu.memory_space<vmem>>, vector<1x2x32xf32>
    %77 = vector.shape_cast %76 : vector<1x2x32xf32> to vector<2x32xf32>
    %78 = vector.shape_cast %75 : vector<2x32xf32> to vector<1x2x32xf32>
    tpu.vector_store %arg6[%c1, %c0_45, %c0_46], %78 {strides = array<i32>} : memref<8x2x64xf32, #tpu.memory_space<vmem>>, vector<1x2x32xf32>,
    %79 = vector.extract_strided_slice %72 {offsets = [2, 0], sizes = [2, 32], strides = [1, 1]} : vector<4x32xf32> to vector<2x32xf32>
    %c6 = arith.constant 6 : index
    %c0_47 = arith.constant 0 : index
    %c32_48 = arith.constant 32 : index
    %80 = vector.load %arg6[%c6, %c0_47, %c32_48] : memref<8x2x64xf32, #tpu.memory_space<vmem>>, vector<1x2x32xf32>
    %81 = vector.shape_cast %80 : vector<1x2x32xf32> to vector<2x32xf32>
    %82 = vector.shape_cast %79 : vector<2x32xf32> to vector<1x2x32xf32>
    tpu.vector_store %arg6[%c6, %c0_47, %c32_48], %82 {strides = array<i32>} : memref<8x2x64xf32, #tpu.memory_space<vmem>>, vector<1x2x32xf32>,
    %c0_49 = arith.constant 0 : index
    %c0_50 = arith.constant 0 : index
    %83 = vector.load %arg9[%c0_49, %c0_50] : memref<4x32xf32, #tpu.memory_space<vmem>>, vector<4x32xf32>
    %c0_51 = arith.constant 0 : index
    %c0_52 = arith.constant 0 : index
    %84 = vector.load %arg2[%c0_51, %c0_52] : memref<32x256xf32, #tpu.memory_space<vmem>>, vector<32x256xf32>
    %cst_53 = arith.constant dense<0.000000e+00> : vector<4x256xf32>
    %85 = tpu.matmul %83, %84, %cst_53 {dimension_numbers = #tpu.dot_dimension_numbers<[1], [0], [0], [1], [0, 0, 1, 1], [], []>} : vector<4x32xf32>, vector<32x256xf32>, vector<4x256xf32> -> vector<4x256xf32>
    %86 = vector.extract_strided_slice %85 {offsets = [0, 0], sizes = [2, 128], strides = [1, 1]} : vector<4x256xf32> to vector<2x128xf32>
    %c4 = arith.constant 4 : index
    %c0_54 = arith.constant 0 : index
    %87 = vector.load %arg8[%c4, %c0_54] : memref<16x256xf32, #tpu.memory_space<vmem>>, vector<2x128xf32>
    %88 = arith.addf %86, %87 : vector<2x128xf32>
    %89 = vector.extract_strided_slice %85 {offsets = [2, 128], sizes = [2, 128], strides = [1, 1]} : vector<4x256xf32> to vector<2x128xf32>
    %c10 = arith.constant 10 : index
    %c128_55 = arith.constant 128 : index
    %90 = vector.load %arg8[%c10, %c128_55] : memref<16x256xf32, #tpu.memory_space<vmem>>, vector<2x128xf32>
    %91 = arith.addf %89, %90 : vector<2x128xf32>
    %92 = tpu.concatenate %88, %91 in 0 : vector<2x128xf32>, vector<2x128xf32> -> vector<4x128xf32>
    %93 = arith.negf %92 : vector<4x128xf32>
    %94 = math.exp %93 : vector<4x128xf32>
    %cst_56 = arith.constant 1.000000e+00 : f32
    %95 = vector.broadcast %cst_56 : f32 to vector<4x128xf32>
    %96 = arith.addf %95, %94 : vector<4x128xf32>
    %97 = arith.divf %95, %96 : vector<4x128xf32>
    %98 = math.tanh %92 : vector<4x128xf32>
    %99 = vector.extract_strided_slice %97 {offsets = [0, 0], sizes = [4, 32], strides = [1, 1]} : vector<4x128xf32> to vector<4x32xf32>
    %100 = vector.extract_strided_slice %97 {offsets = [0, 32], sizes = [4, 32], strides = [1, 1]} : vector<4x128xf32> to vector<4x32xf32>
    %101 = vector.extract_strided_slice %98 {offsets = [0, 64], sizes = [4, 32], strides = [1, 1]} : vector<4x128xf32> to vector<4x32xf32>
    %102 = vector.extract_strided_slice %97 {offsets = [0, 96], sizes = [4, 32], strides = [1, 1]} : vector<4x128xf32> to vector<4x32xf32>
    %c0_57 = arith.constant 0 : index
    %c0_58 = arith.constant 0 : index
    %103 = vector.load %arg10[%c0_57, %c0_58] : memref<4x32xf32, #tpu.memory_space<vmem>>, vector<4x32xf32>
    %104 = arith.mulf %100, %103 : vector<4x32xf32>
    %105 = arith.mulf %99, %101 : vector<4x32xf32>
    %106 = arith.addf %104, %105 : vector<4x32xf32>
    %107 = math.tanh %106 : vector<4x32xf32>
    %108 = arith.mulf %102, %107 : vector<4x32xf32>
    %c0_59 = arith.constant 0 : index
    %c0_60 = arith.constant 0 : index
    %109 = vector.load %arg10[%c0_59, %c0_60] : memref<4x32xf32, #tpu.memory_space<vmem>>, vector<4x32xf32>
    tpu.vector_store %arg10[%c0_59, %c0_60], %106 {strides = array<i32>} : memref<4x32xf32, #tpu.memory_space<vmem>>, vector<4x32xf32>,
    %c0_61 = arith.constant 0 : index
    %c0_62 = arith.constant 0 : index
    %110 = vector.load %arg9[%c0_61, %c0_62] : memref<4x32xf32, #tpu.memory_space<vmem>>, vector<4x32xf32>
    tpu.vector_store %arg9[%c0_61, %c0_62], %108 {strides = array<i32>} : memref<4x32xf32, #tpu.memory_space<vmem>>, vector<4x32xf32>,
    %111 = vector.extract_strided_slice %108 {offsets = [0, 0], sizes = [2, 32], strides = [1, 1]} : vector<4x32xf32> to vector<2x32xf32>
    %c2_63 = arith.constant 2 : index
    %c0_64 = arith.constant 0 : index
    %c0_65 = arith.constant 0 : index
    %112 = vector.load %arg6[%c2_63, %c0_64, %c0_65] : memref<8x2x64xf32, #tpu.memory_space<vmem>>, vector<1x2x32xf32>
    %113 = vector.shape_cast %112 : vector<1x2x32xf32> to vector<2x32xf32>
    %114 = vector.shape_cast %111 : vector<2x32xf32> to vector<1x2x32xf32>
    tpu.vector_store %arg6[%c2_63, %c0_64, %c0_65], %114 {strides = array<i32>} : memref<8x2x64xf32, #tpu.memory_space<vmem>>, vector<1x2x32xf32>,
    %115 = vector.extract_strided_slice %108 {offsets = [2, 0], sizes = [2, 32], strides = [1, 1]} : vector<4x32xf32> to vector<2x32xf32>
    %c5 = arith.constant 5 : index
    %c0_66 = arith.constant 0 : index
    %c32_67 = arith.constant 32 : index
    %116 = vector.load %arg6[%c5, %c0_66, %c32_67] : memref<8x2x64xf32, #tpu.memory_space<vmem>>, vector<1x2x32xf32>
    %117 = vector.shape_cast %116 : vector<1x2x32xf32> to vector<2x32xf32>
    %118 = vector.shape_cast %115 : vector<2x32xf32> to vector<1x2x32xf32>
    tpu.vector_store %arg6[%c5, %c0_66, %c32_67], %118 {strides = array<i32>} : memref<8x2x64xf32, #tpu.memory_space<vmem>>, vector<1x2x32xf32>,
    %c0_68 = arith.constant 0 : index
    %c0_69 = arith.constant 0 : index
    %119 = vector.load %arg9[%c0_68, %c0_69] : memref<4x32xf32, #tpu.memory_space<vmem>>, vector<4x32xf32>
    %c0_70 = arith.constant 0 : index
    %c0_71 = arith.constant 0 : index
    %120 = vector.load %arg2[%c0_70, %c0_71] : memref<32x256xf32, #tpu.memory_space<vmem>>, vector<32x256xf32>
    %cst_72 = arith.constant dense<0.000000e+00> : vector<4x256xf32>
    %121 = tpu.matmul %119, %120, %cst_72 {dimension_numbers = #tpu.dot_dimension_numbers<[1], [0], [0], [1], [0, 0, 1, 1], [], []>} : vector<4x32xf32>, vector<32x256xf32>, vector<4x256xf32> -> vector<4x256xf32>
    %122 = vector.extract_strided_slice %121 {offsets = [0, 0], sizes = [2, 128], strides = [1, 1]} : vector<4x256xf32> to vector<2x128xf32>
    %c6_73 = arith.constant 6 : index
    %c0_74 = arith.constant 0 : index
    %123 = vector.load %arg8[%c6_73, %c0_74] : memref<16x256xf32, #tpu.memory_space<vmem>>, vector<2x128xf32>
    %124 = arith.addf %122, %123 : vector<2x128xf32>
    %125 = vector.extract_strided_slice %121 {offsets = [2, 128], sizes = [2, 128], strides = [1, 1]} : vector<4x256xf32> to vector<2x128xf32>
    %c8 = arith.constant 8 : index
    %c128_75 = arith.constant 128 : index
    %126 = vector.load %arg8[%c8, %c128_75] : memref<16x256xf32, #tpu.memory_space<vmem>>, vector<2x128xf32>
    %127 = arith.addf %125, %126 : vector<2x128xf32>
    %128 = tpu.concatenate %124, %127 in 0 : vector<2x128xf32>, vector<2x128xf32> -> vector<4x128xf32>
    %129 = arith.negf %128 : vector<4x128xf32>
    %130 = math.exp %129 : vector<4x128xf32>
    %cst_76 = arith.constant 1.000000e+00 : f32
    %131 = vector.broadcast %cst_76 : f32 to vector<4x128xf32>
    %132 = arith.addf %131, %130 : vector<4x128xf32>
    %133 = arith.divf %131, %132 : vector<4x128xf32>
    %134 = math.tanh %128 : vector<4x128xf32>
    %135 = vector.extract_strided_slice %133 {offsets = [0, 0], sizes = [4, 32], strides = [1, 1]} : vector<4x128xf32> to vector<4x32xf32>
    %136 = vector.extract_strided_slice %133 {offsets = [0, 32], sizes = [4, 32], strides = [1, 1]} : vector<4x128xf32> to vector<4x32xf32>
    %137 = vector.extract_strided_slice %134 {offsets = [0, 64], sizes = [4, 32], strides = [1, 1]} : vector<4x128xf32> to vector<4x32xf32>
    %138 = vector.extract_strided_slice %133 {offsets = [0, 96], sizes = [4, 32], strides = [1, 1]} : vector<4x128xf32> to vector<4x32xf32>
    %c0_77 = arith.constant 0 : index
    %c0_78 = arith.constant 0 : index
    %139 = vector.load %arg10[%c0_77, %c0_78] : memref<4x32xf32, #tpu.memory_space<vmem>>, vector<4x32xf32>
    %140 = arith.mulf %136, %139 : vector<4x32xf32>
    %141 = arith.mulf %135, %137 : vector<4x32xf32>
    %142 = arith.addf %140, %141 : vector<4x32xf32>
    %143 = math.tanh %142 : vector<4x32xf32>
    %144 = arith.mulf %138, %143 : vector<4x32xf32>
    %c0_79 = arith.constant 0 : index
    %c0_80 = arith.constant 0 : index
    %145 = vector.load %arg10[%c0_79, %c0_80] : memref<4x32xf32, #tpu.memory_space<vmem>>, vector<4x32xf32>
    tpu.vector_store %arg10[%c0_79, %c0_80], %142 {strides = array<i32>} : memref<4x32xf32, #tpu.memory_space<vmem>>, vector<4x32xf32>,
    %c0_81 = arith.constant 0 : index
    %c0_82 = arith.constant 0 : index
    %146 = vector.load %arg9[%c0_81, %c0_82] : memref<4x32xf32, #tpu.memory_space<vmem>>, vector<4x32xf32>
    tpu.vector_store %arg9[%c0_81, %c0_82], %144 {strides = array<i32>} : memref<4x32xf32, #tpu.memory_space<vmem>>, vector<4x32xf32>,
    %147 = vector.extract_strided_slice %144 {offsets = [0, 0], sizes = [2, 32], strides = [1, 1]} : vector<4x32xf32> to vector<2x32xf32>
    %c3 = arith.constant 3 : index
    %c0_83 = arith.constant 0 : index
    %c0_84 = arith.constant 0 : index
    %148 = vector.load %arg6[%c3, %c0_83, %c0_84] : memref<8x2x64xf32, #tpu.memory_space<vmem>>, vector<1x2x32xf32>
    %149 = vector.shape_cast %148 : vector<1x2x32xf32> to vector<2x32xf32>
    %150 = vector.shape_cast %147 : vector<2x32xf32> to vector<1x2x32xf32>
    tpu.vector_store %arg6[%c3, %c0_83, %c0_84], %150 {strides = array<i32>} : memref<8x2x64xf32, #tpu.memory_space<vmem>>, vector<1x2x32xf32>,
    %151 = vector.extract_strided_slice %144 {offsets = [2, 0], sizes = [2, 32], strides = [1, 1]} : vector<4x32xf32> to vector<2x32xf32>
    %c4_85 = arith.constant 4 : index
    %c0_86 = arith.constant 0 : index
    %c32_87 = arith.constant 32 : index
    %152 = vector.load %arg6[%c4_85, %c0_86, %c32_87] : memref<8x2x64xf32, #tpu.memory_space<vmem>>, vector<1x2x32xf32>
    %153 = vector.shape_cast %152 : vector<1x2x32xf32> to vector<2x32xf32>
    %154 = vector.shape_cast %151 : vector<2x32xf32> to vector<1x2x32xf32>
    tpu.vector_store %arg6[%c4_85, %c0_86, %c32_87], %154 {strides = array<i32>} : memref<8x2x64xf32, #tpu.memory_space<vmem>>, vector<1x2x32xf32>,
    %c0_88 = arith.constant 0 : index
    %c0_89 = arith.constant 0 : index
    %155 = vector.load %arg9[%c0_88, %c0_89] : memref<4x32xf32, #tpu.memory_space<vmem>>, vector<4x32xf32>
    %c0_90 = arith.constant 0 : index
    %c0_91 = arith.constant 0 : index
    %156 = vector.load %arg2[%c0_90, %c0_91] : memref<32x256xf32, #tpu.memory_space<vmem>>, vector<32x256xf32>
    %cst_92 = arith.constant dense<0.000000e+00> : vector<4x256xf32>
    %157 = tpu.matmul %155, %156, %cst_92 {dimension_numbers = #tpu.dot_dimension_numbers<[1], [0], [0], [1], [0, 0, 1, 1], [], []>} : vector<4x32xf32>, vector<32x256xf32>, vector<4x256xf32> -> vector<4x256xf32>
    %158 = vector.extract_strided_slice %157 {offsets = [0, 0], sizes = [2, 128], strides = [1, 1]} : vector<4x256xf32> to vector<2x128xf32>
    %c8_93 = arith.constant 8 : index
    %c0_94 = arith.constant 0 : index
    %159 = vector.load %arg8[%c8_93, %c0_94] : memref<16x256xf32, #tpu.memory_space<vmem>>, vector<2x128xf32>
    %160 = arith.addf %158, %159 : vector<2x128xf32>
    %161 = vector.extract_strided_slice %157 {offsets = [2, 128], sizes = [2, 128], strides = [1, 1]} : vector<4x256xf32> to vector<2x128xf32>
    %c6_95 = arith.constant 6 : index
    %c128_96 = arith.constant 128 : index
    %162 = vector.load %arg8[%c6_95, %c128_96] : memref<16x256xf32, #tpu.memory_space<vmem>>, vector<2x128xf32>
    %163 = arith.addf %161, %162 : vector<2x128xf32>
    %164 = tpu.concatenate %160, %163 in 0 : vector<2x128xf32>, vector<2x128xf32> -> vector<4x128xf32>
    %165 = arith.negf %164 : vector<4x128xf32>
    %166 = math.exp %165 : vector<4x128xf32>
    %cst_97 = arith.constant 1.000000e+00 : f32
    %167 = vector.broadcast %cst_97 : f32 to vector<4x128xf32>
    %168 = arith.addf %167, %166 : vector<4x128xf32>
    %169 = arith.divf %167, %168 : vector<4x128xf32>
    %170 = math.tanh %164 : vector<4x128xf32>
    %171 = vector.extract_strided_slice %169 {offsets = [0, 0], sizes = [4, 32], strides = [1, 1]} : vector<4x128xf32> to vector<4x32xf32>
    %172 = vector.extract_strided_slice %169 {offsets = [0, 32], sizes = [4, 32], strides = [1, 1]} : vector<4x128xf32> to vector<4x32xf32>
    %173 = vector.extract_strided_slice %170 {offsets = [0, 64], sizes = [4, 32], strides = [1, 1]} : vector<4x128xf32> to vector<4x32xf32>
    %174 = vector.extract_strided_slice %169 {offsets = [0, 96], sizes = [4, 32], strides = [1, 1]} : vector<4x128xf32> to vector<4x32xf32>
    %c0_98 = arith.constant 0 : index
    %c0_99 = arith.constant 0 : index
    %175 = vector.load %arg10[%c0_98, %c0_99] : memref<4x32xf32, #tpu.memory_space<vmem>>, vector<4x32xf32>
    %176 = arith.mulf %172, %175 : vector<4x32xf32>
    %177 = arith.mulf %171, %173 : vector<4x32xf32>
    %178 = arith.addf %176, %177 : vector<4x32xf32>
    %179 = math.tanh %178 : vector<4x32xf32>
    %180 = arith.mulf %174, %179 : vector<4x32xf32>
    %c0_100 = arith.constant 0 : index
    %c0_101 = arith.constant 0 : index
    %181 = vector.load %arg10[%c0_100, %c0_101] : memref<4x32xf32, #tpu.memory_space<vmem>>, vector<4x32xf32>
    tpu.vector_store %arg10[%c0_100, %c0_101], %178 {strides = array<i32>} : memref<4x32xf32, #tpu.memory_space<vmem>>, vector<4x32xf32>,
    %c0_102 = arith.constant 0 : index
    %c0_103 = arith.constant 0 : index
    %182 = vector.load %arg9[%c0_102, %c0_103] : memref<4x32xf32, #tpu.memory_space<vmem>>, vector<4x32xf32>
    tpu.vector_store %arg9[%c0_102, %c0_103], %180 {strides = array<i32>} : memref<4x32xf32, #tpu.memory_space<vmem>>, vector<4x32xf32>,
    %183 = vector.extract_strided_slice %180 {offsets = [0, 0], sizes = [2, 32], strides = [1, 1]} : vector<4x32xf32> to vector<2x32xf32>
    %c4_104 = arith.constant 4 : index
    %c0_105 = arith.constant 0 : index
    %c0_106 = arith.constant 0 : index
    %184 = vector.load %arg6[%c4_104, %c0_105, %c0_106] : memref<8x2x64xf32, #tpu.memory_space<vmem>>, vector<1x2x32xf32>
    %185 = vector.shape_cast %184 : vector<1x2x32xf32> to vector<2x32xf32>
    %186 = vector.shape_cast %183 : vector<2x32xf32> to vector<1x2x32xf32>
    tpu.vector_store %arg6[%c4_104, %c0_105, %c0_106], %186 {strides = array<i32>} : memref<8x2x64xf32, #tpu.memory_space<vmem>>, vector<1x2x32xf32>,
    %187 = vector.extract_strided_slice %180 {offsets = [2, 0], sizes = [2, 32], strides = [1, 1]} : vector<4x32xf32> to vector<2x32xf32>
    %c3_107 = arith.constant 3 : index
    %c0_108 = arith.constant 0 : index
    %c32_109 = arith.constant 32 : index
    %188 = vector.load %arg6[%c3_107, %c0_108, %c32_109] : memref<8x2x64xf32, #tpu.memory_space<vmem>>, vector<1x2x32xf32>
    %189 = vector.shape_cast %188 : vector<1x2x32xf32> to vector<2x32xf32>
    %190 = vector.shape_cast %187 : vector<2x32xf32> to vector<1x2x32xf32>
    tpu.vector_store %arg6[%c3_107, %c0_108, %c32_109], %190 {strides = array<i32>} : memref<8x2x64xf32, #tpu.memory_space<vmem>>, vector<1x2x32xf32>,
    %c0_110 = arith.constant 0 : index
    %c0_111 = arith.constant 0 : index
    %191 = vector.load %arg9[%c0_110, %c0_111] : memref<4x32xf32, #tpu.memory_space<vmem>>, vector<4x32xf32>
    %c0_112 = arith.constant 0 : index
    %c0_113 = arith.constant 0 : index
    %192 = vector.load %arg2[%c0_112, %c0_113] : memref<32x256xf32, #tpu.memory_space<vmem>>, vector<32x256xf32>
    %cst_114 = arith.constant dense<0.000000e+00> : vector<4x256xf32>
    %193 = tpu.matmul %191, %192, %cst_114 {dimension_numbers = #tpu.dot_dimension_numbers<[1], [0], [0], [1], [0, 0, 1, 1], [], []>} : vector<4x32xf32>, vector<32x256xf32>, vector<4x256xf32> -> vector<4x256xf32>
    %194 = vector.extract_strided_slice %193 {offsets = [0, 0], sizes = [2, 128], strides = [1, 1]} : vector<4x256xf32> to vector<2x128xf32>
    %c10_115 = arith.constant 10 : index
    %c0_116 = arith.constant 0 : index
    %195 = vector.load %arg8[%c10_115, %c0_116] : memref<16x256xf32, #tpu.memory_space<vmem>>, vector<2x128xf32>
    %196 = arith.addf %194, %195 : vector<2x128xf32>
    %197 = vector.extract_strided_slice %193 {offsets = [2, 128], sizes = [2, 128], strides = [1, 1]} : vector<4x256xf32> to vector<2x128xf32>
    %c4_117 = arith.constant 4 : index
    %c128_118 = arith.constant 128 : index
    %198 = vector.load %arg8[%c4_117, %c128_118] : memref<16x256xf32, #tpu.memory_space<vmem>>, vector<2x128xf32>
    %199 = arith.addf %197, %198 : vector<2x128xf32>
    %200 = tpu.concatenate %196, %199 in 0 : vector<2x128xf32>, vector<2x128xf32> -> vector<4x128xf32>
    %201 = arith.negf %200 : vector<4x128xf32>
    %202 = math.exp %201 : vector<4x128xf32>
    %cst_119 = arith.constant 1.000000e+00 : f32
    %203 = vector.broadcast %cst_119 : f32 to vector<4x128xf32>
    %204 = arith.addf %203, %202 : vector<4x128xf32>
    %205 = arith.divf %203, %204 : vector<4x128xf32>
    %206 = math.tanh %200 : vector<4x128xf32>
    %207 = vector.extract_strided_slice %205 {offsets = [0, 0], sizes = [4, 32], strides = [1, 1]} : vector<4x128xf32> to vector<4x32xf32>
    %208 = vector.extract_strided_slice %205 {offsets = [0, 32], sizes = [4, 32], strides = [1, 1]} : vector<4x128xf32> to vector<4x32xf32>
    %209 = vector.extract_strided_slice %206 {offsets = [0, 64], sizes = [4, 32], strides = [1, 1]} : vector<4x128xf32> to vector<4x32xf32>
    %210 = vector.extract_strided_slice %205 {offsets = [0, 96], sizes = [4, 32], strides = [1, 1]} : vector<4x128xf32> to vector<4x32xf32>
    %c0_120 = arith.constant 0 : index
    %c0_121 = arith.constant 0 : index
    %211 = vector.load %arg10[%c0_120, %c0_121] : memref<4x32xf32, #tpu.memory_space<vmem>>, vector<4x32xf32>
    %212 = arith.mulf %208, %211 : vector<4x32xf32>
    %213 = arith.mulf %207, %209 : vector<4x32xf32>
    %214 = arith.addf %212, %213 : vector<4x32xf32>
    %215 = math.tanh %214 : vector<4x32xf32>
    %216 = arith.mulf %210, %215 : vector<4x32xf32>
    %c0_122 = arith.constant 0 : index
    %c0_123 = arith.constant 0 : index
    %217 = vector.load %arg10[%c0_122, %c0_123] : memref<4x32xf32, #tpu.memory_space<vmem>>, vector<4x32xf32>
    tpu.vector_store %arg10[%c0_122, %c0_123], %214 {strides = array<i32>} : memref<4x32xf32, #tpu.memory_space<vmem>>, vector<4x32xf32>,
    %c0_124 = arith.constant 0 : index
    %c0_125 = arith.constant 0 : index
    %218 = vector.load %arg9[%c0_124, %c0_125] : memref<4x32xf32, #tpu.memory_space<vmem>>, vector<4x32xf32>
    tpu.vector_store %arg9[%c0_124, %c0_125], %216 {strides = array<i32>} : memref<4x32xf32, #tpu.memory_space<vmem>>, vector<4x32xf32>,
    %219 = vector.extract_strided_slice %216 {offsets = [0, 0], sizes = [2, 32], strides = [1, 1]} : vector<4x32xf32> to vector<2x32xf32>
    %c5_126 = arith.constant 5 : index
    %c0_127 = arith.constant 0 : index
    %c0_128 = arith.constant 0 : index
    %220 = vector.load %arg6[%c5_126, %c0_127, %c0_128] : memref<8x2x64xf32, #tpu.memory_space<vmem>>, vector<1x2x32xf32>
    %221 = vector.shape_cast %220 : vector<1x2x32xf32> to vector<2x32xf32>
    %222 = vector.shape_cast %219 : vector<2x32xf32> to vector<1x2x32xf32>
    tpu.vector_store %arg6[%c5_126, %c0_127, %c0_128], %222 {strides = array<i32>} : memref<8x2x64xf32, #tpu.memory_space<vmem>>, vector<1x2x32xf32>,
    %223 = vector.extract_strided_slice %216 {offsets = [2, 0], sizes = [2, 32], strides = [1, 1]} : vector<4x32xf32> to vector<2x32xf32>
    %c2_129 = arith.constant 2 : index
    %c0_130 = arith.constant 0 : index
    %c32_131 = arith.constant 32 : index
    %224 = vector.load %arg6[%c2_129, %c0_130, %c32_131] : memref<8x2x64xf32, #tpu.memory_space<vmem>>, vector<1x2x32xf32>
    %225 = vector.shape_cast %224 : vector<1x2x32xf32> to vector<2x32xf32>
    %226 = vector.shape_cast %223 : vector<2x32xf32> to vector<1x2x32xf32>
    tpu.vector_store %arg6[%c2_129, %c0_130, %c32_131], %226 {strides = array<i32>} : memref<8x2x64xf32, #tpu.memory_space<vmem>>, vector<1x2x32xf32>,
    %c0_132 = arith.constant 0 : index
    %c0_133 = arith.constant 0 : index
    %227 = vector.load %arg9[%c0_132, %c0_133] : memref<4x32xf32, #tpu.memory_space<vmem>>, vector<4x32xf32>
    %c0_134 = arith.constant 0 : index
    %c0_135 = arith.constant 0 : index
    %228 = vector.load %arg2[%c0_134, %c0_135] : memref<32x256xf32, #tpu.memory_space<vmem>>, vector<32x256xf32>
    %cst_136 = arith.constant dense<0.000000e+00> : vector<4x256xf32>
    %229 = tpu.matmul %227, %228, %cst_136 {dimension_numbers = #tpu.dot_dimension_numbers<[1], [0], [0], [1], [0, 0, 1, 1], [], []>} : vector<4x32xf32>, vector<32x256xf32>, vector<4x256xf32> -> vector<4x256xf32>
    %230 = vector.extract_strided_slice %229 {offsets = [0, 0], sizes = [2, 128], strides = [1, 1]} : vector<4x256xf32> to vector<2x128xf32>
    %c12_137 = arith.constant 12 : index
    %c0_138 = arith.constant 0 : index
    %231 = vector.load %arg8[%c12_137, %c0_138] : memref<16x256xf32, #tpu.memory_space<vmem>>, vector<2x128xf32>
    %232 = arith.addf %230, %231 : vector<2x128xf32>
    %233 = vector.extract_strided_slice %229 {offsets = [2, 128], sizes = [2, 128], strides = [1, 1]} : vector<4x256xf32> to vector<2x128xf32>
    %c2_139 = arith.constant 2 : index
    %c128_140 = arith.constant 128 : index
    %234 = vector.load %arg8[%c2_139, %c128_140] : memref<16x256xf32, #tpu.memory_space<vmem>>, vector<2x128xf32>
    %235 = arith.addf %233, %234 : vector<2x128xf32>
    %236 = tpu.concatenate %232, %235 in 0 : vector<2x128xf32>, vector<2x128xf32> -> vector<4x128xf32>
    %237 = arith.negf %236 : vector<4x128xf32>
    %238 = math.exp %237 : vector<4x128xf32>
    %cst_141 = arith.constant 1.000000e+00 : f32
    %239 = vector.broadcast %cst_141 : f32 to vector<4x128xf32>
    %240 = arith.addf %239, %238 : vector<4x128xf32>
    %241 = arith.divf %239, %240 : vector<4x128xf32>
    %242 = math.tanh %236 : vector<4x128xf32>
    %243 = vector.extract_strided_slice %241 {offsets = [0, 0], sizes = [4, 32], strides = [1, 1]} : vector<4x128xf32> to vector<4x32xf32>
    %244 = vector.extract_strided_slice %241 {offsets = [0, 32], sizes = [4, 32], strides = [1, 1]} : vector<4x128xf32> to vector<4x32xf32>
    %245 = vector.extract_strided_slice %242 {offsets = [0, 64], sizes = [4, 32], strides = [1, 1]} : vector<4x128xf32> to vector<4x32xf32>
    %246 = vector.extract_strided_slice %241 {offsets = [0, 96], sizes = [4, 32], strides = [1, 1]} : vector<4x128xf32> to vector<4x32xf32>
    %c0_142 = arith.constant 0 : index
    %c0_143 = arith.constant 0 : index
    %247 = vector.load %arg10[%c0_142, %c0_143] : memref<4x32xf32, #tpu.memory_space<vmem>>, vector<4x32xf32>
    %248 = arith.mulf %244, %247 : vector<4x32xf32>
    %249 = arith.mulf %243, %245 : vector<4x32xf32>
    %250 = arith.addf %248, %249 : vector<4x32xf32>
    %251 = math.tanh %250 : vector<4x32xf32>
    %252 = arith.mulf %246, %251 : vector<4x32xf32>
    %c0_144 = arith.constant 0 : index
    %c0_145 = arith.constant 0 : index
    %253 = vector.load %arg10[%c0_144, %c0_145] : memref<4x32xf32, #tpu.memory_space<vmem>>, vector<4x32xf32>
    tpu.vector_store %arg10[%c0_144, %c0_145], %250 {strides = array<i32>} : memref<4x32xf32, #tpu.memory_space<vmem>>, vector<4x32xf32>,
    %c0_146 = arith.constant 0 : index
    %c0_147 = arith.constant 0 : index
    %254 = vector.load %arg9[%c0_146, %c0_147] : memref<4x32xf32, #tpu.memory_space<vmem>>, vector<4x32xf32>
    tpu.vector_store %arg9[%c0_146, %c0_147], %252 {strides = array<i32>} : memref<4x32xf32, #tpu.memory_space<vmem>>, vector<4x32xf32>,
    %255 = vector.extract_strided_slice %252 {offsets = [0, 0], sizes = [2, 32], strides = [1, 1]} : vector<4x32xf32> to vector<2x32xf32>
    %c6_148 = arith.constant 6 : index
    %c0_149 = arith.constant 0 : index
    %c0_150 = arith.constant 0 : index
    %256 = vector.load %arg6[%c6_148, %c0_149, %c0_150] : memref<8x2x64xf32, #tpu.memory_space<vmem>>, vector<1x2x32xf32>
    %257 = vector.shape_cast %256 : vector<1x2x32xf32> to vector<2x32xf32>
    %258 = vector.shape_cast %255 : vector<2x32xf32> to vector<1x2x32xf32>
    tpu.vector_store %arg6[%c6_148, %c0_149, %c0_150], %258 {strides = array<i32>} : memref<8x2x64xf32, #tpu.memory_space<vmem>>, vector<1x2x32xf32>,
    %259 = vector.extract_strided_slice %252 {offsets = [2, 0], sizes = [2, 32], strides = [1, 1]} : vector<4x32xf32> to vector<2x32xf32>
    %c1_151 = arith.constant 1 : index
    %c0_152 = arith.constant 0 : index
    %c32_153 = arith.constant 32 : index
    %260 = vector.load %arg6[%c1_151, %c0_152, %c32_153] : memref<8x2x64xf32, #tpu.memory_space<vmem>>, vector<1x2x32xf32>
    %261 = vector.shape_cast %260 : vector<1x2x32xf32> to vector<2x32xf32>
    %262 = vector.shape_cast %259 : vector<2x32xf32> to vector<1x2x32xf32>
    tpu.vector_store %arg6[%c1_151, %c0_152, %c32_153], %262 {strides = array<i32>} : memref<8x2x64xf32, #tpu.memory_space<vmem>>, vector<1x2x32xf32>,
    %c0_154 = arith.constant 0 : index
    %c0_155 = arith.constant 0 : index
    %263 = vector.load %arg9[%c0_154, %c0_155] : memref<4x32xf32, #tpu.memory_space<vmem>>, vector<4x32xf32>
    %c0_156 = arith.constant 0 : index
    %c0_157 = arith.constant 0 : index
    %264 = vector.load %arg2[%c0_156, %c0_157] : memref<32x256xf32, #tpu.memory_space<vmem>>, vector<32x256xf32>
    %cst_158 = arith.constant dense<0.000000e+00> : vector<4x256xf32>
    %265 = tpu.matmul %263, %264, %cst_158 {dimension_numbers = #tpu.dot_dimension_numbers<[1], [0], [0], [1], [0, 0, 1, 1], [], []>} : vector<4x32xf32>, vector<32x256xf32>, vector<4x256xf32> -> vector<4x256xf32>
    %266 = vector.extract_strided_slice %265 {offsets = [0, 0], sizes = [2, 128], strides = [1, 1]} : vector<4x256xf32> to vector<2x128xf32>
    %c14_159 = arith.constant 14 : index
    %c0_160 = arith.constant 0 : index
    %267 = vector.load %arg8[%c14_159, %c0_160] : memref<16x256xf32, #tpu.memory_space<vmem>>, vector<2x128xf32>
    %268 = arith.addf %266, %267 : vector<2x128xf32>
    %269 = vector.extract_strided_slice %265 {offsets = [2, 128], sizes = [2, 128], strides = [1, 1]} : vector<4x256xf32> to vector<2x128xf32>
    %c0_161 = arith.constant 0 : index
    %c128_162 = arith.constant 128 : index
    %270 = vector.load %arg8[%c0_161, %c128_162] : memref<16x256xf32, #tpu.memory_space<vmem>>, vector<2x128xf32>
    %271 = arith.addf %269, %270 : vector<2x128xf32>
    %272 = tpu.concatenate %268, %271 in 0 : vector<2x128xf32>, vector<2x128xf32> -> vector<4x128xf32>
    %273 = arith.negf %272 : vector<4x128xf32>
    %274 = math.exp %273 : vector<4x128xf32>
    %cst_163 = arith.constant 1.000000e+00 : f32
    %275 = vector.broadcast %cst_163 : f32 to vector<4x128xf32>
    %276 = arith.addf %275, %274 : vector<4x128xf32>
    %277 = arith.divf %275, %276 : vector<4x128xf32>
    %278 = math.tanh %272 : vector<4x128xf32>
    %279 = vector.extract_strided_slice %277 {offsets = [0, 0], sizes = [4, 32], strides = [1, 1]} : vector<4x128xf32> to vector<4x32xf32>
    %280 = vector.extract_strided_slice %277 {offsets = [0, 32], sizes = [4, 32], strides = [1, 1]} : vector<4x128xf32> to vector<4x32xf32>
    %281 = vector.extract_strided_slice %278 {offsets = [0, 64], sizes = [4, 32], strides = [1, 1]} : vector<4x128xf32> to vector<4x32xf32>
    %282 = vector.extract_strided_slice %277 {offsets = [0, 96], sizes = [4, 32], strides = [1, 1]} : vector<4x128xf32> to vector<4x32xf32>
    %c0_164 = arith.constant 0 : index
    %c0_165 = arith.constant 0 : index
    %283 = vector.load %arg10[%c0_164, %c0_165] : memref<4x32xf32, #tpu.memory_space<vmem>>, vector<4x32xf32>
    %284 = arith.mulf %280, %283 : vector<4x32xf32>
    %285 = arith.mulf %279, %281 : vector<4x32xf32>
    %286 = arith.addf %284, %285 : vector<4x32xf32>
    %287 = math.tanh %286 : vector<4x32xf32>
    %288 = arith.mulf %282, %287 : vector<4x32xf32>
    %c0_166 = arith.constant 0 : index
    %c0_167 = arith.constant 0 : index
    %289 = vector.load %arg10[%c0_166, %c0_167] : memref<4x32xf32, #tpu.memory_space<vmem>>, vector<4x32xf32>
    tpu.vector_store %arg10[%c0_166, %c0_167], %286 {strides = array<i32>} : memref<4x32xf32, #tpu.memory_space<vmem>>, vector<4x32xf32>,
    %c0_168 = arith.constant 0 : index
    %c0_169 = arith.constant 0 : index
    %290 = vector.load %arg9[%c0_168, %c0_169] : memref<4x32xf32, #tpu.memory_space<vmem>>, vector<4x32xf32>
    tpu.vector_store %arg9[%c0_168, %c0_169], %288 {strides = array<i32>} : memref<4x32xf32, #tpu.memory_space<vmem>>, vector<4x32xf32>,
    %291 = vector.extract_strided_slice %288 {offsets = [0, 0], sizes = [2, 32], strides = [1, 1]} : vector<4x32xf32> to vector<2x32xf32>
    %c7_170 = arith.constant 7 : index
    %c0_171 = arith.constant 0 : index
    %c0_172 = arith.constant 0 : index
    %292 = vector.load %arg6[%c7_170, %c0_171, %c0_172] : memref<8x2x64xf32, #tpu.memory_space<vmem>>, vector<1x2x32xf32>
    %293 = vector.shape_cast %292 : vector<1x2x32xf32> to vector<2x32xf32>
    %294 = vector.shape_cast %291 : vector<2x32xf32> to vector<1x2x32xf32>
    tpu.vector_store %arg6[%c7_170, %c0_171, %c0_172], %294 {strides = array<i32>} : memref<8x2x64xf32, #tpu.memory_space<vmem>>, vector<1x2x32xf32>,
    %295 = vector.extract_strided_slice %288 {offsets = [2, 0], sizes = [2, 32], strides = [1, 1]} : vector<4x32xf32> to vector<2x32xf32>
    %c0_173 = arith.constant 0 : index
    %c0_174 = arith.constant 0 : index
    %c32_175 = arith.constant 32 : index
    %296 = vector.load %arg6[%c0_173, %c0_174, %c32_175] : memref<8x2x64xf32, #tpu.memory_space<vmem>>, vector<1x2x32xf32>
    %297 = vector.shape_cast %296 : vector<1x2x32xf32> to vector<2x32xf32>
    %298 = vector.shape_cast %295 : vector<2x32xf32> to vector<1x2x32xf32>
    tpu.vector_store %arg6[%c0_173, %c0_174, %c32_175], %298 {strides = array<i32>} : memref<8x2x64xf32, #tpu.memory_space<vmem>>, vector<1x2x32xf32>,
    %c7_176 = arith.constant 7 : index
    %c0_177 = arith.constant 0 : index
    %c0_178 = arith.constant 0 : index
    %299 = vector.load %arg6[%c7_176, %c0_177, %c0_178] : memref<8x2x64xf32, #tpu.memory_space<vmem>>, vector<1x2x64xf32>
    %300 = vector.shape_cast %299 : vector<1x2x64xf32> to vector<2x64xf32>
    %c0_179 = arith.constant 0 : index
    %c0_180 = arith.constant 0 : index
    %301 = vector.load %arg4[%c0_179, %c0_180] : memref<64x4xf32, #tpu.memory_space<vmem>>, vector<64x4xf32>
    %cst_181 = arith.constant dense<0.000000e+00> : vector<2x4xf32>
    %302 = tpu.matmul %300, %301, %cst_181 {dimension_numbers = #tpu.dot_dimension_numbers<[1], [0], [0], [1], [0, 0, 1, 1], [], []>} : vector<2x64xf32>, vector<64x4xf32>, vector<2x4xf32> -> vector<2x4xf32>
    %c0_182 = arith.constant 0 : index
    %c0_183 = arith.constant 0 : index
    %303 = vector.load %arg5[%c0_182, %c0_183] : memref<1x4xf32, #tpu.memory_space<vmem>>, vector<1x4xf32>
    %304 = vector.broadcast %303 : vector<1x4xf32> to vector<2x4xf32>
    %305 = arith.addf %302, %304 : vector<2x4xf32>
    %cst_184 = arith.constant dense<0xFF800000> : vector<2xf32>
    %306 = vector.multi_reduction <maximumf>, %305, %cst_184 [1] : vector<2x4xf32> to vector<2xf32>
    %307 = vector.shape_cast %306 : vector<2xf32> to vector<2x1xf32>
    %308 = vector.broadcast %307 : vector<2x1xf32> to vector<2x4xf32>
    %309 = arith.subf %305, %308 : vector<2x4xf32>
    %310 = math.exp %309 : vector<2x4xf32>
    %cst_185 = arith.constant dense<0.000000e+00> : vector<2xf32>
    %311 = vector.multi_reduction <add>, %310, %cst_185 [1] : vector<2x4xf32> to vector<2xf32>
    %312 = vector.shape_cast %311 : vector<2xf32> to vector<2x1xf32>
    %313 = vector.broadcast %312 : vector<2x1xf32> to vector<2x4xf32>
    %314 = arith.divf %310, %313 : vector<2x4xf32>
    %c0_186 = arith.constant 0 : index
    %c0_187 = arith.constant 0 : index
    %315 = vector.load %arg7[%c0_186, %c0_187] : memref<2x4xf32, #tpu.memory_space<vmem>>, vector<2x4xf32>
    tpu.vector_store %arg7[%c0_186, %c0_187], %314 {strides = array<i32>} : memref<2x4xf32, #tpu.memory_space<vmem>>, vector<2x4xf32>,
    return
  }
}

</mosaic_0001>

<bundles_post_ra>
// kernel: lstm_model_forward.3
= control target key start
LH: loop header
LB: loop body
LE: loop exit
PB: predicated region body
PF: predicated region fallthrough
CT: control target
= control target key end

     0   :  { %13 = vsyncpa [#allocation6], 0  ;;  %vm145_vm0 = vcmask 257024   ;;  %v1648_v7 = vmov 0.0   ;;  %s2040_s0 = inlined_call_operand.vmem [shape: f32[16,64], index: 0, kind: input, shape index: {}]   ;;  %s2041_s1 = inlined_call_operand.vmem [shape: f32[64,256], index: 1, kind: input, shape index: {}]   ;;  %s2042_s2 = inlined_call_operand.vmem [shape: f32[32,256], index: 2, kind: input, shape index: {}]   ;;  %s2043_s3 = inlined_call_operand.vmem [shape: f32[1,256], index: 3, kind: input, shape index: {}]   ;;  %s2044_s4 = inlined_call_operand.vmem [shape: f32[64,4], index: 4, kind: input, shape index: {}]   ;;  %s2045_s5 = inlined_call_operand.vmem [shape: f32[1,4], index: 5, kind: input, shape index: {}]   ;;  %s2046_s6 = inlined_call_operand.hbm [shape: f32[8,2,64], index: 6, kind: output, shape index: {0}]   ;;  %s2047_s7 = inlined_call_operand.hbm [shape: f32[2,4], index: 7, kind: output, shape index: {1}]  }
   0x1   :  { %v30_v0 = vld [vmem:[%s2041_s1 + $0x8] sm:$0xff]  ;;  %v32_v1 = vld [vmem:[%s2041_s1 + $0x18] sm:$0xff]  ;;  %v29_v2 = vld [vmem:[%s2041_s1] sm:$0xff]  ;;  %128 = vmatprep.mubr.f32.mxu0 %v1648_v7  ;;  %225 = vmatprep.mubr.f32.mxu1 %v1648_v7  ;;  %146 = vst.msk [vmem:[#allocation3] sm:$0xf] %vm145_vm0, %v1648_v7 }
   0x2   :  { %v1431_v3 = vpack.c.bf16 %v32_v1, %v30_v0  ;;  %v31_v4 = vld [vmem:[%s2041_s1 + $0x10] sm:$0xff]  ;;  %v34_v5 = vld [vmem:[%s2041_s1 + $0x28] sm:$0xff]  ;;  %v36_v6 = vld [vmem:[%s2041_s1 + $0x38] sm:$0xff]  ;;  %147 = vst.msk [vmem:[#allocation4] sm:$0xf] %vm145_vm0, %v1648_v7 }
   0x3   :  { %v1433_v8 = vpack.c.bf16 %v31_v4, %v29_v2  ;;  %v1435_v9 = vpack.c.bf16 %v36_v6, %v34_v5  ;;  %v33_v10 = vld [vmem:[%s2041_s1 + $0x20] sm:$0xff]  ;;  %v35_v11 = vld [vmem:[%s2041_s1 + $0x30] sm:$0xff]  ;;  %v38_v12 = vld [vmem:[%s2041_s1 + $0x48] sm:$0xff] }
   0x4   :  { %1432 = vmatprep.subr.bf16.mxu0 %v1431_v3  ;;  %v40_v13 = vld [vmem:[%s2041_s1 + $0x58] sm:$0xff]  ;;  %v1437_v14 = vpack.c.bf16 %v35_v11, %v33_v10  ;;  %v37_v15 = vld [vmem:[%s2041_s1 + $0x40] sm:$0xff]  ;;  %v39_v16 = vld [vmem:[%s2041_s1 + $0x50] sm:$0xff] }
   0x5   :  { %1434 = vmatpush1.bf16.msra.mxu0 %v1433_v8  ;;  %v1439_v17 = vpack.c.bf16 %v40_v13, %v38_v12  ;;  %v42_v18 = vld [vmem:[%s2041_s1 + $0x68] sm:$0xff]  ;;  %v44_v19 = vld [vmem:[%s2041_s1 + $0x78] sm:$0xff]  ;;  %v149_v22 = vld [vmem:[%s2042_s2] sm:$0xff]  ;;  %v1441_v28 = vpack.c.bf16 %v39_v16, %v37_v15 }
   0x6   :  { %1436 = vmatprep.subr.bf16.mxu0 %v1435_v9  ;;  %v150_v20 = vld [vmem:[%s2042_s2 + $0x8] sm:$0xff]  ;;  %v152_v21 = vld [vmem:[%s2042_s2 + $0x18] sm:$0xff]  ;;  %v151_v23 = vld [vmem:[%s2042_s2 + $0x10] sm:$0xff]  ;;  %v1443_v32 = vpack.c.bf16 %v44_v19, %v42_v18 }
   0x7   :  { %v1757_v24 = vpack.c.bf16 %v152_v21, %v150_v20  ;;  %v1759_v25 = vpack.c.bf16 %v151_v23, %v149_v22  ;;  %v154_v26 = vld [vmem:[%s2042_s2 + $0x28] sm:$0xff]  ;;  %v156_v27 = vld [vmem:[%s2042_s2 + $0x38] sm:$0xff]  ;;  %v153_v30 = vld [vmem:[%s2042_s2 + $0x20] sm:$0xff] }
   0x8   :  { %v1767_v29 = vpack.c.bf16 %v156_v27, %v154_v26  ;;  %v155_v31 = vld [vmem:[%s2042_s2 + $0x30] sm:$0xff]  ;;  %v41_v33 = vld [vmem:[%s2041_s1 + $0x60] sm:$0xff] }
   0x9   :  { %1438 = vmatpush1.bf16.msra.mxu0 %v1437_v14  ;;  %v43_v34 = vld [vmem:[%s2041_s1 + $0x70] sm:$0xff]  ;;  %1448 = vmatprep.subr.bf16.mxu1 %v1757_v24 }
   0xa   :  { %1440 = vmatprep.subr.bf16.mxu0 %v1439_v17 }
   0xb   :  { %14 = vsyncpa [#allocation8], 0  ;;  %1450 = vmatpush1.bf16.msra.mxu1 %v1759_v25  ;;  %v1783_v35 = vpack.c.bf16 %v155_v31, %v153_v30  ;;  %v1445_v36 = vpack.c.bf16 %v43_v34, %v41_v33  ;;  %v148_v37 = vld [vmem:[#allocation3] sm:$0xf]  ;;  %vm157_vm1 = vcmask 261120   ;;  %vm57_vm2 = vcmask 523264  }
   0xc   :  { %1452 = vmatprep.subr.bf16.mxu1 %v1767_v29  ;;  %v27_v38 = vld [vmem:[%s2040_s0] sm:$0xff]  ;;  %v28_v39 = vld [vmem:[%s2040_s0 + $0x8] sm:$0xff]  ;;  %v47_v40 = vlaneseq  ;;  %vm239_vm3 = vcmask 1041408   ;;  %s1650_s29 = smov 32   ;;  %s1651_s30 = smov 96   ;;  %vm280_vm4 = vcmask 254976  }
   0xd   :  { %1442 = vmatpush1.bf16.msra.mxu0 %v1441_v28  ;;  %v45_v43 = vld [vmem:[%s2043_s3] sm:$0x3]  ;;  %s1649_s3 = smov 64   ;;  %v248_v0 = vld [vmem:[#allocation4] sm:$0xf]  ;;  %vm286_vm5 = vcmask 519426  }
   0xe   :  { %1444 = vmatprep.subr.bf16.mxu0 %v1443_v32  ;;  %v48_v41 = vshrl.u32 %v47_v40, 7  ;;  %vm1653_vm6 = vmmov 0   ;;  %vm1340_vm7 = vcmask 25600  }
   0xf   :  { %1454 = vmatpush1.bf16.msra.mxu1 %v1783_v35 }
  0x10   :  { %1456 = vmatprep.subr.bf16.mxu1 %v1757_v24  ;;  %v49_v42 = vsub.s32 0, %v48_v41  ;;  %v53_v44 = vsub.s32 1, %v48_v41 }
  0x11   :  { %1446 = vmatpush1.bf16.msra.mxu0 %v1445_v36 }
  0x12   :  { %1385 = vmatmul.mubr.msk.f32.vlgmr.msra.gmra.mrb[0].mxu1 %vm157_vm1, %v148_v37  ;;  %1480 = vmatprep.subr.bf16.mxu0 %v1757_v24  ;;  %v50_v45 = vrot.slane %v45_v43, %v49_v42  ;;  %v54_v46 = vrot.slane %v45_v43, %v53_v44 }
  0x13   :  { %1458 = vmatpush1.bf16.msra.mxu1 %v1759_v25  ;;  %364 = vmatprep.mubr.f32.mxu1 %v1648_v7 }
  0x14   :  { %1383 = vmatmul.mubr.msk.f32.vlgmr.msra.gmra.mrb[0].mxu0 %vm57_vm2, %v27_v38  ;;  %1460 = vmatprep.subr.bf16.mxu1 %v1767_v29 }
  0x15   :  { %134 = vmatprep.mubr.f32.mxu0 %v1648_v7  ;;  %1482 = vmatpush1.bf16.msra.mxu0 %v1759_v25 }
  0x16   :  { %1484 = vmatprep.subr.bf16.mxu0 %v1767_v29 }
  0x17   :  { %1462 = vmatpush1.bf16.msra.mxu1 %v1783_v35 }
  0x18   :  { %1384 = vmatmul.mubr.msk.f32.gmra.mrb[2].mxu0 %vm57_vm2, %v28_v39  ;;  %1464 = vmatprep.subr.bf16.mxu1 %v1757_v24 }
  0x19   :  { %1486 = vmatpush1.bf16.msra.mxu0 %v1783_v35  ;;  %781 = vmatprep.mubr.f32.mxu0 %v1648_v7 }
  0x1a   :  { %1496 = vmatprep.subr.bf16.mxu0 %v1757_v24 }
  0xe5   :  { %v227_v47 = vpop.f32.mrb[0].mxu1 }
  0xe6   :  { %v229_v48 = vpop.f32.mrb[1].mxu1 }
  0xe7   :  { %v130_v49 = vpop.f32.mrb[0].mxu0 }
  0xe8   :  { %v131_v50 = vadd.f32 %v130_v49, %v50_v45  ;;  %v132_v51 = vpop.f32.mrb[1].mxu0 }
  0xe9   :  { %v133_v52 = vadd.f32 %v132_v51, %v54_v46 }
  0xea   :  { %141 = vst [vmem:[#allocation2] sm:$0xff] %v131_v50 }
  0xeb   :  { %142 = vst [vmem:[#allocation2 + $0x8] sm:$0xff] %v133_v52  ;;  %v136_v53 = vpop.f32.mrb[2].mxu0 }
  0xec   :  { %v137_v54 = vadd.f32 %v136_v53, %v50_v45  ;;  %v138_v55 = vpop.f32.mrb[3].mxu0 }
  0xed   :  { %v139_v56 = vadd.f32 %v138_v55, %v54_v46 }
  0xee   :  { %143 = vst [vmem:[#allocation2 + $0x10] sm:$0xff] %v137_v54 }
  0xef   :  { %144 = vst [vmem:[#allocation2 + $0x18] sm:$0xff] %v139_v56 }
  0xf1   :  { %v232_v57 = vld [vmem:[#allocation2] sm:$0x3]  ;;  %v371_v19 = vld [vmem:[#allocation2] sm:$0xc]  ;;  %v511_v50 = vld [vmem:[#allocation2] sm:$0x30] }
  0xf2   :  { %v233_v60 = vadd.f32 %v232_v57, %v227_v47  ;;  %v373_v21 = vrot.slane %v371_v19, 2  ;;  %v513_v51 = vrot.slane %v511_v50, 4 }
  0xf6   :  { %v234_v58 = vld [vmem:[#allocation2 + $0x18] sm:$0xc0]  ;;  %v376_v20 = vld [vmem:[#allocation2 + $0x18] sm:$0x30]  ;;  %v516_v55 = vld [vmem:[#allocation2 + $0x18] sm:$0xc] }
  0xf7   :  { %v236_v59 = vrot.slane %v234_v58, 4  ;;  %v378_v23 = vrot.slane %v376_v20, 2 }
  0xf9   :  { %v238_v61 = vadd.f32 %v236_v59, %v229_v48 }
  0xfb   :  { %v240_v62 = vsel %vm239_vm3, %v233_v60, %v238_v61 }
  0xfc   :  { %1532 = vtanh.f32 %v240_v62  ;;  %v1386_v1 = vmul.f32 -1.442695, %v240_v62 }
  0xfe   :  { %1534 = vpow2.f32 %v1386_v1 }
 0x106   :  { %v1533_v63 = vpop.eup %1532 }
 0x107   :  { %255 = vrot.lane.b32.xlu0 %v1533_v63, %s1649_s3 }
 0x108   :  { %v1535_v2 = vpop.eup %1534 }
 0x109   :  { %v244_v3 = vadd.f32 1.0, %v1535_v2 }
 0x10b   :  { %250 = vrot.lane.b32.xlu0 %v248_v0, %s1650_s29  ;;  %1536 = vrcp.f32 %v244_v3 }
 0x115   :  { %v1537_v4 = vpop.eup %1536 }
 0x179   :  { %v256_v5 = vpop.permute.xlu0 %255 }
 0x17a   :  { %v258_v6 = vmul.f32 %v1537_v4, %v256_v5 }
 0x17c   :  { %260 = vrot.lane.b32.xlu1 %v258_v6, %s1650_s29 }
 0x17d   :  { %v251_v8 = vpop.permute.xlu0 %250 }
 0x17e   :  { %v253_v9 = vmul.f32 %v1537_v4, %v251_v8 }
 0x1ee   :  { %v261_v10 = vpop.permute.xlu1 %260 }
 0x1ef   :  { %v263_v11 = vadd.f32 %v261_v10, %v253_v9 }
 0x1f1   :  { %1538 = vtanh.f32 %v263_v11 }
 0x1fb   :  { %v1539_v12 = vpop.eup %1538 }
 0x1fc   :  { %266 = vrot.lane.b32.xlu1 %v1539_v12, %s1649_s3 }
 0x200   :  { %271 = vrot.lane.b32.xlu1 %v263_v11, %s1651_s30 }
 0x26e   :  { %v267_v13 = vpop.permute.xlu1 %266 }
 0x26f   :  { %v1818_v14 = vmul.f32 %v1537_v4, %v267_v13  ;;  %v648_v13 = vld [vmem:[#allocation2] sm:$0xc0] }
 0x271   :  { %276 = vrot.lane.b32.xlu0 %v1818_v14, %s1650_s29 }
 0x272   :  { %v272_v15 = vpop.permute.xlu1 %271 }
 0x273   :  { %274 = vst.msk [vmem:[#allocation4] sm:$0xf] %vm145_vm0, %v272_v15  ;;  %v653_v15 = vld [vmem:[#allocation2 + $0x18] sm:$0x3] }
 0x27a   :  { %v389_v16 = vld [vmem:[#allocation4] sm:$0xf] }
 0x27b   :  { %391 = vrot.lane.b32.xlu1 %v389_v16, %s1650_s29  ;;  %v650_v16 = vrot.slane %v648_v13, 6 }
 0x2e3   :  { %v277_v17 = vpop.permute.xlu0 %276 }
 0x2e4   :  { %279 = vst.msk [vmem:[#allocation3] sm:$0xf] %vm145_vm0, %v277_v17 }
 0x2e5   :  { %281 = vst.msk [vmem:[#allocation5] sm:$0x3] %vm280_vm4, %v277_v17 }
 0x2eb   :  { %v288_v18 = vld [vmem:[#allocation3] sm:$0xf] }
 0x2ec   :  { %1387 = vmatmul.mubr.msk.f32.vlgmr.msra.gmra.mrb[2].mxu1 %vm157_vm1, %v288_v18  ;;  %v655_v18 = vrot.slane %v653_v15, 6 }
 0x2ed   :  { %1466 = vmatpush1.bf16.msra.mxu1 %v1759_v25  ;;  %504 = vmatprep.mubr.f32.mxu1 %v1648_v7  ;;  %v392_v39 = vpop.permute.xlu1 %391 }
 0x2ee   :  { %1468 = vmatprep.subr.bf16.mxu1 %v1767_v29 }
 0x2f1   :  { %1470 = vmatpush1.bf16.msra.mxu1 %v1783_v35 }
 0x2f2   :  { %1472 = vmatprep.subr.bf16.mxu1 %v1757_v24 }
 0x3bf   :  { %v366_v22 = vpop.f32.mrb[2].mxu1 }
 0x3c0   :  { %v375_v26 = vadd.f32 %v373_v21, %v366_v22  ;;  %v368_v27 = vpop.f32.mrb[3].mxu1 }
 0x3c1   :  { %v380_v28 = vadd.f32 %v378_v23, %v368_v27 }
 0x3c3   :  { %v381_v30 = vsel %vm239_vm3, %v375_v26, %v380_v28 }
 0x3c4   :  { %1540 = vtanh.f32 %v381_v30  ;;  %v1388_v32 = vmul.f32 -1.442695, %v381_v30 }
 0x3c6   :  { %1542 = vpow2.f32 %v1388_v32 }
 0x3ce   :  { %v1541_v31 = vpop.eup %1540 }
 0x3cf   :  { %396 = vrot.lane.b32.xlu0 %v1541_v31, %s1649_s3 }
 0x3d0   :  { %v1543_v33 = vpop.eup %1542 }
 0x3d1   :  { %v385_v34 = vadd.f32 1.0, %v1543_v33 }
 0x3d3   :  { %1544 = vrcp.f32 %v385_v34 }
 0x3dd   :  { %v1545_v36 = vpop.eup %1544 }
 0x3de   :  { %v394_v40 = vmul.f32 %v1545_v36, %v392_v39 }
 0x441   :  { %v397_v37 = vpop.permute.xlu0 %396 }
 0x442   :  { %v399_v38 = vmul.f32 %v1545_v36, %v397_v37 }
 0x444   :  { %401 = vrot.lane.b32.xlu0 %v399_v38, %s1650_s29 }
 0x4b6   :  { %v402_v41 = vpop.permute.xlu0 %401 }
 0x4b7   :  { %v404_v42 = vadd.f32 %v402_v41, %v394_v40 }
 0x4b9   :  { %1546 = vtanh.f32 %v404_v42 }
 0x4c3   :  { %v1547_v43 = vpop.eup %1546 }
 0x4c4   :  { %407 = vrot.lane.b32.xlu1 %v1547_v43, %s1649_s3 }
 0x4c8   :  { %412 = vrot.lane.b32.xlu1 %v404_v42, %s1651_s30 }
 0x536   :  { %v408_v44 = vpop.permute.xlu1 %407 }
 0x537   :  { %v1837_v45 = vmul.f32 %v1545_v36, %v408_v44  ;;  %v790_v44 = vld [vmem:[#allocation2 + $0x8] sm:$0xc0] }
 0x539   :  { %417 = vrot.lane.b32.xlu0 %v1837_v45, %s1650_s29 }
 0x53a   :  { %v413_v46 = vpop.permute.xlu1 %412 }
 0x53b   :  { %415 = vst.msk [vmem:[#allocation4] sm:$0xf] %vm145_vm0, %v413_v46 }
 0x542   :  { %v526_v47 = vld [vmem:[#allocation4] sm:$0xf] }
 0x543   :  { %528 = vrot.lane.b32.xlu1 %v526_v47, %s1650_s29  ;;  %v788_v47 = vld [vmem:[#allocation2 + $0x10] sm:$0x3] }
 0x5ab   :  { %v418_v48 = vpop.permute.xlu0 %417 }
 0x5ac   :  { %420 = vst.msk [vmem:[#allocation3] sm:$0xf] %vm145_vm0, %v418_v48 }
 0x5ad   :  { %422 = vst.msk [vmem:[#allocation5 + $0x2] sm:$0x3] %vm280_vm4, %v418_v48  ;;  %v792_v48 = vrot.slane %v790_v44, 4 }
 0x5b3   :  { %v428_v49 = vld [vmem:[#allocation3] sm:$0xf] }
 0x5b4   :  { %1389 = vmatmul.mubr.msk.f32.vlgmr.msra.gmra.mrb[4].mxu1 %vm157_vm1, %v428_v49 }
 0x5b5   :  { %1474 = vmatpush1.bf16.msra.mxu1 %v1759_v25  ;;  %641 = vmatprep.mubr.f32.mxu1 %v1648_v7  ;;  %v529_v1 = vpop.permute.xlu1 %528 }
 0x5b6   :  { %1476 = vmatprep.subr.bf16.mxu1 %v1767_v29 }
 0x5b9   :  { %1478 = vmatpush1.bf16.msra.mxu1 %v1783_v35 }
 0x5ba   :  { %1488 = vmatprep.subr.bf16.mxu1 %v1757_v24 }
 0x687   :  { %v506_v52 = vpop.f32.mrb[4].mxu1 }
 0x688   :  { %v515_v53 = vadd.f32 %v513_v51, %v506_v52  ;;  %v508_v54 = vpop.f32.mrb[5].mxu1 }
 0x689   :  { %v517_v56 = vadd.f32 %v516_v55, %v508_v54 }
 0x68b   :  { %v518_v57 = vsel %vm239_vm3, %v515_v53, %v517_v56 }
 0x68c   :  { %1548 = vtanh.f32 %v518_v57  ;;  %v1390_v59 = vmul.f32 -1.442695, %v518_v57 }
 0x68e   :  { %1550 = vpow2.f32 %v1390_v59 }
 0x696   :  { %v1549_v58 = vpop.eup %1548 }
 0x697   :  { %533 = vrot.lane.b32.xlu0 %v1549_v58, %s1649_s3 }
 0x698   :  { %v1551_v60 = vpop.eup %1550 }
 0x699   :  { %v522_v61 = vadd.f32 1.0, %v1551_v60 }
 0x69b   :  { %1552 = vrcp.f32 %v522_v61 }
 0x6a5   :  { %v1553_v62 = vpop.eup %1552 }
 0x6a6   :  { %v531_v2 = vmul.f32 %v1553_v62, %v529_v1 }
 0x709   :  { %v534_v63 = vpop.permute.xlu0 %533 }
 0x70a   :  { %v536_v0 = vmul.f32 %v1553_v62, %v534_v63 }
 0x70c   :  { %538 = vrot.lane.b32.xlu0 %v536_v0, %s1650_s29 }
 0x77e   :  { %v539_v3 = vpop.permute.xlu0 %538 }
 0x77f   :  { %v541_v4 = vadd.f32 %v539_v3, %v531_v2 }
 0x781   :  { %1554 = vtanh.f32 %v541_v4 }
 0x78b   :  { %v1555_v5 = vpop.eup %1554 }
 0x78c   :  { %544 = vrot.lane.b32.xlu1 %v1555_v5, %s1649_s3 }
 0x790   :  { %549 = vrot.lane.b32.xlu1 %v541_v4, %s1651_s30 }
 0x7fe   :  { %v545_v6 = vpop.permute.xlu1 %544 }
 0x7ff   :  { %v1856_v8 = vmul.f32 %v1553_v62, %v545_v6 }
 0x801   :  { %554 = vrot.lane.b32.xlu0 %v1856_v8, %s1650_s29 }
 0x802   :  { %v550_v9 = vpop.permute.xlu1 %549 }
 0x803   :  { %552 = vst.msk [vmem:[#allocation4] sm:$0xf] %vm145_vm0, %v550_v9  ;;  %v923_v9 = vld [vmem:[#allocation2 + $0x10] sm:$0xc] }
 0x80a   :  { %v666_v10 = vld [vmem:[#allocation4] sm:$0xf] }
 0x80b   :  { %668 = vrot.lane.b32.xlu1 %v666_v10, %s1650_s29  ;;  %v928_v10 = vld [vmem:[#allocation2 + $0x8] sm:$0x30] }
 0x80c   :  { %v930_v13 = vrot.slane %v928_v10, 2 }
 0x873   :  { %v555_v11 = vpop.permute.xlu0 %554 }
 0x874   :  { %557 = vst.msk [vmem:[#allocation3] sm:$0xf] %vm145_vm0, %v555_v11 }
 0x875   :  { %559 = vst.msk [vmem:[#allocation5 + $0x4] sm:$0x3] %vm280_vm4, %v555_v11  ;;  %v925_v11 = vrot.slane %v923_v9, 2 }
 0x87b   :  { %v565_v12 = vld [vmem:[#allocation3] sm:$0xf] }
 0x87c   :  { %1391 = vmatmul.mubr.msk.f32.vlgmr.msra.gmra.mrb[6].mxu1 %vm157_vm1, %v565_v12 }
 0x87d   :  { %1490 = vmatpush1.bf16.msra.mxu1 %v1759_v25  ;;  %916 = vmatprep.mubr.f32.mxu1 %v1648_v7  ;;  %v669_v32 = vpop.permute.xlu1 %668 }
 0x87e   :  { %1492 = vmatprep.subr.bf16.mxu1 %v1767_v29 }
 0x881   :  { %1494 = vmatpush1.bf16.msra.mxu1 %v1783_v35 }
 0x882   :  { %1504 = vmatprep.subr.bf16.mxu1 %v1757_v24 }
 0x94f   :  { %v643_v17 = vpop.f32.mrb[6].mxu1 }
 0x950   :  { %v652_v19 = vadd.f32 %v650_v16, %v643_v17  ;;  %v645_v20 = vpop.f32.mrb[7].mxu1 }
 0x951   :  { %v657_v21 = vadd.f32 %v655_v18, %v645_v20 }
 0x953   :  { %v658_v22 = vsel %vm239_vm3, %v652_v19, %v657_v21 }
 0x954   :  { %1556 = vtanh.f32 %v658_v22  ;;  %v1392_v26 = vmul.f32 -1.442695, %v658_v22 }
 0x956   :  { %1558 = vpow2.f32 %v1392_v26 }
 0x95e   :  { %v1557_v23 = vpop.eup %1556 }
 0x95f   :  { %673 = vrot.lane.b32.xlu0 %v1557_v23, %s1649_s3 }
 0x960   :  { %v1559_v27 = vpop.eup %1558 }
 0x961   :  { %v662_v28 = vadd.f32 1.0, %v1559_v27 }
 0x963   :  { %1560 = vrcp.f32 %v662_v28 }
 0x96d   :  { %v1561_v24 = vpop.eup %1560 }
 0x96e   :  { %v671_v33 = vmul.f32 %v1561_v24, %v669_v32 }
 0x9d1   :  { %v674_v30 = vpop.permute.xlu0 %673 }
 0x9d2   :  { %v676_v31 = vmul.f32 %v1561_v24, %v674_v30 }
 0x9d4   :  { %678 = vrot.lane.b32.xlu0 %v676_v31, %s1650_s29 }
 0xa46   :  { %v679_v34 = vpop.permute.xlu0 %678 }
 0xa47   :  { %v681_v36 = vadd.f32 %v679_v34, %v671_v33 }
 0xa49   :  { %1562 = vtanh.f32 %v681_v36 }
 0xa53   :  { %v1563_v37 = vpop.eup %1562 }
 0xa54   :  { %684 = vrot.lane.b32.xlu1 %v1563_v37, %s1649_s3  ;;  %v1061_v37 = vld [vmem:[#allocation2 + $0x10] sm:$0x30] }
 0xa58   :  { %689 = vrot.lane.b32.xlu1 %v681_v36, %s1651_s30 }
 0xac6   :  { %v685_v38 = vpop.permute.xlu1 %684 }
 0xac7   :  { %v1875_v39 = vmul.f32 %v1561_v24, %v685_v38  ;;  %v1063_v38 = vrot.slane %v1061_v37, 4  ;;  %v1257_v37 = vld [vmem:[%s2044_s4 + $0x28] sm:$0xff] }
 0xac9   :  { %694 = vrot.lane.b32.xlu0 %v1875_v39, %s1650_s29 }
 0xaca   :  { %v690_v40 = vpop.permute.xlu1 %689 }
 0xacb   :  { %692 = vst.msk [vmem:[#allocation4] sm:$0xf] %vm145_vm0, %v690_v40 }
 0xad2   :  { %v803_v41 = vld [vmem:[#allocation4] sm:$0xf] }
 0xad3   :  { %805 = vrot.lane.b32.xlu1 %v803_v41, %s1650_s29 }
 0xb3b   :  { %v695_v42 = vpop.permute.xlu0 %694 }
 0xb3c   :  { %697 = vst.msk [vmem:[#allocation3] sm:$0xf] %vm145_vm0, %v695_v42 }
 0xb3d   :  { %699 = vst.msk [vmem:[#allocation5 + $0x6] sm:$0x3] %vm280_vm4, %v695_v42 }
 0xb43   :  { %v705_v43 = vld [vmem:[#allocation3] sm:$0xf] }
 0xb44   :  { %1393 = vmatmul.mubr.msk.f32.vlgmr.msra.gmra.mrb[4].mxu0 %vm157_vm1, %v705_v43  ;;  %v1066_v43 = vld [vmem:[#allocation2 + $0x8] sm:$0xc] }
 0xb45   :  { %1498 = vmatpush1.bf16.msra.mxu0 %v1759_v25  ;;  %1054 = vmatprep.mubr.f32.mxu0 %v1648_v7  ;;  %v806_v60 = vpop.permute.xlu1 %805 }
 0xb46   :  { %1500 = vmatprep.subr.bf16.mxu0 %v1767_v29 }
 0xb49   :  { %1502 = vmatpush1.bf16.msra.mxu0 %v1783_v35 }
 0xc17   :  { %v783_v46 = vpop.f32.mrb[4].mxu0 }
 0xc18   :  { %v789_v49 = vadd.f32 %v788_v47, %v783_v46  ;;  %v785_v50 = vpop.f32.mrb[5].mxu0 }
 0xc19   :  { %v794_v51 = vadd.f32 %v792_v48, %v785_v50 }
 0xc1b   :  { %v795_v52 = vsel %vm239_vm3, %v789_v49, %v794_v51 }
 0xc1c   :  { %1564 = vtanh.f32 %v795_v52  ;;  %v1394_v54 = vmul.f32 -1.442695, %v795_v52 }
 0xc1e   :  { %1566 = vpow2.f32 %v1394_v54 }
 0xc26   :  { %v1565_v53 = vpop.eup %1564 }
 0xc27   :  { %810 = vrot.lane.b32.xlu0 %v1565_v53, %s1649_s3 }
 0xc28   :  { %v1567_v55 = vpop.eup %1566 }
 0xc29   :  { %v799_v56 = vadd.f32 1.0, %v1567_v55 }
 0xc2b   :  { %1568 = vrcp.f32 %v799_v56 }
 0xc35   :  { %v1569_v57 = vpop.eup %1568 }
 0xc36   :  { %v808_v61 = vmul.f32 %v1569_v57, %v806_v60 }
 0xc99   :  { %v811_v58 = vpop.permute.xlu0 %810 }
 0xc9a   :  { %v813_v59 = vmul.f32 %v1569_v57, %v811_v58 }
 0xc9c   :  { %815 = vrot.lane.b32.xlu0 %v813_v59, %s1650_s29 }
 0xd0e   :  { %v816_v62 = vpop.permute.xlu0 %815 }
 0xd0f   :  { %v818_v63 = vadd.f32 %v816_v62, %v808_v61 }
 0xd11   :  { %1570 = vtanh.f32 %v818_v63 }
 0xd1b   :  { %v1571_v0 = vpop.eup %1570 }
 0xd1c   :  { %821 = vrot.lane.b32.xlu1 %v1571_v0, %s1649_s3 }
 0xd20   :  { %826 = vrot.lane.b32.xlu1 %v818_v63, %s1651_s30 }
 0xd8e   :  { %v822_v1 = vpop.permute.xlu1 %821 }
 0xd8f   :  { %v1893_v2 = vmul.f32 %v1569_v57, %v822_v1  ;;  %v1196_v1 = vld [vmem:[#allocation2 + $0x10] sm:$0xc0] }
 0xd91   :  { %831 = vrot.lane.b32.xlu0 %v1893_v2, %s1650_s29 }
 0xd92   :  { %v827_v3 = vpop.permute.xlu1 %826 }
 0xd93   :  { %829 = vst.msk [vmem:[#allocation4] sm:$0xf] %vm145_vm0, %v827_v3  ;;  %v1201_v3 = vld [vmem:[#allocation2 + $0x8] sm:$0x3] }
 0xd94   :  { %v1203_v9 = vrot.slane %v1201_v3, 6 }
 0xd9a   :  { %v941_v4 = vld [vmem:[#allocation4] sm:$0xf] }
 0xd9b   :  { %943 = vrot.lane.b32.xlu1 %v941_v4, %s1650_s29  ;;  %v1198_v4 = vrot.slane %v1196_v1, 6 }
 0xe03   :  { %v1899_v5 = vpop.permute.xlu0 %831 }
 0xe04   :  { %834 = vst.msk [vmem:[#allocation3] sm:$0xf] %vm145_vm0, %v1899_v5 }
 0xe0b   :  { %v840_v6 = vld [vmem:[#allocation3] sm:$0xf] }
 0xe0c   :  { %1395 = vmatmul.mubr.msk.f32.vlgmr.msra.gmra.mrb[8].mxu1 %vm157_vm1, %v840_v6 }
 0xe0d   :  { %1506 = vmatpush1.bf16.msra.mxu1 %v1759_v25  ;;  %1189 = vmatprep.mubr.f32.mxu1 %v1648_v7  ;;  %v944_v23 = vpop.permute.xlu1 %943 }
 0xe0e   :  { %1508 = vmatprep.subr.bf16.mxu1 %v1767_v29 }
 0xe11   :  { %1510 = vmatpush1.bf16.msra.mxu1 %v1783_v35 }
 0xedf   :  { %v918_v12 = vpop.f32.mrb[8].mxu1 }
 0xee0   :  { %v927_v15 = vadd.f32 %v925_v11, %v918_v12  ;;  %v920_v16 = vpop.f32.mrb[9].mxu1 }
 0xee1   :  { %v932_v17 = vadd.f32 %v930_v13, %v920_v16 }
 0xee3   :  { %v933_v18 = vsel %vm239_vm3, %v927_v15, %v932_v17 }
 0xee4   :  { %1572 = vtanh.f32 %v933_v18  ;;  %v1396_v25 = vmul.f32 -1.442695, %v933_v18 }
 0xee6   :  { %1574 = vpow2.f32 %v1396_v25 }
 0xeee   :  { %v1573_v19 = vpop.eup %1572 }
 0xeef   :  { %948 = vrot.lane.b32.xlu0 %v1573_v19, %s1649_s3 }
 0xef0   :  { %v1575_v20 = vpop.eup %1574 }
 0xef1   :  { %v937_v29 = vadd.f32 1.0, %v1575_v20 }
 0xef3   :  { %1576 = vrcp.f32 %v937_v29 }
 0xefd   :  { %v1577_v35 = vpop.eup %1576 }
 0xefe   :  { %v946_v26 = vmul.f32 %v1577_v35, %v944_v23 }
 0xf61   :  { %v949_v21 = vpop.permute.xlu0 %948 }
 0xf62   :  { %v951_v22 = vmul.f32 %v1577_v35, %v949_v21 }
 0xf64   :  { %953 = vrot.lane.b32.xlu0 %v951_v22, %s1650_s29 }
 0xfd6   :  { %v954_v27 = vpop.permute.xlu0 %953 }
 0xfd7   :  { %v956_v28 = vadd.f32 %v954_v27, %v946_v26  ;;  %v1252_v27 = vld [vmem:[%s2044_s4] sm:$0xff] }
 0xfd9   :  { %1578 = vtanh.f32 %v956_v28 }
 0xfe3   :  { %v1579_v24 = vpop.eup %1578 }
 0xfe4   :  { %959 = vrot.lane.b32.xlu1 %v1579_v24, %s1649_s3  ;;  %v1652_v24 = vmov 0.0|0.0  }
 0xfe5   :  { %1511 = vmatprep.subr.bf16.mxu0 %v1652_v24 }
 0xfe8   :  { %964 = vrot.lane.b32.xlu1 %v956_v28, %s1651_s30  ;;  %v1254_v28 = vld [vmem:[%s2044_s4 + $0x10] sm:$0xff] }
0x1056   :  { %v960_v30 = vpop.permute.xlu1 %959 }
0x1057   :  { %v1913_v31 = vmul.f32 %v1577_v35, %v960_v30 }
0x1059   :  { %969 = vrot.lane.b32.xlu0 %v1913_v31, %s1650_s29 }
0x105a   :  { %v965_v32 = vpop.permute.xlu1 %964 }
0x105b   :  { %967 = vst.msk [vmem:[#allocation4] sm:$0xf] %vm145_vm0, %v965_v32  ;;  %v1255_v32 = vld [vmem:[%s2044_s4 + $0x18] sm:$0xff] }
0x1062   :  { %v1076_v33 = vld [vmem:[#allocation4] sm:$0xf] }
0x1063   :  { %1078 = vrot.lane.b32.xlu1 %v1076_v33, %s1650_s29  ;;  %v1515_v33 = vpack.c.bf16 %v1255_v32, %v1254_v28 }
0x10cb   :  { %v1919_v34 = vpop.permute.xlu0 %969 }
0x10cc   :  { %972 = vst.msk [vmem:[#allocation3] sm:$0xf] %vm145_vm0, %v1919_v34 }
0x10d3   :  { %v978_v36 = vld [vmem:[#allocation3] sm:$0xf] }
0x10d4   :  { %1397 = vmatmul.mubr.msk.f32.vlgmr.msra.gmra.mrb[6].mxu0 %vm157_vm1, %v978_v36  ;;  %v1256_v36 = vld [vmem:[%s2044_s4 + $0x20] sm:$0xff] }
0x10d5   :  { %v1079_v54 = vpop.permute.xlu1 %1078  ;;  %1428 = vmatprep.mubr.msk.f32.mxu0 %vm1653_vm6, %v1648_v7 }
0x11a7   :  { %v1056_v40 = vpop.f32.mrb[6].mxu0 }
0x11a8   :  { %v1065_v41 = vadd.f32 %v1063_v38, %v1056_v40  ;;  %v1058_v42 = vpop.f32.mrb[7].mxu0  ;;  %v1518_v38 = vpack.c.bf16 %v1257_v37, %v1256_v36  ;;  %v1258_v40 = vld [vmem:[%s2044_s4 + $0x30] sm:$0xff] }
0x11a9   :  { %v1067_v44 = vadd.f32 %v1066_v43, %v1058_v42 }
0x11ab   :  { %v1068_v46 = vsel %vm239_vm3, %v1065_v41, %v1067_v44  ;;  %v1259_v41 = vld [vmem:[%s2044_s4 + $0x38] sm:$0xff] }
0x11ac   :  { %1580 = vtanh.f32 %v1068_v46  ;;  %v1398_v48 = vmul.f32 -1.442695, %v1068_v46  ;;  %v1521_v42 = vpack.c.bf16 %v1259_v41, %v1258_v40 }
0x11ae   :  { %1582 = vpow2.f32 %v1398_v48 }
0x11b6   :  { %v1581_v47 = vpop.eup %1580 }
0x11b7   :  { %1083 = vrot.lane.b32.xlu0 %v1581_v47, %s1649_s3 }
0x11b8   :  { %v1583_v49 = vpop.eup %1582 }
0x11b9   :  { %v1072_v50 = vadd.f32 1.0, %v1583_v49 }
0x11bb   :  { %1584 = vrcp.f32 %v1072_v50 }
0x11c5   :  { %v1585_v51 = vpop.eup %1584 }
0x11c6   :  { %v1081_v55 = vmul.f32 %v1585_v51, %v1079_v54 }
0x1229   :  { %v1084_v52 = vpop.permute.xlu0 %1083 }
0x122a   :  { %v1086_v53 = vmul.f32 %v1585_v51, %v1084_v52 }
0x122c   :  { %1088 = vrot.lane.b32.xlu0 %v1086_v53, %s1650_s29 }
0x129e   :  { %v1089_v56 = vpop.permute.xlu0 %1088 }
0x129f   :  { %v1091_v57 = vadd.f32 %v1089_v56, %v1081_v55 }
0x12a1   :  { %1586 = vtanh.f32 %v1091_v57 }
0x12ab   :  { %v1587_v58 = vpop.eup %1586 }
0x12ac   :  { %1094 = vrot.lane.b32.xlu1 %v1587_v58, %s1649_s3 }
0x12b0   :  { %1099 = vrot.lane.b32.xlu1 %v1091_v57, %s1651_s30 }
0x131e   :  { %v1095_v59 = vpop.permute.xlu1 %1094 }
0x131f   :  { %v1929_v60 = vmul.f32 %v1585_v51, %v1095_v59 }
0x1321   :  { %1104 = vrot.lane.b32.xlu0 %v1929_v60, %s1650_s29 }
0x1322   :  { %v1100_v61 = vpop.permute.xlu1 %1099 }
0x1323   :  { %1102 = vst.msk [vmem:[#allocation4] sm:$0xf] %vm145_vm0, %v1100_v61 }
0x132a   :  { %v1214_v62 = vld [vmem:[#allocation4] sm:$0xf] }
0x132b   :  { %1216 = vrot.lane.b32.xlu1 %v1214_v62, %s1650_s29 }
0x1393   :  { %v1935_v63 = vpop.permute.xlu0 %1104 }
0x1394   :  { %1107 = vst.msk [vmem:[#allocation3] sm:$0xf] %vm145_vm0, %v1935_v63 }
0x139b   :  { %v1113_v0 = vld [vmem:[#allocation3] sm:$0xf] }
0x139c   :  { %1399 = vmatmul.mubr.msk.f32.vlgmr.msra.gmra.mrb[10].mxu1 %vm157_vm1, %v1113_v0 }
0x139d   :  { %v1217_v29 = vpop.permute.xlu1 %1216 }
0x146f   :  { %v1191_v6 = vpop.f32.mrb[10].mxu1 }
0x1470   :  { %v1200_v10 = vadd.f32 %v1198_v4, %v1191_v6  ;;  %v1193_v11 = vpop.f32.mrb[11].mxu1 }
0x1471   :  { %v1205_v12 = vadd.f32 %v1203_v9, %v1193_v11 }
0x1473   :  { %v1206_v13 = vsel %vm239_vm3, %v1200_v10, %v1205_v12 }
0x1474   :  { %1588 = vtanh.f32 %v1206_v13  ;;  %v1400_v16 = vmul.f32 -1.442695, %v1206_v13 }
0x1476   :  { %1590 = vpow2.f32 %v1400_v16 }
0x147e   :  { %v1589_v15 = vpop.eup %1588 }
0x147f   :  { %1221 = vrot.lane.b32.xlu0 %v1589_v15, %s1649_s3 }
0x1480   :  { %v1591_v17 = vpop.eup %1590 }
0x1481   :  { %v1210_v18 = vadd.f32 1.0, %v1591_v17 }
0x1483   :  { %1592 = vrcp.f32 %v1210_v18 }
0x148d   :  { %v1593_v19 = vpop.eup %1592 }
0x148e   :  { %v1219_v35 = vmul.f32 %v1593_v19, %v1217_v29 }
0x14f1   :  { %v1222_v25 = vpop.permute.xlu0 %1221 }
0x14f2   :  { %v1224_v20 = vmul.f32 %v1593_v19, %v1222_v25 }
0x14f4   :  { %1226 = vrot.lane.b32.xlu0 %v1224_v20, %s1650_s29 }
0x14f8   :  { %282 = vrot.lane.b32.xlu0 %v1818_v14, %s1649_s3  ;;  %v1253_v14 = vld [vmem:[%s2044_s4 + $0x8] sm:$0xff] }
0x14f9   :  { %v1512_v30 = vpack.c.bf16 %v1253_v14, %v1252_v27 }
0x14fb   :  { %1513 = vmatpush3.bf16.msra.mxu0 %v1512_v30 }
0x14fc   :  { %1514 = vmatprep.subr.bf16.mxu0 %v1652_v24 }
0x14ff   :  { %1516 = vmatpush3.bf16.msra.mxu0 %v1515_v33 }
0x1500   :  { %1517 = vmatprep.subr.bf16.mxu0 %v1652_v24 }
0x1503   :  { %1519 = vmatpush3.bf16.msra.mxu0 %v1518_v38 }
0x1504   :  { %1520 = vmatprep.subr.bf16.mxu0 %v1652_v24 }
0x1507   :  { %1522 = vmatpush3.bf16.msra.mxu0 %v1521_v42 }
0x1566   :  { %v1227_v21 = vpop.permute.xlu0 %1226 }
0x1567   :  { %v1945_v22 = vadd.f32 %v1227_v21, %v1219_v35 }
0x1569   :  { %1594 = vtanh.f32 %v1945_v22 }
0x156a   :  { %v283_v23 = vpop.permute.xlu0 %282 }
0x156b   :  { %287 = vst.msk [vmem:[#allocation5 + $0xc] sm:$0xc] %vm286_vm5, %v283_v23 }
0x1573   :  { %v1595_v26 = vpop.eup %1594 }
0x1574   :  { %1232 = vrot.lane.b32.xlu1 %v1595_v26, %s1649_s3 }
0x15e6   :  { %v1233_v43 = vpop.permute.xlu1 %1232 }
0x15e7   :  { %v1235_v44 = vmul.f32 %v1593_v19, %v1233_v43 }
0x15e9   :  { %1242 = vrot.lane.b32.xlu1 %v1235_v44, %s1650_s29 }
0x15ed   :  { %560 = vrot.lane.b32.xlu1 %v1856_v8, %s1649_s3 }
0x15f1   :  { %836 = vrot.lane.b32.xlu1 %v1893_v2, %s1649_s3  ;;  %v1401_v2 = vld [vmem:[%s2045_s5] ss:$0 sm:$0xff]  ;;  %s1654_s5 = smov [#allocation5]  }
0x15f2   :  { %s1358_s25 = sshll.u32 %s1654_s5, 4  ;;  %s1359_s25 = int_to_ptr.vmem [resolvable:$true] %s1358_s25 }
0x15f3   :  { %s1600_s1 = scalar_lea.vmem %s1359_s25, 256  ;;  %p1605_p1 = scmp.lt.s32.totalorder %s1359_s25, %s1359_s25 }
0x15f4   :  { %p1601_p0 = scmp.ne.s32.totalorder %s1359_s25, %s1600_s1  ;;  %p1606_p2 = scmp.lt.s32.totalorder %s1600_s1, %s1600_s1 }
0x15f5   :  { %1109 = vrot.lane.b32.xlu1 %v1929_v60, %s1649_s3 }
0x15f6   :  { %p1607_p3 = por %p1606_p2, %p1605_p1 }
0x15f8   :  { %p1608_p4 = pnand %p1607_p3, %p1601_p0 }
0x165b   :  { %v1243_v46 = vpop.permute.xlu1 %1242 }
0x165c   :  { %1245 = vst.msk [vmem:[#allocation3] sm:$0xf] %vm145_vm0, %v1243_v46 }
0x165d   :  { %1246 = vst.msk [vmem:[#allocation5 + $0xe] sm:$0x3] %vm280_vm4, %v1243_v46 }
0x165f   :  { %v561_v7 = vpop.permute.xlu1 %560 }
0x1660   :  { %564 = vst.msk [vmem:[#allocation5 + $0x8] sm:$0xc] %vm286_vm5, %v561_v7 }
0x1661   :  { %973 = vst.msk [vmem:[#allocation5 + $0xa] sm:$0x3] %vm280_vm4, %v1919_v34 }
0x1663   :  { %v837_v47 = vpop.permute.xlu1 %836 }
0x1664   :  { %v1251_v48 = vld [vmem:[#allocation5 + $0xe] sm:$0x3]  ;;  %839 = vst.msk [vmem:[#allocation5 + $0x4] sm:$0xc] %vm286_vm5, %v837_v47 }
0x1665   :  { %1429 = vmatmul.mubr.msk.f32.vlgmr.msra.gmra.mrb[8].mxu0 %vm57_vm2, %v1251_v48 }
0x1667   :  { %v1110_v8 = vpop.permute.xlu1 %1109 }
0x1668   :  { %1112 = vst.msk [vmem:[#allocation5] sm:$0xc] %vm286_vm5, %v1110_v8 }
0x1738   :  { %v1336_v49 = vpop.f32.mrb[8].mxu0 }
0x1739   :  { %v1337_v50 = vadd.f32 %v1401_v2, %v1336_v49  ;;  %v1430_v51 = vpop.f32.mrb[9].mxu0 }
0x173b   :  { %v1341_v52 = vsel %vm1340_vm7, %v1337_v50, -inf }
0x173c   :  { %1342 = vmax.xlane.f32.xlu0 %v1341_v52 }
0x1752   :  { %423 = vrot.lane.b32.xlu0 %v1837_v45, %s1649_s3 }
0x1756   :  { %700 = vrot.lane.b32.xlu0 %v1875_v39, %s1649_s3 }
0x175a   :  { %974 = vrot.lane.b32.xlu0 %v1913_v31, %s1649_s3 }
0x175e   :  { %1247 = vrot.lane.b32.xlu0 %v1235_v44, %s1649_s3 }
0x17c9   :  { %v1343_v34 = vpop.xlane.xlu0 %1342 }
0x17ca   :  { %v1344_v53 = vsub.f32 %v1337_v50, %v1343_v34 }
0x17cc   :  { %v1345_v54 = vmul.f32 1.442695, %v1344_v53 }
0x17cd   :  { %v424_v55 = vpop.permute.xlu0 %423 }
0x17ce   :  { %1596 = vpow2.f32 %v1345_v54  ;;  %427 = vst.msk [vmem:[#allocation5 + $0xa] sm:$0xc] %vm286_vm5, %v424_v55 }
0x17cf   :  { %1108 = vst.msk [vmem:[#allocation5 + $0xc] sm:$0x3] %vm280_vm4, %v1935_v63 }
0x17d1   :  { %v701_v56 = vpop.permute.xlu0 %700 }
0x17d2   :  { %704 = vst.msk [vmem:[#allocation5 + $0x6] sm:$0xc] %vm286_vm5, %v701_v56 }
0x17d3   :  { %835 = vst.msk [vmem:[#allocation5 + $0x8] sm:$0x3] %vm280_vm4, %v1899_v5 }
0x17d5   :  { %v975_v45 = vpop.permute.xlu0 %974 }
0x17d6   :  { %977 = vst.msk [vmem:[#allocation5 + $0x2] sm:$0xc] %vm286_vm5, %v975_v45 }
0x17d8   :  { %v1597_v39 = vpop.eup %1596 }
0x17d9   :  { %v1248_v31 = vpop.permute.xlu0 %1247  ;;  %v1347_v57 = vsel %vm1340_vm7, %v1597_v39, 0.0 }
0x17da   :  { %1250 = vst.msk [vmem:[#allocation5 - $0x2] sm:$0xc] %vm286_vm5, %v1248_v31  ;;  %1348 = vadd.xlane.f32.xlu1 %v1347_v57 }
0x17eb   :  { %1237 = vrot.lane.b32.xlu1 %v1945_v22, %s1651_s30 }
0x17ec   :  { %1611 = shalt.err (!%p1608_p4)
}
0x17ed   :  { %s1612_s27 = scalar_lea.hbm %s2046_s6, 256 }
0x17ee   :  { %p1613_p5 = scmp.ne.s32.totalorder %s2046_s6, %s1612_s27  ;;  %p1616_p6 = scmp.lt.u32.totalorder %s1612_s27, %s2046_s6 }
0x17f0   :  { %p1618_p7 = pnand %p1616_p6, %p1613_p5 }
0x17f2   :  { %1621 = shalt.err (!%p1618_p7)
}
0x17f3   :  { %s1655_s8 = smov 2   ;;  %s1656_s11 = smov [#allocation7]  }
0x17f4   :  { %1364 = dma.vmem_to_hbm [thread:$0]  %s1359_s25, 256, %s2046_s6, [#allocation6], %s1650_s29, %s1650_s29, %s1655_s8  }
0x17f5   :  { %s1371_s12 = sshll.u32 %s1656_s11, 4  ;;  %s1372_s12 = int_to_ptr.vmem [resolvable:$true] %s1371_s12 }
0x17f6   :  { %s1622_s13 = scalar_lea.vmem %s1372_s12, 32  ;;  %p1627_p9 = scmp.lt.s32.totalorder %s1372_s12, %s1372_s12 }
0x17f7   :  { %p1623_p8 = scmp.ne.s32.totalorder %s1372_s12, %s1622_s13  ;;  %p1628_p10 = scmp.lt.s32.totalorder %s1622_s13, %s1622_s13 }
0x17f9   :  { %p1629_p11 = por %p1628_p10, %p1627_p9 }
0x17fb   :  { %p1630_p12 = pnand %p1629_p11, %p1623_p8 }
0x1867   :  { %v1349_v5 = vpop.xlane.xlu1 %1348 }
0x1868   :  { %1598 = vrcp.f32 %v1349_v5 }
0x186b   :  { %v1238_v58 = vpop.permute.xlu1 %1237 }
0x186c   :  { %1240 = vst.msk [vmem:[#allocation4] sm:$0xf] %vm145_vm0, %v1238_v58 }
0x1872   :  { %v1599_v59 = vpop.eup %1598 }
0x1873   :  { %v1351_v60 = vmul.f32 %v1599_v59, %v1597_v39 }
0x1875   :  { %1352 = vst.msk [vmem:[#allocation7] sm:$0x3] %vm1340_vm7, %v1351_v60 }
0x1876   :  { %1633 = shalt.err (!%p1630_p12)
}
0x1877   :  { %s1634_s14 = scalar_lea.hbm %s2047_s7, 32 }
0x1878   :  { %p1635_p13 = scmp.ne.s32.totalorder %s2047_s7, %s1634_s14  ;;  %p1638_p0 = scmp.lt.u32.totalorder %s1634_s14, %s2047_s7 }
0x187a   :  { %p1640_p1 = pnand %p1638_p0, %p1635_p13 }
0x187c   :  { %1643 = shalt.err (!%p1640_p1)
}
0x187d   :  { %1374 = dma.vmem_to_hbm [thread:$0]  %s1372_s12, 32, %s2047_s7, [#allocation8]  }
0x187e   :  { %1644 = dma.done.wait [#allocation6], 256  }
0x187f   :  { %1645 = vsyncadd [#allocation6], 4294967040 }
0x1880   :  { %1646 = dma.done.wait [#allocation8], 32  }
0x1881   :  { %1647 = vsyncadd [#allocation8], 4294967264 }
0x1882   :  { %1381 = vsyncpa [#allocation6], 1 }
0x1883   :  { %1382 = vsyncpa [#allocation8], 1 }

// kernel: lstm_model_forward.2
= control target key start
LH: loop header
LB: loop body
LE: loop exit
PB: predicated region body
PF: predicated region fallthrough
CT: control target
= control target key end

     0   :  { %v1646_v3 = vmov 0.0   ;;  %vm283_vm0 = vcmask 257024   ;;  %vm118_vm1 = vcmask 1043456   ;;  %vm1647_vm2 = vmmov 1   ;;  %s1649_s11 = smov 32   ;;  %s1650_s12 = smov 96   ;;  %s2198_s1 = inlined_call_operand.vmem [shape: f32[300,256], index: 1, kind: input, shape index: {}]   ;;  %s2199_s0 = inlined_call_operand.vmem [shape: f32[16,300], index: 0, kind: input, shape index: {}]   ;;  %s2200_s2 = inlined_call_operand.vmem [shape: f32[32,256], index: 2, kind: input, shape index: {}]   ;;  %s2201_s3 = inlined_call_operand.vmem [shape: f32[1,256], index: 3, kind: input, shape index: {}]   ;;  %s2202_s4 = inlined_call_operand.vmem [shape: f32[8,2,64], index: 4, kind: output, shape index: {}]  }
   0x1   :  { %v24_v0 = vld [vmem:[%s2198_s1 + $0x8] sm:$0xff]  ;;  %v26_v1 = vld [vmem:[%s2198_s1 + $0x18] sm:$0xff]  ;;  %v23_v2 = vld [vmem:[%s2198_s1] sm:$0xff]  ;;  %266 = vmatprep.mubr.f32.mxu1 %v1646_v3  ;;  %284 = vst.msk [vmem:[#allocation3] sm:$0xf] %vm283_vm0, %v1646_v3  ;;  %vm111_vm4 = vcmask 359424  }
   0x2   :  { %v1427_v4 = vpack.c.bf16 %v26_v1, %v24_v0  ;;  %v25_v5 = vld [vmem:[%s2198_s1 + $0x10] sm:$0xff]  ;;  %v28_v6 = vld [vmem:[%s2198_s1 + $0x28] sm:$0xff]  ;;  %v30_v7 = vld [vmem:[%s2198_s1 + $0x38] sm:$0xff]  ;;  %285 = vst.msk [vmem:[#allocation4] sm:$0xf] %vm283_vm0, %v1646_v3  ;;  %vm295_vm5 = vcmask 261120  }
   0x3   :  { %v1429_v8 = vpack.c.bf16 %v25_v5, %v23_v2  ;;  %v1431_v9 = vpack.c.bf16 %v30_v7, %v28_v6  ;;  %v27_v10 = vld [vmem:[%s2198_s1 + $0x20] sm:$0xff]  ;;  %v29_v11 = vld [vmem:[%s2198_s1 + $0x30] sm:$0xff]  ;;  %v32_v12 = vld [vmem:[%s2198_s1 + $0x48] sm:$0xff]  ;;  %vm377_vm6 = vcmask 1041408   ;;  %vm418_vm7 = vcmask 254976  }
   0x4   :  { %1428 = vmatprep.subr.bf16.mxu0 %v1427_v4  ;;  %v34_v13 = vld [vmem:[%s2198_s1 + $0x58] sm:$0xff]  ;;  %v1433_v14 = vpack.c.bf16 %v29_v11, %v27_v10  ;;  %v31_v16 = vld [vmem:[%s2198_s1 + $0x40] sm:$0xff]  ;;  %v33_v17 = vld [vmem:[%s2198_s1 + $0x50] sm:$0xff]  ;;  %vm424_vm8 = vcmask 519426  }
   0x5   :  { %1430 = vmatpush1.bf16.msra.mxu0 %v1429_v8  ;;  %v1435_v15 = vpack.c.bf16 %v34_v13, %v32_v12  ;;  %v36_v18 = vld [vmem:[%s2198_s1 + $0x68] sm:$0xff]  ;;  %v38_v19 = vld [vmem:[%s2198_s1 + $0x78] sm:$0xff]  ;;  %v1437_v20 = vpack.c.bf16 %v33_v17, %v31_v16  ;;  %v35_v22 = vld [vmem:[%s2198_s1 + $0x60] sm:$0xff] }
   0x6   :  { %1432 = vmatprep.subr.bf16.mxu0 %v1431_v9  ;;  %v1439_v21 = vpack.c.bf16 %v38_v19, %v36_v18  ;;  %v37_v23 = vld [vmem:[%s2198_s1 + $0x70] sm:$0xff]  ;;  %v40_v24 = vld [vmem:[%s2198_s1 + $0x88] sm:$0xff]  ;;  %v42_v25 = vld [vmem:[%s2198_s1 + $0x98] sm:$0xff] }
   0x7   :  { %v1441_v26 = vpack.c.bf16 %v37_v23, %v35_v22  ;;  %v1443_v27 = vpack.c.bf16 %v42_v25, %v40_v24  ;;  %v39_v28 = vld [vmem:[%s2198_s1 + $0x80] sm:$0xff]  ;;  %v41_v29 = vld [vmem:[%s2198_s1 + $0x90] sm:$0xff]  ;;  %v44_v30 = vld [vmem:[%s2198_s1 + $0xa8] sm:$0xff] }
   0x8   :  { %v46_v31 = vld [vmem:[%s2198_s1 + $0xb8] sm:$0xff]  ;;  %v1445_v32 = vpack.c.bf16 %v41_v29, %v39_v28  ;;  %v43_v34 = vld [vmem:[%s2198_s1 + $0xa0] sm:$0xff]  ;;  %v45_v35 = vld [vmem:[%s2198_s1 + $0xb0] sm:$0xff] }
   0x9   :  { %1434 = vmatpush1.bf16.msra.mxu0 %v1433_v14  ;;  %v1447_v33 = vpack.c.bf16 %v46_v31, %v44_v30  ;;  %v48_v36 = vld [vmem:[%s2198_s1 + $0xc8] sm:$0xff]  ;;  %v50_v37 = vld [vmem:[%s2198_s1 + $0xd8] sm:$0xff]  ;;  %v87_v40 = vld [vmem:[%s2198_s1 + $0x200] sm:$0xff]  ;;  %v1449_v42 = vpack.c.bf16 %v45_v35, %v43_v34 }
   0xa   :  { %1436 = vmatprep.subr.bf16.mxu0 %v1435_v15  ;;  %v88_v38 = vld [vmem:[%s2198_s1 + $0x208] sm:$0xff]  ;;  %v90_v39 = vld [vmem:[%s2198_s1 + $0x218] sm:$0xff]  ;;  %v89_v41 = vld [vmem:[%s2198_s1 + $0x210] sm:$0xff]  ;;  %v1451_v47 = vpack.c.bf16 %v50_v37, %v48_v36 }
   0xb   :  { %v47_v43 = vld [vmem:[%s2198_s1 + $0xc0] sm:$0xff]  ;;  %v49_v44 = vld [vmem:[%s2198_s1 + $0xd0] sm:$0xff]  ;;  %v1491_v45 = vpack.c.bf16 %v90_v39, %v88_v38  ;;  %v1493_v46 = vpack.c.bf16 %v89_v41, %v87_v40  ;;  %v52_v48 = vld [vmem:[%s2198_s1 + $0xe8] sm:$0xff] }
   0xc   :  { %v92_v49 = vld [vmem:[%s2198_s1 + $0x228] sm:$0xff]  ;;  %v94_v50 = vld [vmem:[%s2198_s1 + $0x238] sm:$0xff]  ;;  %v91_v53 = vld [vmem:[%s2198_s1 + $0x220] sm:$0xff]  ;;  %v1453_v58 = vpack.c.bf16 %v49_v44, %v47_v43 }
   0xd   :  { %1438 = vmatpush1.bf16.msra.mxu0 %v1437_v20  ;;  %v54_v51 = vld [vmem:[%s2198_s1 + $0xf8] sm:$0xff]  ;;  %1492 = vmatprep.subr.bf16.mxu1 %v1491_v45  ;;  %v1495_v52 = vpack.c.bf16 %v94_v50, %v92_v49  ;;  %v93_v54 = vld [vmem:[%s2198_s1 + $0x230] sm:$0xff]  ;;  %v51_v55 = vld [vmem:[%s2198_s1 + $0xe0] sm:$0xff] }
   0xe   :  { %1440 = vmatprep.subr.bf16.mxu0 %v1439_v21  ;;  %v53_v56 = vld [vmem:[%s2198_s1 + $0xf0] sm:$0xff]  ;;  %1494 = vmatpush1.bf16.msra.mxu1 %v1493_v46  ;;  %v1497_v57 = vpack.c.bf16 %v93_v54, %v91_v53  ;;  %v96_v59 = vld [vmem:[%s2198_s1 + $0x248] sm:$0xff]  ;;  %v98_v60 = vld [vmem:[%s2198_s1 + $0x258] sm:$0xf]  ;;  %v1455_v62 = vpack.c.bf16 %v54_v51, %v52_v48 }
   0xf   :  { %1496 = vmatprep.subr.bf16.mxu1 %v1495_v52  ;;  %vm1808_vm3 = vmpackc.low %vm118_vm1, %vm1647_vm2  ;;  %v1499_v63 = vpack.c.bf16 %v98_v60, %v96_v59  ;;  %v95_v0 = vld [vmem:[%s2198_s1 + $0x240] sm:$0xff]  ;;  %v97_v1 = vld [vmem:[%s2198_s1 + $0x250] sm:$0xf]  ;;  %v1457_v9 = vpack.c.bf16 %v53_v56, %v51_v55 }
  0x10   :  { %v18_v2 = vld [vmem:[%s2199_s0 + $0x8] sm:$0xff]  ;;  %v58_v5 = vld [vmem:[%s2198_s1 + $0x118] sm:$0xff]  ;;  %v1502_v6 = vpack.c.bf16 %v97_v1, %v95_v0  ;;  %v55_v11 = vld [vmem:[%s2198_s1 + $0x100] sm:$0xff] }
  0x11   :  { %1442 = vmatpush1.bf16.msra.mxu0 %v1441_v26  ;;  %v56_v4 = vld [vmem:[%s2198_s1 + $0x108] sm:$0xff]  ;;  %189 = vmatprep.mubr.f32.mxu0 %v18_v2  ;;  %v290_v8 = vld [vmem:[%s2200_s2 + $0x18] sm:$0xff]  ;;  %v57_v12 = vld [vmem:[%s2198_s1 + $0x110] sm:$0xff] }
  0x12   :  { %1444 = vmatprep.subr.bf16.mxu0 %v1443_v27  ;;  %1498 = vmatpush1.bf16.msra.mxu1 %v1497_v57  ;;  %v288_v7 = vld [vmem:[%s2200_s2 + $0x8] sm:$0xff]  ;;  %v1459_v10 = vpack.c.bf16 %v58_v5, %v56_v4  ;;  %v62_v14 = vld [vmem:[%s2198_s1 + $0x138] sm:$0xff]  ;;  %v287_v16 = vld [vmem:[%s2200_s2] sm:$0xff]  ;;  %v1461_v21 = vpack.c.bf16 %v57_v12, %v55_v11 }
  0x13   :  { %1501 = vmatprep.subr.msk.bf16.mxu1 %vm1808_vm3, %v1499_v63  ;;  %v60_v13 = vld [vmem:[%s2198_s1 + $0x128] sm:$0xff]  ;;  %v1847_v15 = vpack.c.bf16 %v290_v8, %v288_v7  ;;  %v289_v17 = vld [vmem:[%s2200_s2 + $0x10] sm:$0xff]  ;;  %v294_v20 = vld [vmem:[%s2200_s2 + $0x38] sm:$0xff] }
  0x14   :  { %v19_v18 = vld [vmem:[%s2199_s0 + $0x10] sm:$0xff]  ;;  %v292_v19 = vld [vmem:[%s2200_s2 + $0x28] sm:$0xff]  ;;  %v1463_v22 = vpack.c.bf16 %v62_v14, %v60_v13  ;;  %v59_v23 = vld [vmem:[%s2198_s1 + $0x120] sm:$0xff]  ;;  %v1876_v26 = vpack.c.bf16 %v289_v17, %v287_v16  ;;  %v101_v13 = vlaneseq }
  0x15   :  { %1446 = vmatpush1.bf16.msra.mxu0 %v1445_v32  ;;  %v61_v24 = vld [vmem:[%s2198_s1 + $0x130] sm:$0xff]  ;;  %v64_v25 = vld [vmem:[%s2198_s1 + $0x148] sm:$0xff]  ;;  %v66_v27 = vld [vmem:[%s2198_s1 + $0x158] sm:$0xff]  ;;  %v1882_v28 = vpack.c.bf16 %v294_v20, %v292_v19 }
  0x16   :  { %1448 = vmatprep.subr.bf16.mxu0 %v1447_v33  ;;  %1504 = vmatpush1.bf16.msk.msra.mxu1 %vm1808_vm3, %v1502_v6  ;;  %v291_v29 = vld [vmem:[%s2200_s2 + $0x20] sm:$0xff]  ;;  %v293_v30 = vld [vmem:[%s2200_s2 + $0x30] sm:$0xff]  ;;  %v22_v31 = vld [vmem:[%s2199_s0 + $0x28] sm:$0xff]  ;;  %v1465_v32 = vpack.c.bf16 %v61_v24, %v59_v23  ;;  %v1467_v33 = vpack.c.bf16 %v66_v27, %v64_v25  ;;  %v102_v14 = vshrl.u32 %v101_v13, 7 }
  0x17   :  { %1514 = vmatprep.subr.bf16.mxu1 %v1847_v15  ;;  %v63_v34 = vld [vmem:[%s2198_s1 + $0x140] sm:$0xff]  ;;  %v65_v35 = vld [vmem:[%s2198_s1 + $0x150] sm:$0xff]  ;;  %v1902_v36 = vpack.c.bf16 %v293_v30, %v291_v29  ;;  %v68_v37 = vld [vmem:[%s2198_s1 + $0x168] sm:$0xff] }
  0x18   :  { %v70_v38 = vld [vmem:[%s2198_s1 + $0x178] sm:$0xff]  ;;  %v1469_v39 = vpack.c.bf16 %v65_v35, %v63_v34  ;;  %v67_v41 = vld [vmem:[%s2198_s1 + $0x160] sm:$0xff]  ;;  %v72_v43 = vld [vmem:[%s2198_s1 + $0x188] sm:$0xff]  ;;  %v103_v16 = vsub.s32 0, %v102_v14 }
  0x19   :  { %1450 = vmatpush1.bf16.msra.mxu0 %v1449_v42  ;;  %1395 = vmatmul.mubr.msk.f32.vlgmr.msra.gmra.mrb[0].mxu1 %vm111_vm4, %v19_v18  ;;  %v1471_v40 = vpack.c.bf16 %v70_v38, %v68_v37  ;;  %v69_v42 = vld [vmem:[%s2198_s1 + $0x170] sm:$0xff]  ;;  %v74_v44 = vld [vmem:[%s2198_s1 + $0x198] sm:$0xff]  ;;  %v76_v49 = vld [vmem:[%s2198_s1 + $0x1a8] sm:$0xff]  ;;  %v107_v18 = vsub.s32 1, %v102_v14 }
  0x1a   :  { %1452 = vmatprep.subr.bf16.mxu0 %v1451_v47  ;;  %272 = vmatprep.mubr.f32.mxu1 %v1646_v3  ;;  %v1473_v45 = vpack.c.bf16 %v69_v42, %v67_v41  ;;  %v1475_v46 = vpack.c.bf16 %v74_v44, %v72_v43  ;;  %v71_v47 = vld [vmem:[%s2198_s1 + $0x180] sm:$0xff]  ;;  %v73_v48 = vld [vmem:[%s2198_s1 + $0x190] sm:$0xff]  ;;  %v78_v50 = vld [vmem:[%s2198_s1 + $0x1b8] sm:$0xff] }
  0x1b   :  { %1516 = vmatpush1.bf16.msra.mxu1 %v1876_v26  ;;  %v1477_v51 = vpack.c.bf16 %v73_v48, %v71_v47  ;;  %v1479_v52 = vpack.c.bf16 %v78_v50, %v76_v49  ;;  %v75_v53 = vld [vmem:[%s2198_s1 + $0x1a0] sm:$0xff]  ;;  %v77_v54 = vld [vmem:[%s2198_s1 + $0x1b0] sm:$0xff]  ;;  %v80_v55 = vld [vmem:[%s2198_s1 + $0x1c8] sm:$0xff] }
  0x1c   :  { %1518 = vmatprep.subr.bf16.mxu1 %v1882_v28  ;;  %v82_v56 = vld [vmem:[%s2198_s1 + $0x1d8] sm:$0xff]  ;;  %v1481_v57 = vpack.c.bf16 %v77_v54, %v75_v53  ;;  %v79_v59 = vld [vmem:[%s2198_s1 + $0x1c0] sm:$0xff]  ;;  %v81_v60 = vld [vmem:[%s2198_s1 + $0x1d0] sm:$0xff] }
  0x1d   :  { %1454 = vmatpush1.bf16.msra.mxu0 %v1453_v58  ;;  %1396 = vmatmul.mubr.msk.f32.gmra.mrb[2].mxu1 %vm111_vm4, %v22_v31  ;;  %v1483_v58 = vpack.c.bf16 %v82_v56, %v80_v55  ;;  %v84_v61 = vld [vmem:[%s2198_s1 + $0x1e8] sm:$0xff]  ;;  %v1485_v63 = vpack.c.bf16 %v81_v60, %v79_v59  ;;  %v83_v1 = vld [vmem:[%s2198_s1 + $0x1e0] sm:$0xff]  ;;  %v85_v2 = vld [vmem:[%s2198_s1 + $0x1f0] sm:$0xff] }
  0x1e   :  { %1456 = vmatprep.subr.bf16.mxu0 %v1455_v62  ;;  %502 = vmatprep.mubr.f32.mxu1 %v1646_v3  ;;  %v86_v62 = vld [vmem:[%s2198_s1 + $0x1f8] sm:$0xff]  ;;  %v1489_v4 = vpack.c.bf16 %v85_v2, %v83_v1  ;;  %v17_v5 = vld [vmem:[%s2199_s0] sm:$0xff] }
  0x1f   :  { %1520 = vmatpush1.bf16.msra.mxu1 %v1902_v36  ;;  %v1487_v0 = vpack.c.bf16 %v86_v62, %v84_v61  ;;  %v21_v6 = vld [vmem:[%s2199_s0 + $0x20] sm:$0xff]  ;;  %v20_v7 = vld [vmem:[%s2199_s0 + $0x18] sm:$0xff] }
  0x20   :  { %1522 = vmatprep.subr.bf16.mxu1 %v1847_v15  ;;  %v286_v8 = vld [vmem:[#allocation3] sm:$0xf] }
  0x21   :  { %1458 = vmatpush1.bf16.msra.mxu0 %v1457_v9  ;;  %v99_v17 = vld [vmem:[%s2201_s3] sm:$0x3]  ;;  %s1648_s3 = smov 64  }
  0x22   :  { %1460 = vmatprep.subr.bf16.mxu0 %v1459_v10  ;;  %v104_v19 = vrot.slane %v99_v17, %v103_v16  ;;  %v108_v20 = vrot.slane %v99_v17, %v107_v18 }
  0x25   :  { %1462 = vmatpush1.bf16.msra.mxu0 %v1461_v21 }
  0x26   :  { %1464 = vmatprep.subr.bf16.mxu0 %v1463_v22 }
  0x29   :  { %1466 = vmatpush1.bf16.msra.mxu0 %v1465_v32 }
  0x2a   :  { %1468 = vmatprep.subr.bf16.mxu0 %v1467_v33 }
  0x2d   :  { %1470 = vmatpush1.bf16.msra.mxu0 %v1469_v39 }
  0x2e   :  { %1472 = vmatprep.subr.bf16.mxu0 %v1471_v40 }
  0x31   :  { %1474 = vmatpush1.bf16.msra.mxu0 %v1473_v45  ;;  %v386_v45 = vld [vmem:[#allocation4] sm:$0xf] }
  0x32   :  { %1476 = vmatprep.subr.bf16.mxu0 %v1475_v46 }
  0x35   :  { %1478 = vmatpush1.bf16.msra.mxu0 %v1477_v51 }
  0x36   :  { %1480 = vmatprep.subr.bf16.mxu0 %v1479_v52 }
  0x39   :  { %1482 = vmatpush1.bf16.msra.mxu0 %v1481_v57 }
  0x3a   :  { %1484 = vmatprep.subr.bf16.mxu0 %v1483_v58 }
  0x3d   :  { %1486 = vmatpush1.bf16.msra.mxu0 %v1485_v63 }
  0x3e   :  { %1488 = vmatprep.subr.bf16.mxu0 %v1487_v0 }
  0x41   :  { %1490 = vmatpush1.bf16.msra.mxu0 %v1489_v4 }
  0x42   :  { %1506 = vmatprep.subr.bf16.mxu0 %v1847_v15 }
  0x44   :  { %190 = vmatmul.mubr.f32.vlgmr.msra.gmra.mrb[0].mxu0 %v17_v5 }
  0x45   :  { %195 = vmatprep.mubr.f32.mxu0 %v21_v6  ;;  %1508 = vmatpush1.bf16.msra.mxu0 %v1876_v26 }
  0x46   :  { %1510 = vmatprep.subr.bf16.mxu0 %v1882_v28 }
  0x48   :  { %196 = vmatmul.mubr.f32.gmra.mrb[2].mxu0 %v20_v7 }
  0x49   :  { %1512 = vmatpush1.bf16.msra.mxu0 %v1902_v36  ;;  %363 = vmatprep.mubr.f32.mxu0 %v1646_v3 }
  0x4c   :  { %1397 = vmatmul.mubr.msk.f32.vlgmr.msra.gmra.mrb[4].mxu0 %vm295_vm5, %v286_v8 }
  0xec   :  { %v268_v9 = vpop.f32.mrb[0].mxu1 }
  0xed   :  { %v270_v10 = vpop.f32.mrb[1].mxu1 }
  0xf0   :  { %v274_v11 = vpop.f32.mrb[2].mxu1 }
  0xf1   :  { %v276_v12 = vpop.f32.mrb[3].mxu1 }
 0x117   :  { %v191_v21 = vpop.f32.mrb[0].mxu0 }
 0x118   :  { %v192_v22 = vadd.f32 %v191_v21, %v104_v19  ;;  %v193_v23 = vpop.f32.mrb[1].mxu0 }
 0x119   :  { %v194_v24 = vadd.f32 %v193_v23, %v108_v20 }
 0x11a   :  { %v269_v25 = vadd.f32 %v268_v9, %v192_v22 }
 0x11b   :  { %v271_v27 = vadd.f32 %v270_v10, %v194_v24  ;;  %v197_v29 = vpop.f32.mrb[2].mxu0 }
 0x11c   :  { %279 = vst [vmem:[#allocation2] sm:$0xff] %v269_v25  ;;  %v198_v30 = vadd.f32 %v197_v29, %v104_v19  ;;  %v199_v31 = vpop.f32.mrb[3].mxu0 }
 0x11d   :  { %280 = vst [vmem:[#allocation2 + $0x8] sm:$0xff] %v271_v27  ;;  %v200_v32 = vadd.f32 %v199_v31, %v108_v20 }
 0x11e   :  { %v275_v33 = vadd.f32 %v274_v11, %v198_v30 }
 0x11f   :  { %v277_v34 = vadd.f32 %v276_v12, %v200_v32  ;;  %v365_v35 = vpop.f32.mrb[4].mxu0 }
 0x120   :  { %281 = vst [vmem:[#allocation2 + $0x10] sm:$0xff] %v275_v33  ;;  %v367_v37 = vpop.f32.mrb[5].mxu0 }
 0x121   :  { %282 = vst [vmem:[#allocation2 + $0x18] sm:$0xff] %v277_v34 }
 0x123   :  { %v370_v38 = vld [vmem:[#allocation2] sm:$0x3]  ;;  %v509_v63 = vld [vmem:[#allocation2] sm:$0xc]  ;;  %v649_v30 = vld [vmem:[#allocation2] sm:$0x30] }
 0x124   :  { %v371_v41 = vadd.f32 %v370_v38, %v365_v35  ;;  %v511_v1 = vrot.slane %v509_v63, 2  ;;  %v651_v31 = vrot.slane %v649_v30, 4 }
 0x128   :  { %v372_v39 = vld [vmem:[#allocation2 + $0x18] sm:$0xc0]  ;;  %v514_v0 = vld [vmem:[#allocation2 + $0x18] sm:$0x30]  ;;  %v654_v35 = vld [vmem:[#allocation2 + $0x18] sm:$0xc] }
 0x129   :  { %v374_v40 = vrot.slane %v372_v39, 4  ;;  %v516_v4 = vrot.slane %v514_v0, 2 }
 0x12b   :  { %v376_v42 = vadd.f32 %v374_v40, %v367_v37 }
 0x12d   :  { %v378_v43 = vsel %vm377_vm6, %v371_v41, %v376_v42 }
 0x12e   :  { %1582 = vtanh.f32 %v378_v43  ;;  %v1398_v46 = vmul.f32 -1.442695, %v378_v43 }
 0x130   :  { %1584 = vpow2.f32 %v1398_v46 }
 0x138   :  { %v1583_v44 = vpop.eup %1582 }
 0x139   :  { %393 = vrot.lane.b32.xlu0 %v1583_v44, %s1648_s3 }
 0x13a   :  { %v1585_v47 = vpop.eup %1584 }
 0x13b   :  { %v382_v48 = vadd.f32 1.0, %v1585_v47 }
 0x13d   :  { %388 = vrot.lane.b32.xlu0 %v386_v45, %s1649_s11  ;;  %1586 = vrcp.f32 %v382_v48 }
 0x147   :  { %v1587_v49 = vpop.eup %1586 }
 0x1ab   :  { %v394_v50 = vpop.permute.xlu0 %393 }
 0x1ac   :  { %v396_v51 = vmul.f32 %v1587_v49, %v394_v50 }
 0x1ae   :  { %398 = vrot.lane.b32.xlu1 %v396_v51, %s1649_s11 }
 0x1af   :  { %v389_v52 = vpop.permute.xlu0 %388 }
 0x1b0   :  { %v391_v53 = vmul.f32 %v1587_v49, %v389_v52 }
 0x220   :  { %v399_v54 = vpop.permute.xlu1 %398 }
 0x221   :  { %v401_v55 = vadd.f32 %v399_v54, %v391_v53 }
 0x223   :  { %1588 = vtanh.f32 %v401_v55 }
 0x22d   :  { %v1589_v56 = vpop.eup %1588 }
 0x22e   :  { %404 = vrot.lane.b32.xlu1 %v1589_v56, %s1648_s3 }
 0x232   :  { %409 = vrot.lane.b32.xlu1 %v401_v55, %s1650_s12 }
 0x2a0   :  { %v405_v57 = vpop.permute.xlu1 %404 }
 0x2a1   :  { %v1992_v58 = vmul.f32 %v1587_v49, %v405_v57  ;;  %v786_v57 = vld [vmem:[#allocation2] sm:$0xc0] }
 0x2a3   :  { %414 = vrot.lane.b32.xlu0 %v1992_v58, %s1649_s11 }
 0x2a4   :  { %v410_v59 = vpop.permute.xlu1 %409 }
 0x2a5   :  { %412 = vst.msk [vmem:[#allocation4] sm:$0xf] %vm283_vm0, %v410_v59  ;;  %v791_v59 = vld [vmem:[#allocation2 + $0x18] sm:$0x3] }
 0x2ac   :  { %v527_v60 = vld [vmem:[#allocation4] sm:$0xf] }
 0x2ad   :  { %529 = vrot.lane.b32.xlu1 %v527_v60, %s1649_s11  ;;  %v788_v60 = vrot.slane %v786_v57, 6 }
 0x315   :  { %v415_v61 = vpop.permute.xlu0 %414 }
 0x316   :  { %417 = vst.msk [vmem:[#allocation3] sm:$0xf] %vm283_vm0, %v415_v61 }
 0x317   :  { %419 = vst.msk [vmem:[%s2202_s4] sm:$0x3] %vm418_vm7, %v415_v61 }
 0x31d   :  { %v426_v62 = vld [vmem:[#allocation3] sm:$0xf] }
 0x31e   :  { %1400 = vmatmul.mubr.msk.f32.vlgmr.msra.gmra.mrb[4].mxu1 %vm295_vm5, %v426_v62  ;;  %v793_v62 = vrot.slane %v791_v59, 6 }
 0x31f   :  { %1524 = vmatpush1.bf16.msra.mxu1 %v1876_v26  ;;  %642 = vmatprep.mubr.f32.mxu1 %v1646_v3  ;;  %v530_v17 = vpop.permute.xlu1 %529 }
 0x320   :  { %1526 = vmatprep.subr.bf16.mxu1 %v1882_v28 }
 0x323   :  { %1528 = vmatpush1.bf16.msra.mxu1 %v1902_v36 }
 0x324   :  { %1530 = vmatprep.subr.bf16.mxu1 %v1847_v15 }
 0x3f1   :  { %v504_v2 = vpop.f32.mrb[4].mxu1 }
 0x3f2   :  { %v513_v5 = vadd.f32 %v511_v1, %v504_v2  ;;  %v506_v6 = vpop.f32.mrb[5].mxu1 }
 0x3f3   :  { %v518_v7 = vadd.f32 %v516_v4, %v506_v6 }
 0x3f5   :  { %v519_v8 = vsel %vm377_vm6, %v513_v5, %v518_v7 }
 0x3f6   :  { %1590 = vtanh.f32 %v519_v8  ;;  %v1401_v10 = vmul.f32 -1.442695, %v519_v8 }
 0x3f8   :  { %1592 = vpow2.f32 %v1401_v10 }
 0x400   :  { %v1591_v9 = vpop.eup %1590 }
 0x401   :  { %534 = vrot.lane.b32.xlu0 %v1591_v9, %s1648_s3 }
 0x402   :  { %v1593_v11 = vpop.eup %1592 }
 0x403   :  { %v523_v12 = vadd.f32 1.0, %v1593_v11 }
 0x405   :  { %1594 = vrcp.f32 %v523_v12 }
 0x40f   :  { %v1595_v13 = vpop.eup %1594 }
 0x410   :  { %v532_v18 = vmul.f32 %v1595_v13, %v530_v17 }
 0x473   :  { %v535_v14 = vpop.permute.xlu0 %534 }
 0x474   :  { %v537_v16 = vmul.f32 %v1595_v13, %v535_v14 }
 0x476   :  { %539 = vrot.lane.b32.xlu0 %v537_v16, %s1649_s11 }
 0x4e8   :  { %v540_v19 = vpop.permute.xlu0 %539 }
 0x4e9   :  { %v542_v20 = vadd.f32 %v540_v19, %v532_v18 }
 0x4eb   :  { %1596 = vtanh.f32 %v542_v20 }
 0x4f5   :  { %v1597_v21 = vpop.eup %1596 }
 0x4f6   :  { %545 = vrot.lane.b32.xlu1 %v1597_v21, %s1648_s3 }
 0x4fa   :  { %550 = vrot.lane.b32.xlu1 %v542_v20, %s1650_s12 }
 0x568   :  { %v546_v22 = vpop.permute.xlu1 %545 }
 0x569   :  { %v2014_v23 = vmul.f32 %v1595_v13, %v546_v22 }
 0x56b   :  { %555 = vrot.lane.b32.xlu0 %v2014_v23, %s1649_s11 }
 0x56c   :  { %v551_v24 = vpop.permute.xlu1 %550 }
 0x56d   :  { %553 = vst.msk [vmem:[#allocation4] sm:$0xf] %vm283_vm0, %v551_v24  ;;  %v928_v24 = vld [vmem:[#allocation2 + $0x8] sm:$0xc0] }
 0x574   :  { %v664_v25 = vld [vmem:[#allocation4] sm:$0xf] }
 0x575   :  { %666 = vrot.lane.b32.xlu1 %v664_v25, %s1649_s11 }
 0x5dd   :  { %v556_v27 = vpop.permute.xlu0 %555 }
 0x5de   :  { %558 = vst.msk [vmem:[#allocation3] sm:$0xf] %vm283_vm0, %v556_v27 }
 0x5df   :  { %1402 = vst.msk [vmem:[%s2202_s4 + $0x2] sm:$0x3] %vm418_vm7, %v556_v27  ;;  %v926_v27 = vld [vmem:[#allocation2 + $0x10] sm:$0x3] }
 0x5e5   :  { %v566_v29 = vld [vmem:[#allocation3] sm:$0xf] }
 0x5e6   :  { %1404 = vmatmul.mubr.msk.f32.vlgmr.msra.gmra.mrb[6].mxu1 %vm295_vm5, %v566_v29  ;;  %v930_v29 = vrot.slane %v928_v24, 4 }
 0x5e7   :  { %1532 = vmatpush1.bf16.msra.mxu1 %v1876_v26  ;;  %779 = vmatprep.mubr.f32.mxu1 %v1646_v3  ;;  %v667_v46 = vpop.permute.xlu1 %666 }
 0x5e8   :  { %1534 = vmatprep.subr.bf16.mxu1 %v1882_v28 }
 0x5eb   :  { %1536 = vmatpush1.bf16.msra.mxu1 %v1902_v36 }
 0x5ec   :  { %1538 = vmatprep.subr.bf16.mxu1 %v1847_v15 }
 0x6b9   :  { %v644_v32 = vpop.f32.mrb[6].mxu1 }
 0x6ba   :  { %v653_v33 = vadd.f32 %v651_v31, %v644_v32  ;;  %v646_v34 = vpop.f32.mrb[7].mxu1 }
 0x6bb   :  { %v655_v37 = vadd.f32 %v654_v35, %v646_v34 }
 0x6bd   :  { %v656_v38 = vsel %vm377_vm6, %v653_v33, %v655_v37 }
 0x6be   :  { %1598 = vtanh.f32 %v656_v38  ;;  %v1405_v40 = vmul.f32 -1.442695, %v656_v38 }
 0x6c0   :  { %1600 = vpow2.f32 %v1405_v40 }
 0x6c8   :  { %v1599_v39 = vpop.eup %1598 }
 0x6c9   :  { %671 = vrot.lane.b32.xlu0 %v1599_v39, %s1648_s3 }
 0x6ca   :  { %v1601_v41 = vpop.eup %1600 }
 0x6cb   :  { %v660_v42 = vadd.f32 1.0, %v1601_v41 }
 0x6cd   :  { %1602 = vrcp.f32 %v660_v42 }
 0x6d7   :  { %v1603_v43 = vpop.eup %1602 }
 0x6d8   :  { %v669_v47 = vmul.f32 %v1603_v43, %v667_v46 }
 0x73b   :  { %v672_v44 = vpop.permute.xlu0 %671 }
 0x73c   :  { %v674_v45 = vmul.f32 %v1603_v43, %v672_v44 }
 0x73e   :  { %676 = vrot.lane.b32.xlu0 %v674_v45, %s1649_s11 }
 0x7b0   :  { %v677_v48 = vpop.permute.xlu0 %676 }
 0x7b1   :  { %v679_v49 = vadd.f32 %v677_v48, %v669_v47 }
 0x7b3   :  { %1604 = vtanh.f32 %v679_v49 }
 0x7bd   :  { %v1605_v50 = vpop.eup %1604 }
 0x7be   :  { %682 = vrot.lane.b32.xlu1 %v1605_v50, %s1648_s3 }
 0x7c2   :  { %687 = vrot.lane.b32.xlu1 %v679_v49, %s1650_s12 }
 0x830   :  { %v683_v51 = vpop.permute.xlu1 %682 }
 0x831   :  { %v2036_v52 = vmul.f32 %v1603_v43, %v683_v51 }
 0x833   :  { %692 = vrot.lane.b32.xlu0 %v2036_v52, %s1649_s11 }
 0x834   :  { %v688_v53 = vpop.permute.xlu1 %687 }
 0x835   :  { %690 = vst.msk [vmem:[#allocation4] sm:$0xf] %vm283_vm0, %v688_v53 }
 0x83c   :  { %v804_v54 = vld [vmem:[#allocation4] sm:$0xf] }
 0x83d   :  { %806 = vrot.lane.b32.xlu1 %v804_v54, %s1649_s11  ;;  %v1061_v54 = vld [vmem:[#allocation2 + $0x10] sm:$0xc] }
 0x8a5   :  { %v693_v55 = vpop.permute.xlu0 %692 }
 0x8a6   :  { %695 = vst.msk [vmem:[#allocation3] sm:$0xf] %vm283_vm0, %v693_v55 }
 0x8a7   :  { %1406 = vst.msk [vmem:[%s2202_s4 + $0x4] sm:$0x3] %vm418_vm7, %v693_v55  ;;  %v1066_v55 = vld [vmem:[#allocation2 + $0x8] sm:$0x30] }
 0x8a8   :  { %v1068_v59 = vrot.slane %v1066_v55, 2 }
 0x8ad   :  { %v703_v56 = vld [vmem:[#allocation3] sm:$0xf] }
 0x8ae   :  { %1408 = vmatmul.mubr.msk.f32.vlgmr.msra.gmra.mrb[8].mxu1 %vm295_vm5, %v703_v56  ;;  %v1063_v56 = vrot.slane %v1061_v54, 2 }
 0x8af   :  { %1540 = vmatpush1.bf16.msra.mxu1 %v1876_v26  ;;  %919 = vmatprep.mubr.f32.mxu1 %v1646_v3  ;;  %v807_v11 = vpop.permute.xlu1 %806 }
 0x8b0   :  { %1542 = vmatprep.subr.bf16.mxu1 %v1882_v28 }
 0x8b3   :  { %1544 = vmatpush1.bf16.msra.mxu1 %v1902_v36 }
 0x8b4   :  { %1546 = vmatprep.subr.bf16.mxu1 %v1847_v15 }
 0x981   :  { %v781_v61 = vpop.f32.mrb[8].mxu1 }
 0x982   :  { %v790_v63 = vadd.f32 %v788_v60, %v781_v61  ;;  %v783_v0 = vpop.f32.mrb[9].mxu1 }
 0x983   :  { %v795_v1 = vadd.f32 %v793_v62, %v783_v0 }
 0x985   :  { %v796_v2 = vsel %vm377_vm6, %v790_v63, %v795_v1 }
 0x986   :  { %1606 = vtanh.f32 %v796_v2  ;;  %v1409_v5 = vmul.f32 -1.442695, %v796_v2 }
 0x988   :  { %1608 = vpow2.f32 %v1409_v5 }
 0x990   :  { %v1607_v4 = vpop.eup %1606 }
 0x991   :  { %811 = vrot.lane.b32.xlu0 %v1607_v4, %s1648_s3 }
 0x992   :  { %v1609_v6 = vpop.eup %1608 }
 0x993   :  { %v800_v7 = vadd.f32 1.0, %v1609_v6 }
 0x995   :  { %1610 = vrcp.f32 %v800_v7 }
 0x99f   :  { %v1611_v8 = vpop.eup %1610 }
 0x9a0   :  { %v809_v12 = vmul.f32 %v1611_v8, %v807_v11 }
 0xa03   :  { %v812_v9 = vpop.permute.xlu0 %811 }
 0xa04   :  { %v814_v10 = vmul.f32 %v1611_v8, %v812_v9 }
 0xa06   :  { %816 = vrot.lane.b32.xlu0 %v814_v10, %s1649_s11 }
 0xa78   :  { %v817_v13 = vpop.permute.xlu0 %816 }
 0xa79   :  { %v819_v14 = vadd.f32 %v817_v13, %v809_v12 }
 0xa7b   :  { %1612 = vtanh.f32 %v819_v14 }
 0xa85   :  { %v1613_v16 = vpop.eup %1612 }
 0xa86   :  { %822 = vrot.lane.b32.xlu1 %v1613_v16, %s1648_s3 }
 0xa8a   :  { %827 = vrot.lane.b32.xlu1 %v819_v14, %s1650_s12 }
 0xaf8   :  { %v823_v17 = vpop.permute.xlu1 %822 }
 0xaf9   :  { %v2058_v18 = vmul.f32 %v1611_v8, %v823_v17 }
 0xafb   :  { %832 = vrot.lane.b32.xlu0 %v2058_v18, %s1649_s11 }
 0xafc   :  { %v828_v19 = vpop.permute.xlu1 %827 }
 0xafd   :  { %830 = vst.msk [vmem:[#allocation4] sm:$0xf] %vm283_vm0, %v828_v19 }
 0xb04   :  { %v941_v20 = vld [vmem:[#allocation4] sm:$0xf] }
 0xb05   :  { %943 = vrot.lane.b32.xlu1 %v941_v20, %s1649_s11  ;;  %v1199_v20 = vld [vmem:[#allocation2 + $0x10] sm:$0x30] }
 0xb6d   :  { %v833_v21 = vpop.permute.xlu0 %832 }
 0xb6e   :  { %835 = vst.msk [vmem:[#allocation3] sm:$0xf] %vm283_vm0, %v833_v21 }
 0xb6f   :  { %1410 = vst.msk [vmem:[%s2202_s4 + $0x6] sm:$0x3] %vm418_vm7, %v833_v21  ;;  %v1201_v21 = vrot.slane %v1199_v20, 4 }
 0xb75   :  { %v843_v22 = vld [vmem:[#allocation3] sm:$0xf] }
 0xb76   :  { %1412 = vmatmul.mubr.msk.f32.vlgmr.msra.gmra.mrb[10].mxu1 %vm295_vm5, %v843_v22 }
 0xb77   :  { %1548 = vmatpush1.bf16.msra.mxu1 %v1876_v26  ;;  %1054 = vmatprep.mubr.f32.mxu1 %v1646_v3  ;;  %v944_v42 = vpop.permute.xlu1 %943 }
 0xb78   :  { %1550 = vmatprep.subr.bf16.mxu1 %v1882_v28 }
 0xb7b   :  { %1552 = vmatpush1.bf16.msra.mxu1 %v1902_v36 }
 0xb7c   :  { %1554 = vmatprep.subr.bf16.mxu1 %v1847_v15 }
 0xc49   :  { %v921_v25 = vpop.f32.mrb[10].mxu1 }
 0xc4a   :  { %v927_v30 = vadd.f32 %v926_v27, %v921_v25  ;;  %v923_v31 = vpop.f32.mrb[11].mxu1  ;;  %v1204_v27 = vld [vmem:[#allocation2 + $0x8] sm:$0xc] }
 0xc4b   :  { %v932_v32 = vadd.f32 %v930_v29, %v923_v31 }
 0xc4d   :  { %v933_v33 = vsel %vm377_vm6, %v927_v30, %v932_v32 }
 0xc4e   :  { %1614 = vtanh.f32 %v933_v33  ;;  %v1413_v35 = vmul.f32 -1.442695, %v933_v33 }
 0xc50   :  { %1616 = vpow2.f32 %v1413_v35 }
 0xc58   :  { %v1615_v34 = vpop.eup %1614 }
 0xc59   :  { %948 = vrot.lane.b32.xlu0 %v1615_v34, %s1648_s3 }
 0xc5a   :  { %v1617_v37 = vpop.eup %1616 }
 0xc5b   :  { %v937_v38 = vadd.f32 1.0, %v1617_v37 }
 0xc5d   :  { %1618 = vrcp.f32 %v937_v38 }
 0xc67   :  { %v1619_v39 = vpop.eup %1618 }
 0xc68   :  { %v946_v43 = vmul.f32 %v1619_v39, %v944_v42 }
 0xccb   :  { %v949_v40 = vpop.permute.xlu0 %948 }
 0xccc   :  { %v951_v41 = vmul.f32 %v1619_v39, %v949_v40 }
 0xcce   :  { %953 = vrot.lane.b32.xlu0 %v951_v41, %s1649_s11 }
 0xd40   :  { %v954_v44 = vpop.permute.xlu0 %953 }
 0xd41   :  { %v956_v45 = vadd.f32 %v954_v44, %v946_v43 }
 0xd43   :  { %1620 = vtanh.f32 %v956_v45 }
 0xd4d   :  { %v1621_v46 = vpop.eup %1620 }
 0xd4e   :  { %959 = vrot.lane.b32.xlu1 %v1621_v46, %s1648_s3  ;;  %v1334_v46 = vld [vmem:[#allocation2 + $0x10] sm:$0xc0] }
 0xd52   :  { %964 = vrot.lane.b32.xlu1 %v956_v45, %s1650_s12 }
 0xdc0   :  { %v960_v47 = vpop.permute.xlu1 %959 }
 0xdc1   :  { %v2080_v48 = vmul.f32 %v1619_v39, %v960_v47  ;;  %v1339_v47 = vld [vmem:[#allocation2 + $0x8] sm:$0x3] }
 0xdc3   :  { %969 = vrot.lane.b32.xlu0 %v2080_v48, %s1649_s11 }
 0xdc4   :  { %v965_v49 = vpop.permute.xlu1 %964 }
 0xdc5   :  { %967 = vst.msk [vmem:[#allocation4] sm:$0xf] %vm283_vm0, %v965_v49  ;;  %v1336_v49 = vrot.slane %v1334_v46, 6 }
 0xdcc   :  { %v1079_v50 = vld [vmem:[#allocation4] sm:$0xf] }
 0xdcd   :  { %1081 = vrot.lane.b32.xlu1 %v1079_v50, %s1649_s11 }
 0xe35   :  { %v2086_v51 = vpop.permute.xlu0 %969 }
 0xe36   :  { %972 = vst.msk [vmem:[#allocation3] sm:$0xf] %vm283_vm0, %v2086_v51 }
 0xe3d   :  { %v978_v53 = vld [vmem:[#allocation3] sm:$0xf] }
 0xe3e   :  { %1416 = vmatmul.mubr.msk.f32.vlgmr.msra.gmra.mrb[12].mxu1 %vm295_vm5, %v978_v53  ;;  %v1341_v53 = vrot.slane %v1339_v47, 6 }
 0xe3f   :  { %1556 = vmatpush1.bf16.msra.mxu1 %v1876_v26  ;;  %1192 = vmatprep.mubr.f32.mxu1 %v1646_v3  ;;  %v1082_v7 = vpop.permute.xlu1 %1081 }
 0xe40   :  { %1558 = vmatprep.subr.bf16.mxu1 %v1882_v28 }
 0xe43   :  { %1560 = vmatpush1.bf16.msra.mxu1 %v1902_v36 }
 0xe44   :  { %1562 = vmatprep.subr.bf16.mxu1 %v1847_v15 }
 0xf11   :  { %v1056_v57 = vpop.f32.mrb[12].mxu1 }
 0xf12   :  { %v1065_v60 = vadd.f32 %v1063_v56, %v1056_v57  ;;  %v1058_v61 = vpop.f32.mrb[13].mxu1 }
 0xf13   :  { %v1070_v62 = vadd.f32 %v1068_v59, %v1058_v61 }
 0xf15   :  { %v1071_v63 = vsel %vm377_vm6, %v1065_v60, %v1070_v62 }
 0xf16   :  { %1622 = vtanh.f32 %v1071_v63  ;;  %v1417_v1 = vmul.f32 -1.442695, %v1071_v63 }
 0xf18   :  { %1624 = vpow2.f32 %v1417_v1 }
 0xf20   :  { %v1623_v0 = vpop.eup %1622 }
 0xf21   :  { %1086 = vrot.lane.b32.xlu0 %v1623_v0, %s1648_s3 }
 0xf22   :  { %v1625_v2 = vpop.eup %1624 }
 0xf23   :  { %v1075_v4 = vadd.f32 1.0, %v1625_v2 }
 0xf25   :  { %1626 = vrcp.f32 %v1075_v4 }
 0xf2f   :  { %v1627_v15 = vpop.eup %1626 }
 0xf30   :  { %v1084_v8 = vmul.f32 %v1627_v15, %v1082_v7 }
 0xf93   :  { %v1087_v5 = vpop.permute.xlu0 %1086 }
 0xf94   :  { %v1089_v6 = vmul.f32 %v1627_v15, %v1087_v5 }
 0xf96   :  { %1091 = vrot.lane.b32.xlu0 %v1089_v6, %s1649_s11 }
0x1008   :  { %v1092_v9 = vpop.permute.xlu0 %1091 }
0x1009   :  { %v1094_v10 = vadd.f32 %v1092_v9, %v1084_v8 }
0x100b   :  { %1628 = vtanh.f32 %v1094_v10 }
0x1015   :  { %v1629_v11 = vpop.eup %1628 }
0x1016   :  { %1097 = vrot.lane.b32.xlu1 %v1629_v11, %s1648_s3 }
0x101a   :  { %1102 = vrot.lane.b32.xlu1 %v1094_v10, %s1650_s12 }
0x1088   :  { %v1098_v12 = vpop.permute.xlu1 %1097 }
0x1089   :  { %v2101_v13 = vmul.f32 %v1627_v15, %v1098_v12 }
0x108b   :  { %1107 = vrot.lane.b32.xlu0 %v2101_v13, %s1649_s11 }
0x108c   :  { %v1103_v14 = vpop.permute.xlu1 %1102 }
0x108d   :  { %1105 = vst.msk [vmem:[#allocation4] sm:$0xf] %vm283_vm0, %v1103_v14 }
0x1094   :  { %v1214_v16 = vld [vmem:[#allocation4] sm:$0xf] }
0x1095   :  { %1216 = vrot.lane.b32.xlu1 %v1214_v16, %s1649_s11 }
0x10fd   :  { %v2107_v17 = vpop.permute.xlu0 %1107 }
0x10fe   :  { %1110 = vst.msk [vmem:[#allocation3] sm:$0xf] %vm283_vm0, %v2107_v17 }
0x1105   :  { %v1116_v19 = vld [vmem:[#allocation3] sm:$0xf] }
0x1106   :  { %1420 = vmatmul.mubr.msk.f32.vlgmr.msra.gmra.mrb[14].mxu1 %vm295_vm5, %v1116_v19 }
0x1107   :  { %1564 = vmatpush1.bf16.msra.mxu1 %v1876_v26  ;;  %1327 = vmatprep.mubr.f32.mxu1 %v1646_v3  ;;  %v1217_v34 = vpop.permute.xlu1 %1216 }
0x1108   :  { %1566 = vmatprep.subr.bf16.mxu1 %v1882_v28 }
0x110b   :  { %1568 = vmatpush1.bf16.msra.mxu1 %v1902_v36 }
0x11d9   :  { %v1194_v22 = vpop.f32.mrb[14].mxu1 }
0x11da   :  { %v1203_v24 = vadd.f32 %v1201_v21, %v1194_v22  ;;  %v1196_v25 = vpop.f32.mrb[15].mxu1 }
0x11db   :  { %v1205_v29 = vadd.f32 %v1204_v27, %v1196_v25 }
0x11dd   :  { %v1206_v30 = vsel %vm377_vm6, %v1203_v24, %v1205_v29 }
0x11de   :  { %1630 = vtanh.f32 %v1206_v30  ;;  %v1421_v26 = vmul.f32 -1.442695, %v1206_v30 }
0x11e0   :  { %1632 = vpow2.f32 %v1421_v26 }
0x11e8   :  { %v1631_v31 = vpop.eup %1630 }
0x11e9   :  { %1221 = vrot.lane.b32.xlu0 %v1631_v31, %s1648_s3 }
0x11ea   :  { %v1633_v3 = vpop.eup %1632 }
0x11eb   :  { %v1210_v32 = vadd.f32 1.0, %v1633_v3 }
0x11ed   :  { %1634 = vrcp.f32 %v1210_v32 }
0x11f7   :  { %v1635_v28 = vpop.eup %1634 }
0x11f8   :  { %v1219_v35 = vmul.f32 %v1635_v28, %v1217_v34 }
0x125b   :  { %v1222_v36 = vpop.permute.xlu0 %1221 }
0x125c   :  { %v1224_v33 = vmul.f32 %v1635_v28, %v1222_v36 }
0x125e   :  { %1226 = vrot.lane.b32.xlu0 %v1224_v33, %s1649_s11 }
0x12d0   :  { %v1227_v37 = vpop.permute.xlu0 %1226 }
0x12d1   :  { %v1229_v38 = vadd.f32 %v1227_v37, %v1219_v35 }
0x12d3   :  { %1636 = vtanh.f32 %v1229_v38 }
0x12dd   :  { %v1637_v39 = vpop.eup %1636 }
0x12de   :  { %1232 = vrot.lane.b32.xlu1 %v1637_v39, %s1648_s3 }
0x12e2   :  { %1237 = vrot.lane.b32.xlu1 %v1229_v38, %s1650_s12 }
0x1350   :  { %v1233_v40 = vpop.permute.xlu1 %1232 }
0x1351   :  { %v1235_v41 = vmul.f32 %v1635_v28, %v1233_v40 }
0x1353   :  { %1242 = vrot.lane.b32.xlu0 %v1235_v41, %s1649_s11 }
0x1354   :  { %v1238_v42 = vpop.permute.xlu1 %1237 }
0x1355   :  { %1240 = vst.msk [vmem:[#allocation4] sm:$0xf] %vm283_vm0, %v1238_v42 }
0x135c   :  { %v1352_v43 = vld [vmem:[#allocation4] sm:$0xf] }
0x135d   :  { %1354 = vrot.lane.b32.xlu1 %v1352_v43, %s1649_s11 }
0x13c5   :  { %v1243_v44 = vpop.permute.xlu0 %1242 }
0x13c6   :  { %1245 = vst.msk [vmem:[#allocation3] sm:$0xf] %vm283_vm0, %v1243_v44 }
0x13cd   :  { %v1251_v45 = vld [vmem:[#allocation3] sm:$0xf] }
0x13ce   :  { %1424 = vmatmul.mubr.msk.f32.vlgmr.msra.gmra.mrb[16].mxu1 %vm295_vm5, %v1251_v45 }
0x13cf   :  { %v1355_v2 = vpop.permute.xlu1 %1354 }
0x14a1   :  { %v1329_v50 = vpop.f32.mrb[16].mxu1 }
0x14a2   :  { %v1338_v54 = vadd.f32 %v1336_v49, %v1329_v50  ;;  %v1331_v55 = vpop.f32.mrb[17].mxu1 }
0x14a3   :  { %v1343_v56 = vadd.f32 %v1341_v53, %v1331_v55 }
0x14a5   :  { %v1344_v57 = vsel %vm377_vm6, %v1338_v54, %v1343_v56 }
0x14a6   :  { %1638 = vtanh.f32 %v1344_v57  ;;  %v1425_v60 = vmul.f32 -1.442695, %v1344_v57 }
0x14a8   :  { %1640 = vpow2.f32 %v1425_v60 }
0x14b0   :  { %v1639_v59 = vpop.eup %1638 }
0x14b1   :  { %1359 = vrot.lane.b32.xlu0 %v1639_v59, %s1648_s3 }
0x14b2   :  { %v1641_v61 = vpop.eup %1640 }
0x14b3   :  { %v1348_v62 = vadd.f32 1.0, %v1641_v61 }
0x14b5   :  { %1642 = vrcp.f32 %v1348_v62 }
0x14bf   :  { %v1643_v63 = vpop.eup %1642 }
0x14c0   :  { %v1357_v4 = vmul.f32 %v1643_v63, %v1355_v2 }
0x1523   :  { %v1360_v0 = vpop.permute.xlu0 %1359 }
0x1524   :  { %v1362_v1 = vmul.f32 %v1643_v63, %v1360_v0 }
0x1526   :  { %1364 = vrot.lane.b32.xlu0 %v1362_v1, %s1649_s11 }
0x152a   :  { %420 = vrot.lane.b32.xlu0 %v1992_v58, %s1648_s3 }
0x152e   :  { %698 = vrot.lane.b32.xlu0 %v2036_v52, %s1648_s3 }
0x1532   :  { %974 = vrot.lane.b32.xlu0 %v2080_v48, %s1648_s3 }
0x1536   :  { %1247 = vrot.lane.b32.xlu0 %v1235_v41, %s1648_s3 }
0x1598   :  { %v1365_v15 = vpop.permute.xlu0 %1364 }
0x1599   :  { %v1367_v5 = vadd.f32 %v1365_v15, %v1357_v4 }
0x159b   :  { %1644 = vtanh.f32 %v1367_v5 }
0x159c   :  { %v421_v6 = vpop.permute.xlu0 %420 }
0x159d   :  { %1399 = vst.msk [vmem:[%s2202_s4 + $0xc] sm:$0xc] %vm424_vm8, %v421_v6 }
0x15a0   :  { %v699_v58 = vpop.permute.xlu0 %698 }
0x15a1   :  { %1407 = vst.msk [vmem:[%s2202_s4 + $0x8] sm:$0xc] %vm424_vm8, %v699_v58 }
0x15a2   :  { %1418 = vst.msk [vmem:[%s2202_s4 + $0xa] sm:$0x3] %vm418_vm7, %v2107_v17 }
0x15a4   :  { %v975_v52 = vpop.permute.xlu0 %974 }
0x15a5   :  { %v1645_v48 = vpop.eup %1644  ;;  %1415 = vst.msk [vmem:[%s2202_s4 + $0x4] sm:$0xc] %vm424_vm8, %v975_v52 }
0x15a6   :  { %1370 = vrot.lane.b32.xlu1 %v1645_v48, %s1648_s3 }
0x15a8   :  { %v1248_v7 = vpop.permute.xlu0 %1247 }
0x15a9   :  { %1423 = vst.msk [vmem:[%s2202_s4] sm:$0xc] %vm424_vm8, %v1248_v7 }
0x15aa   :  { %561 = vrot.lane.b32.xlu1 %v2014_v23, %s1648_s3 }
0x15ae   :  { %838 = vrot.lane.b32.xlu1 %v2058_v18, %s1648_s3 }
0x15b2   :  { %1112 = vrot.lane.b32.xlu1 %v2101_v13, %s1648_s3 }
0x15b6   :  { %1375 = vrot.lane.b32.xlu1 %v1367_v5, %s1650_s12 }
0x1618   :  { %v1371_v8 = vpop.permute.xlu1 %1370 }
0x1619   :  { %v1373_v9 = vmul.f32 %v1643_v63, %v1371_v8 }
0x161b   :  { %1385 = vrot.lane.b32.xlu1 %v1373_v9, %s1648_s3  ;;  %1380 = vrot.lane.b32.xlu0 %v1373_v9, %s1649_s11 }
0x161c   :  { %v562_v10 = vpop.permute.xlu1 %561 }
0x161d   :  { %1403 = vst.msk [vmem:[%s2202_s4 + $0xa] sm:$0xc] %vm424_vm8, %v562_v10 }
0x161e   :  { %1422 = vst.msk [vmem:[%s2202_s4 + $0xc] sm:$0x3] %vm418_vm7, %v1243_v44 }
0x1620   :  { %v839_v23 = vpop.permute.xlu1 %838 }
0x1621   :  { %1411 = vst.msk [vmem:[%s2202_s4 + $0x6] sm:$0xc] %vm424_vm8, %v839_v23 }
0x1622   :  { %1414 = vst.msk [vmem:[%s2202_s4 + $0x8] sm:$0x3] %vm418_vm7, %v2086_v51 }
0x1624   :  { %v1113_v18 = vpop.permute.xlu1 %1112 }
0x1625   :  { %1419 = vst.msk [vmem:[%s2202_s4 + $0x2] sm:$0xc] %vm424_vm8, %v1113_v18 }
0x1628   :  { %v1376_v11 = vpop.permute.xlu1 %1375 }
0x1629   :  { %1378 = vst.msk [vmem:[#allocation4] sm:$0xf] %vm283_vm0, %v1376_v11 }
0x168d   :  { %v1381_v12 = vpop.permute.xlu0 %1380  ;;  %v1386_v13 = vpop.permute.xlu1 %1385 }
0x168e   :  { %1383 = vst.msk [vmem:[#allocation3] sm:$0xf] %vm283_vm0, %v1381_v12 }
0x168f   :  { %1426 = vst.msk [vmem:[%s2202_s4 + $0xe] sm:$0x3] %vm418_vm7, %v1381_v12 }
0x1690   :  { %1388 = vst.msk [vmem:[%s2202_s4 - $0x2] sm:$0xc] %vm424_vm8, %v1386_v13 }

</bundles_post_ra>
